<compile_context>
chip_gen: v7x
topology: tpu7x:2x2x1
jax: 0.10.0
libtpu: 0.0.40
codegen_flags: <defaults>
</compile_context>

<pallas_src>
import functools

import jax
import jax.numpy as jnp
from jax import lax
from jax.experimental import pallas as pl
from jax.experimental.pallas import tpu as pltpu


_IMAGENET_MEAN = (0.485, 0.456, 0.406)
_IMAGENET_STD = (0.229, 0.224, 0.225)


def _round_up(x, m):
    return (x + m - 1) // m * m


@functools.lru_cache(maxsize=None)
def _tpu_vmem_capacity():
    """Per-TensorCore VMEM bytes (64 MiB v7x, 128 MiB v5e/v6e); conservative fallback."""
    try:
        info = pltpu.get_tpu_info()
        for name in ("vmem_capacity_bytes", "vmem_bytes", "vmem_size_bytes"):
            cap = getattr(info, name, None)
            if cap:
                return int(cap)
    except Exception:
        pass
    return 64 << 20          # assume the smallest (v7x) if the query is unavailable


def _tile_budget():
    # per-grid-step working-set target: ~5 MiB on v7x, ~10 MiB on v5e/v6e.
    return _tpu_vmem_capacity() // 12


def _vmem_limit(step_bytes):
    cap = _tpu_vmem_capacity()
    hi = cap * 3 // 4        # 48 MiB on v7x, 96 MiB on v5e/v6e
    return int(min(hi, max(32 << 20, step_bytes + (8 << 20))))


def _padded_bytes(shape, itemsize=4):
    """f32 VMEM footprint of a block: last dim -> 128 lanes, 2nd-to-last -> 8 sublanes."""
    dims = [int(d) for d in shape]
    if len(dims) >= 1:
        dims[-1] = _round_up(dims[-1], 128)
    if len(dims) >= 2:
        dims[-2] = _round_up(dims[-2], 8)
    n = 1
    for d in dims:
        n *= d
    return n * itemsize


def _pick_tile(n, per_unit_bytes, budget):
    """Largest divisor t of n with t * per_unit_bytes <= budget (at least 1)."""
    best = 1
    for t in range(1, n + 1):
        if n % t == 0 and t * per_unit_bytes <= budget:
            best = t
    return best


# --------------------------------------------------------------------------
# Normalization folding: (img/255 - mean)/std is affine per input channel and
# the patch-embed is linear, so fold it into weights/bias (mathematically exact;
# removes a full HBM read+write of both images).
# --------------------------------------------------------------------------
def fold_normalization(w, b, patch):
    """w: (3*patch*patch, N) with K ordered (channel, py, px); b: (N,)."""
    mean = jnp.array(_IMAGENET_MEAN, jnp.float32)
    std = jnp.array(_IMAGENET_STD, jnp.float32)
    scale = 1.0 / (255.0 * std)          # per RGB channel
    shift = -mean / std
    pp = patch * patch
    scale_rows = jnp.repeat(scale, pp)[:, None]
    shift_rows = jnp.repeat(shift, pp)[:, None]
    return w * scale_rows, b + jnp.sum(w * shift_rows, axis=0)


def patchify(x, p):
    B, C, H, W = x.shape
    x = x.reshape(B, C, H // p, p, W // p, p)
    x = x.transpose(0, 2, 4, 1, 3, 5)                      # (B, Hp, Wp, C, p, p)
    return x.reshape(B * (H // p) * (W // p), C * p * p), (B, H // p, W // p)


# --------------------------------------------------------------------------
# Kernel 1: tiled matmul + bias (+ optional ReLU) -- used for the stem_2 stand-in.
# --------------------------------------------------------------------------
def _matmul_bias_kernel(x_ref, w_ref, b_ref, o_ref, *, relu):
    y = jnp.dot(x_ref[...], w_ref[...], preferred_element_type=jnp.float32)
    y = y + b_ref[...]
    if relu:
        y = jnp.maximum(y, 0.0)
    o_ref[...] = y.astype(o_ref.dtype)


def matmul_bias(x, w, b, relu=False, out_dtype=jnp.float32, tm=1024):
    M, K = x.shape
    N = w.shape[1]
    tm = min(tm, _round_up(M, 8))
    Mp = _round_up(M, tm)
    xp = jnp.pad(x, ((0, Mp - M), (0, 0))) if Mp != M else x
    step = (_padded_bytes((tm, K)) + _padded_bytes((K, N)) + _padded_bytes((1, N))
            + _padded_bytes((tm, N)))
    out = pl.pallas_call(
        functools.partial(_matmul_bias_kernel, relu=relu),
        out_shape=jax.ShapeDtypeStruct((Mp, N), out_dtype),
        grid=(Mp // tm,),
        in_specs=[
            pl.BlockSpec((tm, K), lambda i: (i, 0)),
            pl.BlockSpec((K, N), lambda i: (0, 0)),
            pl.BlockSpec((1, N), lambda i: (0, 0)),
        ],
        out_specs=pl.BlockSpec((tm, N), lambda i: (i, 0)),
        compiler_params=pltpu.CompilerParams(
            dimension_semantics=("parallel",),
            vmem_limit_bytes=_vmem_limit(2 * step)),
    )(xp, w.astype(jnp.float32), b.reshape(1, N).astype(jnp.float32))
    return out[:M] if Mp != M else out


# --------------------------------------------------------------------------
# Kernel 2: fused patch-embed ("Feature" stand-in) + proj_cmb 1x1 conv.
# One HBM read of the patches yields both the 32-ch features and 12-ch projection.
# --------------------------------------------------------------------------
def _embed_proj_kernel(x_ref, wf_ref, bf_ref, wp_ref, bp_ref, feat_ref, proj_ref):
    feats = jnp.dot(x_ref[...], wf_ref[...], preferred_element_type=jnp.float32)
    feats = jnp.maximum(feats + bf_ref[...], 0.0)
    proj = jnp.dot(feats, wp_ref[...], preferred_element_type=jnp.float32) + bp_ref[...]
    feat_ref[...] = feats.astype(feat_ref.dtype)
    proj_ref[...] = proj.astype(proj_ref.dtype)


def embed_and_project(x, wf, bf, wp, bp, tm=1024):
    M, K = x.shape
    Nf, Np = wf.shape[1], wp.shape[1]
    tm = min(tm, _round_up(M, 8))
    Mp = _round_up(M, tm)
    xp = jnp.pad(x, ((0, Mp - M), (0, 0))) if Mp != M else x
    step = (_padded_bytes((tm, K)) + _padded_bytes((K, Nf)) + _padded_bytes((1, Nf))
            + _padded_bytes((Nf, Np)) + _padded_bytes((1, Np))
            + _padded_bytes((tm, Nf)) + _padded_bytes((tm, Np)))
    feat, proj = pl.pallas_call(
        _embed_proj_kernel,
        out_shape=(jax.ShapeDtypeStruct((Mp, Nf), jnp.float32),
                   jax.ShapeDtypeStruct((Mp, Np), jnp.float32)),
        grid=(Mp // tm,),
        in_specs=[
            pl.BlockSpec((tm, K), lambda i: (i, 0)),
            pl.BlockSpec((K, Nf), lambda i: (0, 0)),
            pl.BlockSpec((1, Nf), lambda i: (0, 0)),
            pl.BlockSpec((Nf, Np), lambda i: (0, 0)),
            pl.BlockSpec((1, Np), lambda i: (0, 0)),
        ],
        out_specs=(pl.BlockSpec((tm, Nf), lambda i: (i, 0)),
                   pl.BlockSpec((tm, Np), lambda i: (i, 0))),
        compiler_params=pltpu.CompilerParams(
            dimension_semantics=("parallel",),
            vmem_limit_bytes=_vmem_limit(2 * step)),
    )(xp, wf, bf.reshape(1, Nf), wp, bp.reshape(1, Np))
    if Mp != M:
        feat, proj = feat[:M], proj[:M]
    return feat, proj


# --------------------------------------------------------------------------
# Kernel 3: fused disparity head.  Per H-tile (grid over H only) it builds the
# gwc+concat cost volume implicitly, applies corr_stem's 1x1x1 conv + ReLU, the
# classifier and the softmax-over-disparity regression without ever writing the
# cost volume to HBM.  The group-mean and the proj halves of the corr_stem
# weights are pre-folded / hoisted so the per-disparity work is one VPU product,
# one (M,C)@(C,28) MXU dot and one (M,28)@(28,1) MXU dot.
# --------------------------------------------------------------------------
def _disp_head_kernel(lf_ref, rf_ref, lp_ref, rp_ref, wg_ref, wl_ref, wr_ref,
                      bcs_ref, wcls_ref, o_ref, *, D, w_size, pad_w):
    lf = lf_ref[...]                                   # (B, TH, W, C)   f32
    lp = lp_ref[...]                                   # (B, TH, W, Cp)
    rp = rp_ref[...]                                   # (B, TH, Wp, Cp) left-zero-padded
    B, TH, W, C = lf.shape
    Wp = rp.shape[2]
    Cp = lp.shape[-1]
    Nv = wg_ref.shape[-1]
    M = B * TH * W

    wg = wg_ref[...]                                   # (C, Nv) group-mean folded in
    wl = wl_ref[...]                                   # (Cp, Nv)
    wr = wr_ref[...]                                   # (Cp, Nv)
    bcs = bcs_ref[...]                                 # (1, Nv)
    wcls = wcls_ref[...]                               # (Nv, 1)

    # Hoisted out of the disparity loop: row masking / row shifting commute with
    # the right matmul, so the proj_l / proj_r corr_stem contributions are computed once.
    lp_wl = jnp.dot(lp.reshape(M, Cp), wl, preferred_element_type=jnp.float32)   # (M, Nv)
    rp_wr = jnp.dot(rp.reshape(B * TH * Wp, Cp), wr,
                    preferred_element_type=jnp.float32).reshape(B, TH, Wp, Nv)

    wcoord = lax.broadcasted_iota(jnp.int32, (B, TH, W, 1), 2).reshape(M, 1)

    m_run = jnp.full((M, 1), -jnp.inf, jnp.float32)    # online softmax over disparity
    s_run = jnp.zeros((M, 1), jnp.float32)
    a_run = jnp.zeros((M, 1), jnp.float32)

    for d in range(D):                                 # static unroll; D = max_disp // 4
        start = pad_w - d                              # zero-padded shift of the right image
        rf_d = rf_ref[:, :, start:start + w_size, :]   # (B, TH, W, C); zeros where w < d
        prod = (lf * rf_d).reshape(M, C)
        # corr_stem 1x1x1 conv on [gwc | proj_l | proj_r] + ReLU
        pre = (jnp.dot(prod, wg, preferred_element_type=jnp.float32)
               + jnp.where(wcoord >= d, lp_wl, 0.0)
               + rp_wr[:, :, start:start + w_size, :].reshape(M, Nv)
               + bcs)
        vol = jnp.maximum(pre, 0.0)
        # classifier (1x1x1, N=1) as an MXU dot instead of a lane-axis reduce
        logit = jnp.dot(vol, wcls, preferred_element_type=jnp.float32)            # (M, 1)
        m_new = jnp.maximum(m_run, logit)
        scale = jnp.exp(m_run - m_new)
        p = jnp.exp(logit - m_new)
        s_run = s_run * scale + p
        a_run = a_run * scale + p * float(d)
        m_run = m_new

    # Exact divide (not approx reciprocal): one divide per output pixel.
    o_ref[...] = (a_run / s_run).reshape(B, TH, W, 1)


def disparity_head(feat_l, feat_r, proj_l, proj_r, corr_w, corr_b, cls_w, D, groups):
    B, Hq, Wq, C = feat_l.shape
    Cp = proj_l.shape[-1]
    Nv = corr_w.shape[-1]
    assert C % groups == 0 and corr_w.shape[0] == groups + 2 * Cp
    cpg = C // groups

    # Fold the constant group-averaging matrix into the corr_stem weights:
    #   gwc @ W[:G] == (prod @ A) @ W[:G] == prod @ (A @ W[:G])
    avg = jnp.repeat(jnp.eye(groups, dtype=jnp.float32), cpg, axis=0) / float(cpg)   # (C, G)
    wg = avg @ corr_w[:groups].astype(jnp.float32)               # (C, Nv)
    wl = corr_w[groups:groups + Cp].astype(jnp.float32)          # (Cp, Nv)
    wr = corr_w[groups + Cp:].astype(jnp.float32)                # (Cp, Nv)

    # Pad H to a multiple of 8 so the H tile never collapses to 1-2 rows.
    Hp = _round_up(Hq, 8)
    if Hp != Hq:
        padH = ((0, 0), (0, Hp - Hq), (0, 0), (0, 0))
        feat_l, feat_r = jnp.pad(feat_l, padH), jnp.pad(feat_r, padH)
        proj_l, proj_r = jnp.pad(proj_l, padH), jnp.pad(proj_r, padH)

    # Left zero-pad of the right image along W supplies the w<d zeros of the volume.
    # TODO(synk): emit this padded layout directly from the embed kernel store to drop the copy.
    pad_w = D - 1
    if pad_w:
        padW = ((0, 0), (0, 0), (pad_w, 0), (0, 0))
        feat_r, proj_r = jnp.pad(feat_r, padW), jnp.pad(proj_r, padW)
    Wp = Wq + pad_w

    # Lane/sublane-padding-aware VMEM accounting (channel-minor dims pad to 128 lanes).
    per_row = (_padded_bytes((B, Wq, C)) + _padded_bytes((B, Wp, C))
               + _padded_bytes((B, Wq, Cp)) + _padded_bytes((B, Wp, Cp))
               + _padded_bytes((B, Wp, Nv))            # hoisted rp_wr temporary
               + 2 * _padded_bytes((B, Wq, Nv))        # pre / vol temporaries
               + _padded_bytes((B, Wq, 1)))
    tile_h = _pick_tile(Hp, per_row, _tile_budget())

    kern = functools.partial(_disp_head_kernel, D=D, w_size=Wq, pad_w=pad_w)
    out = pl.pallas_call(
        kern,
        out_shape=jax.ShapeDtypeStruct((B, Hp, Wq, 1), jnp.float32),
        grid=(Hp // tile_h,),
        in_specs=[
            pl.BlockSpec((B, tile_h, Wq, C), lambda h: (0, h, 0, 0)),
            pl.BlockSpec((B, tile_h, Wp, C), lambda h: (0, h, 0, 0)),
            pl.BlockSpec((B, tile_h, Wq, Cp), lambda h: (0, h, 0, 0)),
            pl.BlockSpec((B, tile_h, Wp, Cp), lambda h: (0, h, 0, 0)),
            pl.BlockSpec((C, Nv), lambda h: (0, 0)),
            pl.BlockSpec((Cp, Nv), lambda h: (0, 0)),
            pl.BlockSpec((Cp, Nv), lambda h: (0, 0)),
            pl.BlockSpec((1, Nv), lambda h: (0, 0)),
            pl.BlockSpec((Nv, 1), lambda h: (0, 0)),
        ],
        out_specs=pl.BlockSpec((B, tile_h, Wq, 1), lambda h: (0, h, 0, 0)),
        compiler_params=pltpu.CompilerParams(
            dimension_semantics=("parallel",),
            vmem_limit_bytes=_vmem_limit(2 * tile_h * per_row)),
    )(feat_l, feat_r, proj_l, proj_r, wg, wl, wr,
      corr_b.reshape(1, Nv).astype(jnp.float32),
      cls_w.reshape(Nv, 1).astype(jnp.float32))
    out = out[:, :Hq] if Hp != Hq else out
    # (B, Hq, Wq, 1) and (B, 1, Hq, Wq) share the same element order -> free reshape.
    return out.reshape(B, 1, Hq, Wq)


# --------------------------------------------------------------------------
# Parameter init (deterministic, synthetic)
# --------------------------------------------------------------------------
def init_params(key, feat_dim=32, proj_dim=12, vol_dim=28):
    ks = jax.random.split(key, 5)
    s = 0.05
    return {
        "feat_w": jax.random.normal(ks[0], (3 * 16, feat_dim), jnp.float32) * s,
        "feat_b": jnp.zeros((feat_dim,), jnp.float32),
        "stem2_w": jax.random.normal(ks[1], (3 * 4, 32), jnp.float32) * s,
        "stem2_b": jnp.zeros((32,), jnp.float32),
        "proj_w": jax.random.normal(ks[2], (feat_dim, proj_dim), jnp.float32) * s,
        "proj_b": jnp.zeros((proj_dim,), jnp.float32),
        "corr_stem_w": jax.random.normal(ks[3], (8 + 2 * proj_dim, vol_dim), jnp.float32) * s,
        "corr_stem_b": jnp.zeros((vol_dim,), jnp.float32),
        "cls_w": jax.random.normal(ks[4], (vol_dim, 1), jnp.float32) * s,
        "cls_b": jnp.zeros((1,), jnp.float32),   # unused: softmax is shift-invariant
    }


# --------------------------------------------------------------------------
# FoundationStereo.forward (test_mode=True style): cost-volume hot path
# --------------------------------------------------------------------------
def foundation_stereo_forward(params, image1, image2, max_disp=16, cv_group=8):
    B, _, H, W = image1.shape
    D = max_disp // 4

    # normalize_image folded into the linear patch-embed weights (exact).
    feat_w, feat_b = fold_normalization(params["feat_w"], params["feat_b"], 4)
    stem2_w, stem2_b = fold_normalization(params["stem2_w"], params["stem2_b"], 2)

    # "Feature" backbone stand-in: 1/4-res patch-embed fused with proj_cmb (1x1 conv).
    # TODO(synk): real Feature / ContextNetDino (timm EdgeNeXt + DINOv2 ViT) backbones not translated.
    x = jnp.concatenate([image1, image2], axis=0).astype(jnp.float32)
    xf, (B2, Hq, Wq) = patchify(x, 4)
    feat_flat, proj_flat = embed_and_project(xf, feat_w, feat_b,
                                             params["proj_w"], params["proj_b"])
    feats = feat_flat.reshape(B2, Hq, Wq, -1)             # channels-last (NHWC)
    proj = proj_flat.reshape(B2, Hq, Wq, -1)
    feat_l, feat_r = feats[:B], feats[B:]
    proj_l, proj_r = proj[:B], proj[B:]

    # stem_2 stand-in (stride-2 conv as 2x2 patch-embed); GRU/spx path that consumes it is skipped.
    s2f, (_, H2, W2) = patchify(image1.astype(jnp.float32), 2)
    stem_2x = matmul_bias(s2f, stem2_w, stem2_b, relu=True)
    stem_2x = stem_2x.reshape(B, H2, W2, -1).transpose(0, 3, 1, 2)   # NCHW only at the boundary

    # Fused disparity head: gwc+concat cost volume -> corr_stem 1x1x1 + ReLU -> classifier
    # -> softmax over disparity -> disparity regression, all inside one H-tiled kernel.
    # TODO(synk): remaining corr_stem 3x3x3 BasicConv/ResnetBasicBlock3D, corr_feature_att and the
    #             hourglass cost_agg (3-D convs, CostVolumeDisparityAttention, trilinear interp) not translated.
    init_disp = disparity_head(feat_l, feat_r, proj_l, proj_r,
                               params["corr_stem_w"], params["corr_stem_b"],
                               params["cls_w"], D, cv_group)          # (B, 1, H/4, W/4)

    # TODO(synk): GRU update_block iterations, Combined_Geo_Encoding_Volume lookups, SAM/CAM attention
    #             and learned convex (spx) upsampling not translated; bilinear upsample stand-in.
    disp_up = jax.image.resize(init_disp * 4.0, (B, 1, H, W), method="bilinear")
    return init_disp, disp_up, stem_2x


if __name__ == "__main__":
    key = jax.random.PRNGKey(0)
    k1, k2, kp = jax.random.split(key, 3)
    B, H, W = 1, 32, 32
    image1 = jax.random.uniform(k1, (B, 3, H, W), jnp.float32, minval=0.0, maxval=255.0)
    image2 = jax.random.uniform(k2, (B, 3, H, W), jnp.float32, minval=0.0, maxval=255.0)
    params = init_params(kp)

    fwd = jax.jit(functools.partial(foundation_stereo_forward, max_disp=16, cv_group=8))
    init_disp, disp_up, stem_2x = fwd(params, image1, image2)
    jax.block_until_ready((init_disp, disp_up, stem_2x))

    D = 16 // 4
    assert init_disp.shape == (B, 1, H // 4, W // 4)
    assert disp_up.shape == (B, 1, H, W)
    assert stem_2x.shape == (B, 32, H // 2, W // 2)
    assert bool(jnp.all(jnp.isfinite(init_disp)))
    assert bool(jnp.all(init_disp >= -1e-3)) and bool(jnp.all(init_disp <= (D - 1) + 1e-3))
    print("KERNEL_OK")
</pallas_src>

<mosaic_0001>
module attributes {stable_mosaic.version = 11 : i64} {
  func.func @_embed_proj_kernel(%arg0: i32, %arg1: memref<128x48xf32, #tpu.memory_space<vmem>>, %arg2: memref<48x32xf32, #tpu.memory_space<vmem>>, %arg3: memref<1x32xf32, #tpu.memory_space<vmem>>, %arg4: memref<32x12xf32, #tpu.memory_space<vmem>>, %arg5: memref<1x12xf32, #tpu.memory_space<vmem>>, %arg6: memref<128x32xf32, #tpu.memory_space<vmem>>, %arg7: memref<128x12xf32, #tpu.memory_space<vmem>>) attributes {dimension_semantics = [#tpu.dimension_semantics<parallel>], iteration_bounds = array<i64: 1>, scalar_prefetch = 0 : i64, scratch_operands = 0 : i64, tpu.core_type = #tpu.core_type<tc>, window_params = [{transform_indices = @transform_0, window_bounds = array<i64: 128, 48>}, {pipeline_mode = #tpu.pipeline_mode<synchronous>, transform_indices = @transform_1, window_bounds = array<i64: 48, 32>}, {pipeline_mode = #tpu.pipeline_mode<synchronous>, transform_indices = @transform_2, window_bounds = array<i64: 1, 32>}, {pipeline_mode = #tpu.pipeline_mode<synchronous>, transform_indices = @transform_3, window_bounds = array<i64: 32, 12>}, {pipeline_mode = #tpu.pipeline_mode<synchronous>, transform_indices = @transform_4, window_bounds = array<i64: 1, 12>}, {transform_indices = @transform_5, window_bounds = array<i64: 128, 32>}, {transform_indices = @transform_6, window_bounds = array<i64: 128, 12>}]} {
    %c0 = arith.constant 0 : index
    %c0_0 = arith.constant 0 : index
    %0 = vector.load %arg1[%c0, %c0_0] : memref<128x48xf32, #tpu.memory_space<vmem>>, vector<128x48xf32>
    %c0_1 = arith.constant 0 : index
    %c0_2 = arith.constant 0 : index
    %1 = vector.load %arg2[%c0_1, %c0_2] : memref<48x32xf32, #tpu.memory_space<vmem>>, vector<48x32xf32>
    %cst = arith.constant dense<0.000000e+00> : vector<128x32xf32>
    %2 = tpu.matmul %0, %1, %cst {dimension_numbers = #tpu.dot_dimension_numbers<[1], [0], [0], [1], [0, 0, 1, 1], [], []>} : vector<128x48xf32>, vector<48x32xf32>, vector<128x32xf32> -> vector<128x32xf32>
    %c0_3 = arith.constant 0 : index
    %c0_4 = arith.constant 0 : index
    %3 = vector.load %arg3[%c0_3, %c0_4] : memref<1x32xf32, #tpu.memory_space<vmem>>, vector<1x32xf32>
    %4 = vector.broadcast %3 : vector<1x32xf32> to vector<128x32xf32>
    %5 = arith.addf %2, %4 : vector<128x32xf32>
    %cst_5 = arith.constant 0.000000e+00 : f32
    %6 = vector.broadcast %cst_5 : f32 to vector<128x32xf32>
    %7 = arith.maximumf %5, %6 : vector<128x32xf32>
    %c0_6 = arith.constant 0 : index
    %c0_7 = arith.constant 0 : index
    %8 = vector.load %arg4[%c0_6, %c0_7] : memref<32x12xf32, #tpu.memory_space<vmem>>, vector<32x12xf32>
    %cst_8 = arith.constant dense<0.000000e+00> : vector<128x12xf32>
    %9 = tpu.matmul %7, %8, %cst_8 {dimension_numbers = #tpu.dot_dimension_numbers<[1], [0], [0], [1], [0, 0, 1, 1], [], []>} : vector<128x32xf32>, vector<32x12xf32>, vector<128x12xf32> -> vector<128x12xf32>
    %c0_9 = arith.constant 0 : index
    %c0_10 = arith.constant 0 : index
    %10 = vector.load %arg5[%c0_9, %c0_10] : memref<1x12xf32, #tpu.memory_space<vmem>>, vector<1x12xf32>
    %11 = vector.broadcast %10 : vector<1x12xf32> to vector<128x12xf32>
    %12 = arith.addf %9, %11 : vector<128x12xf32>
    %c0_11 = arith.constant 0 : index
    %c0_12 = arith.constant 0 : index
    %13 = vector.load %arg6[%c0_11, %c0_12] : memref<128x32xf32, #tpu.memory_space<vmem>>, vector<128x32xf32>
    tpu.vector_store %arg6[%c0_11, %c0_12], %7 {strides = array<i32>} : memref<128x32xf32, #tpu.memory_space<vmem>>, vector<128x32xf32>,
    %c0_13 = arith.constant 0 : index
    %c0_14 = arith.constant 0 : index
    %14 = vector.load %arg7[%c0_13, %c0_14] : memref<128x12xf32, #tpu.memory_space<vmem>>, vector<128x12xf32>
    tpu.vector_store %arg7[%c0_13, %c0_14], %12 {strides = array<i32>} : memref<128x12xf32, #tpu.memory_space<vmem>>, vector<128x12xf32>,
    return
  }
  func.func @transform_0(%arg0: i32) -> (i32, i32) {
    %c0_i32 = arith.constant 0 : i32
    %c0_i32_0 = arith.constant 0 : i32
    return %arg0, %c0_i32 : i32, i32
  }
  func.func @transform_1(%arg0: i32) -> (i32, i32) {
    %c0_i32 = arith.constant 0 : i32
    %c0_i32_0 = arith.constant 0 : i32
    %c0_i32_1 = arith.constant 0 : i32
    return %c0_i32, %c0_i32_0 : i32, i32
  }
  func.func @transform_2(%arg0: i32) -> (i32, i32) {
    %c0_i32 = arith.constant 0 : i32
    %c0_i32_0 = arith.constant 0 : i32
    %c0_i32_1 = arith.constant 0 : i32
    return %c0_i32, %c0_i32_0 : i32, i32
  }
  func.func @transform_3(%arg0: i32) -> (i32, i32) {
    %c0_i32 = arith.constant 0 : i32
    %c0_i32_0 = arith.constant 0 : i32
    %c0_i32_1 = arith.constant 0 : i32
    return %c0_i32, %c0_i32_0 : i32, i32
  }
  func.func @transform_4(%arg0: i32) -> (i32, i32) {
    %c0_i32 = arith.constant 0 : i32
    %c0_i32_0 = arith.constant 0 : i32
    %c0_i32_1 = arith.constant 0 : i32
    return %c0_i32, %c0_i32_0 : i32, i32
  }
  func.func @transform_5(%arg0: i32) -> (i32, i32) {
    %c0_i32 = arith.constant 0 : i32
    %c0_i32_0 = arith.constant 0 : i32
    return %arg0, %c0_i32 : i32, i32
  }
  func.func @transform_6(%arg0: i32) -> (i32, i32) {
    %c0_i32 = arith.constant 0 : i32
    %c0_i32_0 = arith.constant 0 : i32
    return %arg0, %c0_i32 : i32, i32
  }
}

module attributes {stable_mosaic.version = 11 : i64} {
  func.func @_disp_head_kernel(%arg0: i32, %arg1: memref<1x8x8x32xf32, #tpu.memory_space<vmem>>, %arg2: memref<1x8x11x32xf32, #tpu.memory_space<vmem>>, %arg3: memref<1x8x8x12xf32, #tpu.memory_space<vmem>>, %arg4: memref<1x8x11x12xf32, #tpu.memory_space<vmem>>, %arg5: memref<32x28xf32, #tpu.memory_space<vmem>>, %arg6: memref<12x28xf32, #tpu.memory_space<vmem>>, %arg7: memref<12x28xf32, #tpu.memory_space<vmem>>, %arg8: memref<1x28xf32, #tpu.memory_space<vmem>>, %arg9: memref<28x1xf32, #tpu.memory_space<vmem>>, %arg10: memref<1x8x8x1xf32, #tpu.memory_space<vmem>>) attributes {dimension_semantics = [#tpu.dimension_semantics<parallel>], iteration_bounds = array<i64: 1>, scalar_prefetch = 0 : i64, scratch_operands = 0 : i64, tpu.core_type = #tpu.core_type<tc>, window_params = [{transform_indices = @transform_0, window_bounds = array<i64: 1, 8, 8, 32>}, {transform_indices = @transform_1, window_bounds = array<i64: 1, 8, 11, 32>}, {transform_indices = @transform_2, window_bounds = array<i64: 1, 8, 8, 12>}, {transform_indices = @transform_3, window_bounds = array<i64: 1, 8, 11, 12>}, {pipeline_mode = #tpu.pipeline_mode<synchronous>, transform_indices = @transform_4, window_bounds = array<i64: 32, 28>}, {pipeline_mode = #tpu.pipeline_mode<synchronous>, transform_indices = @transform_5, window_bounds = array<i64: 12, 28>}, {pipeline_mode = #tpu.pipeline_mode<synchronous>, transform_indices = @transform_6, window_bounds = array<i64: 12, 28>}, {pipeline_mode = #tpu.pipeline_mode<synchronous>, transform_indices = @transform_7, window_bounds = array<i64: 1, 28>}, {pipeline_mode = #tpu.pipeline_mode<synchronous>, transform_indices = @transform_8, window_bounds = array<i64: 28, 1>}, {transform_indices = @transform_9, window_bounds = array<i64: 1, 8, 8, 1>}]} {
    %c0 = arith.constant 0 : index
    %c0_0 = arith.constant 0 : index
    %c0_1 = arith.constant 0 : index
    %c0_2 = arith.constant 0 : index
    %0 = vector.load %arg1[%c0, %c0_0, %c0_1, %c0_2] : memref<1x8x8x32xf32, #tpu.memory_space<vmem>>, vector<1x8x8x32xf32>
    %c0_3 = arith.constant 0 : index
    %c0_4 = arith.constant 0 : index
    %c0_5 = arith.constant 0 : index
    %c0_6 = arith.constant 0 : index
    %1 = vector.load %arg3[%c0_3, %c0_4, %c0_5, %c0_6] : memref<1x8x8x12xf32, #tpu.memory_space<vmem>>, vector<1x8x8x12xf32>
    %c0_7 = arith.constant 0 : index
    %c0_8 = arith.constant 0 : index
    %c0_9 = arith.constant 0 : index
    %c0_10 = arith.constant 0 : index
    %2 = vector.load %arg4[%c0_7, %c0_8, %c0_9, %c0_10] : memref<1x8x11x12xf32, #tpu.memory_space<vmem>>, vector<1x8x11x12xf32>
    %c0_11 = arith.constant 0 : index
    %c0_12 = arith.constant 0 : index
    %3 = vector.load %arg5[%c0_11, %c0_12] : memref<32x28xf32, #tpu.memory_space<vmem>>, vector<32x28xf32>
    %c0_13 = arith.constant 0 : index
    %c0_14 = arith.constant 0 : index
    %4 = vector.load %arg6[%c0_13, %c0_14] : memref<12x28xf32, #tpu.memory_space<vmem>>, vector<12x28xf32>
    %c0_15 = arith.constant 0 : index
    %c0_16 = arith.constant 0 : index
    %5 = vector.load %arg7[%c0_15, %c0_16] : memref<12x28xf32, #tpu.memory_space<vmem>>, vector<12x28xf32>
    %c0_17 = arith.constant 0 : index
    %c0_18 = arith.constant 0 : index
    %6 = vector.load %arg8[%c0_17, %c0_18] : memref<1x28xf32, #tpu.memory_space<vmem>>, vector<1x28xf32>
    %c0_19 = arith.constant 0 : index
    %c0_20 = arith.constant 0 : index
    %7 = vector.load %arg9[%c0_19, %c0_20] : memref<28x1xf32, #tpu.memory_space<vmem>>, vector<28x1xf32>
    %8 = vector.shape_cast %1 : vector<1x8x8x12xf32> to vector<64x12xf32>
    %cst = arith.constant dense<0.000000e+00> : vector<64x28xf32>
    %9 = tpu.matmul %8, %4, %cst {dimension_numbers = #tpu.dot_dimension_numbers<[1], [0], [0], [1], [0, 0, 1, 1], [], []>} : vector<64x12xf32>, vector<12x28xf32>, vector<64x28xf32> -> vector<64x28xf32>
    %10 = vector.shape_cast %2 : vector<1x8x11x12xf32> to vector<88x12xf32>
    %cst_21 = arith.constant dense<0.000000e+00> : vector<88x28xf32>
    %11 = tpu.matmul %10, %5, %cst_21 {dimension_numbers = #tpu.dot_dimension_numbers<[1], [0], [0], [1], [0, 0, 1, 1], [], []>} : vector<88x12xf32>, vector<12x28xf32>, vector<88x28xf32> -> vector<88x28xf32>
    %12 = vector.shape_cast %11 : vector<88x28xf32> to vector<1x8x11x28xf32>
    %13 = tpu.iota {dimensions = array<i32: 2>} : vector<1x8x8x1xi32>
    %14 = vector.shape_cast %13 : vector<1x8x8x1xi32> to vector<64x1xi32>
    %cst_22 = arith.constant 0xFF800000 : f32
    %15 = vector.broadcast %cst_22 : f32 to vector<64x1xf32>
    %cst_23 = arith.constant 0.000000e+00 : f32
    %16 = vector.broadcast %cst_23 : f32 to vector<64x1xf32>
    %cst_24 = arith.constant 0.000000e+00 : f32
    %17 = vector.broadcast %cst_24 : f32 to vector<64x1xf32>
    %c0_25 = arith.constant 0 : index
    %c0_26 = arith.constant 0 : index
    %c3 = arith.constant 3 : index
    %c0_27 = arith.constant 0 : index
    %18 = vector.load %arg2[%c0_25, %c0_26, %c3, %c0_27] : memref<1x8x11x32xf32, #tpu.memory_space<vmem>>, vector<1x8x8x32xf32>
    %19 = arith.mulf %0, %18 : vector<1x8x8x32xf32>
    %20 = vector.shape_cast %19 : vector<1x8x8x32xf32> to vector<64x32xf32>
    %cst_28 = arith.constant dense<0.000000e+00> : vector<64x28xf32>
    %21 = tpu.matmul %20, %3, %cst_28 {dimension_numbers = #tpu.dot_dimension_numbers<[1], [0], [0], [1], [0, 0, 1, 1], [], []>} : vector<64x32xf32>, vector<32x28xf32>, vector<64x28xf32> -> vector<64x28xf32>
    %c0_i32 = arith.constant 0 : i32
    %22 = vector.broadcast %c0_i32 : i32 to vector<64x1xi32>
    %23 = arith.cmpi sge, %14, %22 : vector<64x1xi32>
    %cst_29 = arith.constant 0.000000e+00 : f32
    %24 = vector.shape_cast %23 : vector<64x1xi1> to vector<64x1xi1>
    %25 = vector.broadcast %24 : vector<64x1xi1> to vector<64x28xi1>
    %26 = vector.broadcast %cst_29 : f32 to vector<64x28xf32>
    %27 = arith.select %25, %9, %26 : vector<64x28xi1>, vector<64x28xf32>
    %28 = arith.addf %21, %27 : vector<64x28xf32>
    %29 = vector.extract_strided_slice %12 {offsets = [0, 0, 3, 0], sizes = [1, 8, 8, 28], strides = [1, 1, 1, 1]} : vector<1x8x11x28xf32> to vector<1x8x8x28xf32>
    %30 = vector.shape_cast %29 : vector<1x8x8x28xf32> to vector<64x28xf32>
    %31 = arith.addf %28, %30 : vector<64x28xf32>
    %32 = vector.broadcast %6 : vector<1x28xf32> to vector<64x28xf32>
    %33 = arith.addf %31, %32 : vector<64x28xf32>
    %cst_30 = arith.constant 0.000000e+00 : f32
    %34 = vector.broadcast %cst_30 : f32 to vector<64x28xf32>
    %35 = arith.maximumf %33, %34 : vector<64x28xf32>
    %cst_31 = arith.constant dense<0.000000e+00> : vector<64x1xf32>
    %36 = tpu.matmul %35, %7, %cst_31 {dimension_numbers = #tpu.dot_dimension_numbers<[1], [0], [0], [1], [0, 0, 1, 1], [], []>} : vector<64x28xf32>, vector<28x1xf32>, vector<64x1xf32> -> vector<64x1xf32>
    %37 = arith.maximumf %15, %36 : vector<64x1xf32>
    %38 = arith.subf %15, %37 : vector<64x1xf32>
    %39 = math.exp %38 : vector<64x1xf32>
    %40 = arith.subf %36, %37 : vector<64x1xf32>
    %41 = math.exp %40 : vector<64x1xf32>
    %42 = arith.mulf %16, %39 : vector<64x1xf32>
    %43 = arith.addf %42, %41 : vector<64x1xf32>
    %44 = arith.mulf %17, %39 : vector<64x1xf32>
    %cst_32 = arith.constant 0.000000e+00 : f32
    %45 = vector.broadcast %cst_32 : f32 to vector<64x1xf32>
    %46 = arith.mulf %41, %45 : vector<64x1xf32>
    %47 = arith.addf %44, %46 : vector<64x1xf32>
    %c0_33 = arith.constant 0 : index
    %c0_34 = arith.constant 0 : index
    %c2 = arith.constant 2 : index
    %c0_35 = arith.constant 0 : index
    %48 = vector.load %arg2[%c0_33, %c0_34, %c2, %c0_35] : memref<1x8x11x32xf32, #tpu.memory_space<vmem>>, vector<1x8x8x32xf32>
    %49 = arith.mulf %0, %48 : vector<1x8x8x32xf32>
    %50 = vector.shape_cast %49 : vector<1x8x8x32xf32> to vector<64x32xf32>
    %cst_36 = arith.constant dense<0.000000e+00> : vector<64x28xf32>
    %51 = tpu.matmul %50, %3, %cst_36 {dimension_numbers = #tpu.dot_dimension_numbers<[1], [0], [0], [1], [0, 0, 1, 1], [], []>} : vector<64x32xf32>, vector<32x28xf32>, vector<64x28xf32> -> vector<64x28xf32>
    %c1_i32 = arith.constant 1 : i32
    %52 = vector.broadcast %c1_i32 : i32 to vector<64x1xi32>
    %53 = arith.cmpi sge, %14, %52 : vector<64x1xi32>
    %cst_37 = arith.constant 0.000000e+00 : f32
    %54 = vector.shape_cast %53 : vector<64x1xi1> to vector<64x1xi1>
    %55 = vector.broadcast %54 : vector<64x1xi1> to vector<64x28xi1>
    %56 = vector.broadcast %cst_37 : f32 to vector<64x28xf32>
    %57 = arith.select %55, %9, %56 : vector<64x28xi1>, vector<64x28xf32>
    %58 = arith.addf %51, %57 : vector<64x28xf32>
    %59 = vector.extract_strided_slice %12 {offsets = [0, 0, 2, 0], sizes = [1, 8, 8, 28], strides = [1, 1, 1, 1]} : vector<1x8x11x28xf32> to vector<1x8x8x28xf32>
    %60 = vector.shape_cast %59 : vector<1x8x8x28xf32> to vector<64x28xf32>
    %61 = arith.addf %58, %60 : vector<64x28xf32>
    %62 = vector.broadcast %6 : vector<1x28xf32> to vector<64x28xf32>
    %63 = arith.addf %61, %62 : vector<64x28xf32>
    %cst_38 = arith.constant 0.000000e+00 : f32
    %64 = vector.broadcast %cst_38 : f32 to vector<64x28xf32>
    %65 = arith.maximumf %63, %64 : vector<64x28xf32>
    %cst_39 = arith.constant dense<0.000000e+00> : vector<64x1xf32>
    %66 = tpu.matmul %65, %7, %cst_39 {dimension_numbers = #tpu.dot_dimension_numbers<[1], [0], [0], [1], [0, 0, 1, 1], [], []>} : vector<64x28xf32>, vector<28x1xf32>, vector<64x1xf32> -> vector<64x1xf32>
    %67 = arith.maximumf %37, %66 : vector<64x1xf32>
    %68 = arith.subf %37, %67 : vector<64x1xf32>
    %69 = math.exp %68 : vector<64x1xf32>
    %70 = arith.subf %66, %67 : vector<64x1xf32>
    %71 = math.exp %70 : vector<64x1xf32>
    %72 = arith.mulf %43, %69 : vector<64x1xf32>
    %73 = arith.addf %72, %71 : vector<64x1xf32>
    %74 = arith.mulf %47, %69 : vector<64x1xf32>
    %cst_40 = arith.constant 1.000000e+00 : f32
    %75 = vector.broadcast %cst_40 : f32 to vector<64x1xf32>
    %76 = arith.mulf %71, %75 : vector<64x1xf32>
    %77 = arith.addf %74, %76 : vector<64x1xf32>
    %c0_41 = arith.constant 0 : index
    %c0_42 = arith.constant 0 : index
    %c1 = arith.constant 1 : index
    %c0_43 = arith.constant 0 : index
    %78 = vector.load %arg2[%c0_41, %c0_42, %c1, %c0_43] : memref<1x8x11x32xf32, #tpu.memory_space<vmem>>, vector<1x8x8x32xf32>
    %79 = arith.mulf %0, %78 : vector<1x8x8x32xf32>
    %80 = vector.shape_cast %79 : vector<1x8x8x32xf32> to vector<64x32xf32>
    %cst_44 = arith.constant dense<0.000000e+00> : vector<64x28xf32>
    %81 = tpu.matmul %80, %3, %cst_44 {dimension_numbers = #tpu.dot_dimension_numbers<[1], [0], [0], [1], [0, 0, 1, 1], [], []>} : vector<64x32xf32>, vector<32x28xf32>, vector<64x28xf32> -> vector<64x28xf32>
    %c2_i32 = arith.constant 2 : i32
    %82 = vector.broadcast %c2_i32 : i32 to vector<64x1xi32>
    %83 = arith.cmpi sge, %14, %82 : vector<64x1xi32>
    %cst_45 = arith.constant 0.000000e+00 : f32
    %84 = vector.shape_cast %83 : vector<64x1xi1> to vector<64x1xi1>
    %85 = vector.broadcast %84 : vector<64x1xi1> to vector<64x28xi1>
    %86 = vector.broadcast %cst_45 : f32 to vector<64x28xf32>
    %87 = arith.select %85, %9, %86 : vector<64x28xi1>, vector<64x28xf32>
    %88 = arith.addf %81, %87 : vector<64x28xf32>
    %89 = vector.extract_strided_slice %12 {offsets = [0, 0, 1, 0], sizes = [1, 8, 8, 28], strides = [1, 1, 1, 1]} : vector<1x8x11x28xf32> to vector<1x8x8x28xf32>
    %90 = vector.shape_cast %89 : vector<1x8x8x28xf32> to vector<64x28xf32>
    %91 = arith.addf %88, %90 : vector<64x28xf32>
    %92 = vector.broadcast %6 : vector<1x28xf32> to vector<64x28xf32>
    %93 = arith.addf %91, %92 : vector<64x28xf32>
    %cst_46 = arith.constant 0.000000e+00 : f32
    %94 = vector.broadcast %cst_46 : f32 to vector<64x28xf32>
    %95 = arith.maximumf %93, %94 : vector<64x28xf32>
    %cst_47 = arith.constant dense<0.000000e+00> : vector<64x1xf32>
    %96 = tpu.matmul %95, %7, %cst_47 {dimension_numbers = #tpu.dot_dimension_numbers<[1], [0], [0], [1], [0, 0, 1, 1], [], []>} : vector<64x28xf32>, vector<28x1xf32>, vector<64x1xf32> -> vector<64x1xf32>
    %97 = arith.maximumf %67, %96 : vector<64x1xf32>
    %98 = arith.subf %67, %97 : vector<64x1xf32>
    %99 = math.exp %98 : vector<64x1xf32>
    %100 = arith.subf %96, %97 : vector<64x1xf32>
    %101 = math.exp %100 : vector<64x1xf32>
    %102 = arith.mulf %73, %99 : vector<64x1xf32>
    %103 = arith.addf %102, %101 : vector<64x1xf32>
    %104 = arith.mulf %77, %99 : vector<64x1xf32>
    %cst_48 = arith.constant 2.000000e+00 : f32
    %105 = vector.broadcast %cst_48 : f32 to vector<64x1xf32>
    %106 = arith.mulf %101, %105 : vector<64x1xf32>
    %107 = arith.addf %104, %106 : vector<64x1xf32>
    %c0_49 = arith.constant 0 : index
    %c0_50 = arith.constant 0 : index
    %c0_51 = arith.constant 0 : index
    %c0_52 = arith.constant 0 : index
    %108 = vector.load %arg2[%c0_49, %c0_50, %c0_51, %c0_52] : memref<1x8x11x32xf32, #tpu.memory_space<vmem>>, vector<1x8x8x32xf32>
    %109 = arith.mulf %0, %108 : vector<1x8x8x32xf32>
    %110 = vector.shape_cast %109 : vector<1x8x8x32xf32> to vector<64x32xf32>
    %cst_53 = arith.constant dense<0.000000e+00> : vector<64x28xf32>
    %111 = tpu.matmul %110, %3, %cst_53 {dimension_numbers = #tpu.dot_dimension_numbers<[1], [0], [0], [1], [0, 0, 1, 1], [], []>} : vector<64x32xf32>, vector<32x28xf32>, vector<64x28xf32> -> vector<64x28xf32>
    %c3_i32 = arith.constant 3 : i32
    %112 = vector.broadcast %c3_i32 : i32 to vector<64x1xi32>
    %113 = arith.cmpi sge, %14, %112 : vector<64x1xi32>
    %cst_54 = arith.constant 0.000000e+00 : f32
    %114 = vector.shape_cast %113 : vector<64x1xi1> to vector<64x1xi1>
    %115 = vector.broadcast %114 : vector<64x1xi1> to vector<64x28xi1>
    %116 = vector.broadcast %cst_54 : f32 to vector<64x28xf32>
    %117 = arith.select %115, %9, %116 : vector<64x28xi1>, vector<64x28xf32>
    %118 = arith.addf %111, %117 : vector<64x28xf32>
    %119 = vector.extract_strided_slice %12 {offsets = [0, 0, 0, 0], sizes = [1, 8, 8, 28], strides = [1, 1, 1, 1]} : vector<1x8x11x28xf32> to vector<1x8x8x28xf32>
    %120 = vector.shape_cast %119 : vector<1x8x8x28xf32> to vector<64x28xf32>
    %121 = arith.addf %118, %120 : vector<64x28xf32>
    %122 = vector.broadcast %6 : vector<1x28xf32> to vector<64x28xf32>
    %123 = arith.addf %121, %122 : vector<64x28xf32>
    %cst_55 = arith.constant 0.000000e+00 : f32
    %124 = vector.broadcast %cst_55 : f32 to vector<64x28xf32>
    %125 = arith.maximumf %123, %124 : vector<64x28xf32>
    %cst_56 = arith.constant dense<0.000000e+00> : vector<64x1xf32>
    %126 = tpu.matmul %125, %7, %cst_56 {dimension_numbers = #tpu.dot_dimension_numbers<[1], [0], [0], [1], [0, 0, 1, 1], [], []>} : vector<64x28xf32>, vector<28x1xf32>, vector<64x1xf32> -> vector<64x1xf32>
    %127 = arith.maximumf %97, %126 : vector<64x1xf32>
    %128 = arith.subf %97, %127 : vector<64x1xf32>
    %129 = math.exp %128 : vector<64x1xf32>
    %130 = arith.subf %126, %127 : vector<64x1xf32>
    %131 = math.exp %130 : vector<64x1xf32>
    %132 = arith.mulf %103, %129 : vector<64x1xf32>
    %133 = arith.addf %132, %131 : vector<64x1xf32>
    %134 = arith.mulf %107, %129 : vector<64x1xf32>
    %cst_57 = arith.constant 3.000000e+00 : f32
    %135 = vector.broadcast %cst_57 : f32 to vector<64x1xf32>
    %136 = arith.mulf %131, %135 : vector<64x1xf32>
    %137 = arith.addf %134, %136 : vector<64x1xf32>
    %138 = arith.divf %137, %133 : vector<64x1xf32>
    %139 = vector.shape_cast %138 : vector<64x1xf32> to vector<1x8x8x1xf32>
    %c0_58 = arith.constant 0 : index
    %c0_59 = arith.constant 0 : index
    %c0_60 = arith.constant 0 : index
    %c0_61 = arith.constant 0 : index
    %140 = vector.load %arg10[%c0_58, %c0_59, %c0_60, %c0_61] : memref<1x8x8x1xf32, #tpu.memory_space<vmem>>, vector<1x8x8x1xf32>
    tpu.vector_store %arg10[%c0_58, %c0_59, %c0_60, %c0_61], %139 {strides = array<i32>} : memref<1x8x8x1xf32, #tpu.memory_space<vmem>>, vector<1x8x8x1xf32>,
    return
  }
  func.func @transform_0(%arg0: i32) -> (i32, i32, i32, i32) {
    %c0_i32 = arith.constant 0 : i32
    %c0_i32_0 = arith.constant 0 : i32
    %c0_i32_1 = arith.constant 0 : i32
    %c0_i32_2 = arith.constant 0 : i32
    return %c0_i32, %arg0, %c0_i32_0, %c0_i32_1 : i32, i32, i32, i32
  }
  func.func @transform_1(%arg0: i32) -> (i32, i32, i32, i32) {
    %c0_i32 = arith.constant 0 : i32
    %c0_i32_0 = arith.constant 0 : i32
    %c0_i32_1 = arith.constant 0 : i32
    %c0_i32_2 = arith.constant 0 : i32
    return %c0_i32, %arg0, %c0_i32_0, %c0_i32_1 : i32, i32, i32, i32
  }
  func.func @transform_2(%arg0: i32) -> (i32, i32, i32, i32) {
    %c0_i32 = arith.constant 0 : i32
    %c0_i32_0 = arith.constant 0 : i32
    %c0_i32_1 = arith.constant 0 : i32
    %c0_i32_2 = arith.constant 0 : i32
    return %c0_i32, %arg0, %c0_i32_0, %c0_i32_1 : i32, i32, i32, i32
  }
  func.func @transform_3(%arg0: i32) -> (i32, i32, i32, i32) {
    %c0_i32 = arith.constant 0 : i32
    %c0_i32_0 = arith.constant 0 : i32
    %c0_i32_1 = arith.constant 0 : i32
    %c0_i32_2 = arith.constant 0 : i32
    return %c0_i32, %arg0, %c0_i32_0, %c0_i32_1 : i32, i32, i32, i32
  }
  func.func @transform_4(%arg0: i32) -> (i32, i32) {
    %c0_i32 = arith.constant 0 : i32
    %c0_i32_0 = arith.constant 0 : i32
    %c0_i32_1 = arith.constant 0 : i32
    return %c0_i32, %c0_i32_0 : i32, i32
  }
  func.func @transform_5(%arg0: i32) -> (i32, i32) {
    %c0_i32 = arith.constant 0 : i32
    %c0_i32_0 = arith.constant 0 : i32
    %c0_i32_1 = arith.constant 0 : i32
    return %c0_i32, %c0_i32_0 : i32, i32
  }
  func.func @transform_6(%arg0: i32) -> (i32, i32) {
    %c0_i32 = arith.constant 0 : i32
    %c0_i32_0 = arith.constant 0 : i32
    %c0_i32_1 = arith.constant 0 : i32
    return %c0_i32, %c0_i32_0 : i32, i32
  }
  func.func @transform_7(%arg0: i32) -> (i32, i32) {
    %c0_i32 = arith.constant 0 : i32
    %c0_i32_0 = arith.constant 0 : i32
    %c0_i32_1 = arith.constant 0 : i32
    return %c0_i32, %c0_i32_0 : i32, i32
  }
  func.func @transform_8(%arg0: i32) -> (i32, i32) {
    %c0_i32 = arith.constant 0 : i32
    %c0_i32_0 = arith.constant 0 : i32
    %c0_i32_1 = arith.constant 0 : i32
    return %c0_i32, %c0_i32_0 : i32, i32
  }
  func.func @transform_9(%arg0: i32) -> (i32, i32, i32, i32) {
    %c0_i32 = arith.constant 0 : i32
    %c0_i32_0 = arith.constant 0 : i32
    %c0_i32_1 = arith.constant 0 : i32
    %c0_i32_2 = arith.constant 0 : i32
    return %c0_i32, %arg0, %c0_i32_0, %c0_i32_1 : i32, i32, i32, i32
  }
}

module attributes {stable_mosaic.version = 11 : i64} {
  func.func @_matmul_bias_kernel(%arg0: i32, %arg1: memref<256x12xf32, #tpu.memory_space<vmem>>, %arg2: memref<12x32xf32, #tpu.memory_space<vmem>>, %arg3: memref<1x32xf32, #tpu.memory_space<vmem>>, %arg4: memref<256x32xf32, #tpu.memory_space<vmem>>) attributes {dimension_semantics = [#tpu.dimension_semantics<parallel>], iteration_bounds = array<i64: 1>, scalar_prefetch = 0 : i64, scratch_operands = 0 : i64, tpu.core_type = #tpu.core_type<tc>, window_params = [{transform_indices = @transform_0, window_bounds = array<i64: 256, 12>}, {pipeline_mode = #tpu.pipeline_mode<synchronous>, transform_indices = @transform_1, window_bounds = array<i64: 12, 32>}, {pipeline_mode = #tpu.pipeline_mode<synchronous>, transform_indices = @transform_2, window_bounds = array<i64: 1, 32>}, {transform_indices = @transform_3, window_bounds = array<i64: 256, 32>}]} {
    %c0 = arith.constant 0 : index
    %c0_0 = arith.constant 0 : index
    %0 = vector.load %arg1[%c0, %c0_0] : memref<256x12xf32, #tpu.memory_space<vmem>>, vector<256x12xf32>
    %c0_1 = arith.constant 0 : index
    %c0_2 = arith.constant 0 : index
    %1 = vector.load %arg2[%c0_1, %c0_2] : memref<12x32xf32, #tpu.memory_space<vmem>>, vector<12x32xf32>
    %cst = arith.constant dense<0.000000e+00> : vector<256x32xf32>
    %2 = tpu.matmul %0, %1, %cst {dimension_numbers = #tpu.dot_dimension_numbers<[1], [0], [0], [1], [0, 0, 1, 1], [], []>} : vector<256x12xf32>, vector<12x32xf32>, vector<256x32xf32> -> vector<256x32xf32>
    %c0_3 = arith.constant 0 : index
    %c0_4 = arith.constant 0 : index
    %3 = vector.load %arg3[%c0_3, %c0_4] : memref<1x32xf32, #tpu.memory_space<vmem>>, vector<1x32xf32>
    %4 = vector.broadcast %3 : vector<1x32xf32> to vector<256x32xf32>
    %5 = arith.addf %2, %4 : vector<256x32xf32>
    %cst_5 = arith.constant 0.000000e+00 : f32
    %6 = vector.broadcast %cst_5 : f32 to vector<256x32xf32>
    %7 = arith.maximumf %5, %6 : vector<256x32xf32>
    %c0_6 = arith.constant 0 : index
    %c0_7 = arith.constant 0 : index
    %8 = vector.load %arg4[%c0_6, %c0_7] : memref<256x32xf32, #tpu.memory_space<vmem>>, vector<256x32xf32>
    tpu.vector_store %arg4[%c0_6, %c0_7], %7 {strides = array<i32>} : memref<256x32xf32, #tpu.memory_space<vmem>>, vector<256x32xf32>,
    return
  }
  func.func @transform_0(%arg0: i32) -> (i32, i32) {
    %c0_i32 = arith.constant 0 : i32
    %c0_i32_0 = arith.constant 0 : i32
    return %arg0, %c0_i32 : i32, i32
  }
  func.func @transform_1(%arg0: i32) -> (i32, i32) {
    %c0_i32 = arith.constant 0 : i32
    %c0_i32_0 = arith.constant 0 : i32
    %c0_i32_1 = arith.constant 0 : i32
    return %c0_i32, %c0_i32_0 : i32, i32
  }
  func.func @transform_2(%arg0: i32) -> (i32, i32) {
    %c0_i32 = arith.constant 0 : i32
    %c0_i32_0 = arith.constant 0 : i32
    %c0_i32_1 = arith.constant 0 : i32
    return %c0_i32, %c0_i32_0 : i32, i32
  }
  func.func @transform_3(%arg0: i32) -> (i32, i32) {
    %c0_i32 = arith.constant 0 : i32
    %c0_i32_0 = arith.constant 0 : i32
    return %arg0, %c0_i32 : i32, i32
  }
}

</mosaic_0001>

<bundles_post_ra>
// kernel: mul.24
= control target key start
LH: loop header
LB: loop body
LE: loop exit
PB: predicated region body
PF: predicated region fallthrough
CT: control target
= control target key end

     0   :  { %vm7_vm0 = vcmask 130048   ;;  %s30_s8 = smov 16   ;;  %vm13_vm1 = vcmask 392448   ;;  %vm19_vm2 = vcmask 261248   ;;  %s47_s0 = inlined_call_operand.vmem [shape: f32[3,16], index: 0, kind: input, shape index: {}]   ;;  %s48_s1 = inlined_call_operand.vmem [shape: f32[48], index: 1, kind: output, shape index: {}]  }
   0x1   :  { %v4_v0 = vld [vmem:[%s47_s0] sm:$0xf]  ;;  %s29_s0 = smov 32  }
   0x2   :  { %5 = vst [vmem:[#allocation1] sm:$0xf] %v4_v0 }
   0x9   :  { %v10_v1 = vld [vmem:[#allocation1 + $0x2] sm:$0x1]   ;;  %v6_v2 = vld [vmem:[#allocation1] sm:$0x1]   ;;  %v16_v3 = vld [vmem:[#allocation1 + $0x1] sm:$0x1]  }
   0xa   :  { %11 = vrot.lane.b32.xlu0 %v10_v1, %s29_s0  ;;  %8 = vst.msk [vmem:[#allocation0] sm:$0x1] %vm7_vm0, %v6_v2  }
   0xe   :  { %17 = vrot.lane.b32.xlu0 %v16_v3, %s30_s8 }
  0x7c   :  { %v12_v4 = vpop.permute.xlu0 %11  }
  0x7d   :  { %14 = vst.msk [vmem:[#allocation0] sm:$0x1] %vm13_vm1, %v12_v4  }
  0x80   :  { %v18_v5 = vpop.permute.xlu0 %17  }
  0x81   :  { %20 = vst.msk [vmem:[#allocation0] sm:$0x1] %vm19_vm2, %v18_v5  }
  0x88   :  { %v24_v6 = vld [vmem:[#allocation0] sm:$0x1] }
  0x89   :  { %26 = vst [vmem:[%s48_s1] sm:$0x1] %v24_v6 }

// kernel: mul.32
= control target key start
LH: loop header
LB: loop body
LE: loop exit
PB: predicated region body
PF: predicated region fallthrough
CT: control target
= control target key end

     0   :  { %vm7_vm0 = vcmask 31744   ;;  %s30_s8 = smov 4   ;;  %vm13_vm1 = vcmask 97344   ;;  %vm19_vm2 = vcmask 64544   ;;  %s47_s0 = inlined_call_operand.vmem [shape: f32[3,4], index: 0, kind: input, shape index: {}]   ;;  %s48_s1 = inlined_call_operand.vmem [shape: f32[12], index: 1, kind: output, shape index: {}]  }
   0x1   :  { %v4_v0 = vld [vmem:[%s47_s0] sm:$0xf]  ;;  %s29_s0 = smov 8  }
   0x2   :  { %5 = vst [vmem:[#allocation1] sm:$0xf] %v4_v0 }
   0x9   :  { %v10_v1 = vld [vmem:[#allocation1 + $0x2] sm:$0x1]   ;;  %v6_v2 = vld [vmem:[#allocation1] sm:$0x1]   ;;  %v16_v3 = vld [vmem:[#allocation1 + $0x1] sm:$0x1]  }
   0xa   :  { %11 = vrot.lane.b32.xlu0 %v10_v1, %s29_s0  ;;  %8 = vst.msk [vmem:[#allocation0] sm:$0x1] %vm7_vm0, %v6_v2  }
   0xe   :  { %17 = vrot.lane.b32.xlu0 %v16_v3, %s30_s8 }
  0x7c   :  { %v12_v4 = vpop.permute.xlu0 %11  }
  0x7d   :  { %14 = vst.msk [vmem:[#allocation0] sm:$0x1] %vm13_vm1, %v12_v4  }
  0x80   :  { %v18_v5 = vpop.permute.xlu0 %17  }
  0x81   :  { %20 = vst.msk [vmem:[#allocation0] sm:$0x1] %vm19_vm2, %v18_v5  }
  0x88   :  { %v24_v6 = vld [vmem:[#allocation0] sm:$0x1] }
  0x89   :  { %26 = vst [vmem:[%s48_s1] sm:$0x1] %v24_v6 }

// kernel: foundation_stereo_forward.3
= control target key start
LH: loop header
LB: loop body
LE: loop exit
PB: predicated region body
PF: predicated region fallthrough
CT: control target
= control target key end

     0   :  { %vm51_vm0 = vcmask 392192   ;;  %vm272_vm1 = vcmask 261120   ;;  %vm482_vm2 = vcmask 97280   ;;  %s968_s1 = inlined_call_operand.vmem [shape: f32[48,32], index: 1, kind: input, shape index: {}]   ;;  %s969_s0 = inlined_call_operand.vmem [shape: f32[128,48], index: 0, kind: input, shape index: {}]   ;;  %s970_s3 = inlined_call_operand.vmem [shape: f32[32,12], index: 3, kind: input, shape index: {}]   ;;  %s971_s2 = inlined_call_operand.vmem [shape: f32[1,32], index: 2, kind: input, shape index: {}]   ;;  %s972_s5 = inlined_call_operand.vmem [shape: f32[128,32], index: 5, kind: output, shape index: {0}]   ;;  %s973_s4 = inlined_call_operand.vmem [shape: f32[1,12], index: 4, kind: input, shape index: {}]   ;;  %s974_s6 = inlined_call_operand.vmem [shape: f32[128,12], index: 6, kind: output, shape index: {1}]  }
   0x1   :  { %v38_v0 = vld [vmem:[%s968_s1] sm:$0xff]  ;;  %v39_v1 = vld [vmem:[%s968_s1 + $0x8] sm:$0xff]  ;;  %v40_v2 = vld [vmem:[%s968_s1 + $0x10] sm:$0xff] }
   0x2   :  { %v651_v3 = vpack.c.bf16 %v39_v1, %v38_v0  ;;  %v41_v4 = vld [vmem:[%s968_s1 + $0x18] sm:$0xff]  ;;  %v42_v6 = vld [vmem:[%s968_s1 + $0x20] sm:$0xff]  ;;  %v43_v7 = vld [vmem:[%s968_s1 + $0x28] sm:$0xff] }
   0x3   :  { %v655_v5 = vpack.c.bf16 %v41_v4, %v40_v2  ;;  %v22_v8 = vld [vmem:[%s969_s0] sm:$0xff]  ;;  %v659_v9 = vpack.c.bf16 %v43_v7, %v42_v6  ;;  %v262_v11 = vld [vmem:[%s970_s3 + $0x8] sm:$0xff]  ;;  %v24_v14 = vld [vmem:[%s969_s0 + $0x10] sm:$0xff] }
   0x4   :  { %652 = vmatprep.subr.bf16.mxu0 %v651_v3  ;;  %595 = vmatprep.mubr.msk.f32.mxu0 %vm51_vm0, %v22_v8  ;;  %v261_v10 = vld [vmem:[%s970_s3] sm:$0xff]  ;;  %v23_v13 = vld [vmem:[%s969_s0 + $0x8] sm:$0xff]  ;;  %v25_v15 = vld [vmem:[%s969_s0 + $0x18] sm:$0xff] }
   0x5   :  { %654 = vmatpush3.bf16.msra.mxu0 %v651_v3  ;;  %v663_v12 = vpack.c.bf16 %v262_v11, %v261_v10  ;;  %v26_v16 = vld [vmem:[%s969_s0 + $0x20] sm:$0xff]  ;;  %v27_v17 = vld [vmem:[%s969_s0 + $0x28] sm:$0xff]  ;;  %v28_v18 = vld [vmem:[%s969_s0 + $0x30] sm:$0xff] }
   0x6   :  { %656 = vmatprep.subr.bf16.mxu0 %v655_v5  ;;  %v29_v19 = vld [vmem:[%s969_s0 + $0x38] sm:$0xff]  ;;  %v30_v20 = vld [vmem:[%s969_s0 + $0x40] sm:$0xff]  ;;  %v31_v21 = vld [vmem:[%s969_s0 + $0x48] sm:$0xff] }
   0x7   :  { %664 = vmatprep.subr.bf16.mxu1 %v663_v12  ;;  %v32_v22 = vld [vmem:[%s969_s0 + $0x50] sm:$0xff]  ;;  %v33_v23 = vld [vmem:[%s969_s0 + $0x58] sm:$0xff]  ;;  %v34_v24 = vld [vmem:[%s969_s0 + $0x60] sm:$0xff] }
   0x8   :  { %666 = vmatpush3.bf16.msra.mxu1 %v663_v12  ;;  %v35_v25 = vld [vmem:[%s969_s0 + $0x68] sm:$0xff]  ;;  %v36_v26 = vld [vmem:[%s969_s0 + $0x70] sm:$0xff]  ;;  %v37_v27 = vld [vmem:[%s969_s0 + $0x78] sm:$0xff] }
   0x9   :  { %658 = vmatpush3.bf16.msra.mxu0 %v655_v5  ;;  %v263_v28 = vld [vmem:[%s970_s3 + $0x10] sm:$0xff]  ;;  %v264_v29 = vld [vmem:[%s970_s3 + $0x18] sm:$0xff]  ;;  %v803_v31 = vld [vmem:[%s971_s2] ss:$0 sm:$0xff] }
   0xa   :  { %660 = vmatprep.subr.bf16.mxu0 %v659_v9  ;;  %v667_v30 = vpack.c.bf16 %v264_v29, %v263_v28 }
   0xc   :  { %668 = vmatprep.subr.bf16.mxu1 %v667_v30 }
   0xd   :  { %662 = vmatpush3.bf16.msra.mxu0 %v659_v9  ;;  %670 = vmatpush3.bf16.msra.mxu1 %v667_v30 }
  0x10   :  { %596 = vmatmul.mubr.msk.f32.vlgmr.msra.gmra.mrb[0].mxu0 %vm51_vm0, %v23_v13 }
  0x11   :  { %598 = vmatprep.mubr.msk.f32.mxu0 %vm51_vm0, %v24_v14 }
  0x14   :  { %599 = vmatmul.mubr.msk.f32.gmra.mrb[2].mxu0 %vm51_vm0, %v25_v15 }
  0x15   :  { %601 = vmatprep.mubr.msk.f32.mxu0 %vm51_vm0, %v26_v16  ;;  %v524_v16 = vld [vmem:[%s973_s4] ss:$0 sm:$0xff] }
  0x18   :  { %602 = vmatmul.mubr.msk.f32.gmra.mrb[4].mxu0 %vm51_vm0, %v27_v17 }
  0x19   :  { %604 = vmatprep.mubr.msk.f32.mxu0 %vm51_vm0, %v28_v18 }
  0x1c   :  { %605 = vmatmul.mubr.msk.f32.gmra.mrb[6].mxu0 %vm51_vm0, %v29_v19 }
  0x1d   :  { %607 = vmatprep.mubr.msk.f32.mxu0 %vm51_vm0, %v30_v20 }
  0x20   :  { %608 = vmatmul.mubr.msk.f32.gmra.mrb[8].mxu0 %vm51_vm0, %v31_v21 }
  0x21   :  { %610 = vmatprep.mubr.msk.f32.mxu0 %vm51_vm0, %v32_v22 }
  0x24   :  { %611 = vmatmul.mubr.msk.f32.gmra.mrb[10].mxu0 %vm51_vm0, %v33_v23 }
  0x25   :  { %613 = vmatprep.mubr.msk.f32.mxu0 %vm51_vm0, %v34_v24 }
  0x28   :  { %614 = vmatmul.mubr.msk.f32.gmra.mrb[12].mxu0 %vm51_vm0, %v35_v25 }
  0x29   :  { %616 = vmatprep.mubr.msk.f32.mxu0 %vm51_vm0, %v36_v26 }
  0x2c   :  { %617 = vmatmul.mubr.msk.f32.gmra.mrb[14].mxu0 %vm51_vm0, %v37_v27 }
  0xe3   :  { %v597_v32 = vpop.f32.mrb[0].mxu0 }
  0xe4   :  { %v172_v33 = vadd.f32 %v597_v32, %v803_v31  ;;  %v166_v34 = vpop.f32.mrb[1].mxu0 }
  0xe5   :  { %v167_v35 = vadd.f32 %v803_v31, %v166_v34 }
  0xe6   :  { %v246_v36 = vmax.f32 %v172_v33, 0.0 }
  0xe7   :  { %v245_v37 = vmax.f32 %v167_v35, 0.0  ;;  %v600_v38 = vpop.f32.mrb[2].mxu0 }
  0xe8   :  { %467 = vst.msk [vmem:[%s972_s5 + $0x8] sm:$0xff] %vm272_vm1, %v246_v36  ;;  %v182_v39 = vadd.f32 %v600_v38, %v803_v31  ;;  %v176_v40 = vpop.f32.mrb[3].mxu0 }
  0xe9   :  { %466 = vst.msk [vmem:[%s972_s5] sm:$0xff] %vm272_vm1, %v245_v37  ;;  %v177_v41 = vadd.f32 %v803_v31, %v176_v40  ;;  %627 = vmatprep.mubr.msk.f32.mxu1 %vm272_vm1, %v245_v37 }
  0xea   :  { %v248_v42 = vmax.f32 %v182_v39, 0.0  ;;  %628 = vmatmul.mubr.msk.f32.vlgmr.msra.gmra.mrb[0].mxu1 %vm272_vm1, %v246_v36 }
  0xeb   :  { %v247_v43 = vmax.f32 %v177_v41, 0.0  ;;  %v603_v44 = vpop.f32.mrb[4].mxu0 }
  0xec   :  { %469 = vst.msk [vmem:[%s972_s5 + $0x18] sm:$0xff] %vm272_vm1, %v248_v42  ;;  %v192_v45 = vadd.f32 %v603_v44, %v803_v31  ;;  %v186_v46 = vpop.f32.mrb[5].mxu0 }
  0xed   :  { %468 = vst.msk [vmem:[%s972_s5 + $0x10] sm:$0xff] %vm272_vm1, %v247_v43  ;;  %v187_v47 = vadd.f32 %v803_v31, %v186_v46  ;;  %630 = vmatprep.mubr.msk.f32.mxu1 %vm272_vm1, %v247_v43 }
  0xee   :  { %v250_v48 = vmax.f32 %v192_v45, 0.0  ;;  %631 = vmatmul.mubr.msk.f32.gmra.mrb[2].mxu1 %vm272_vm1, %v248_v42 }
  0xef   :  { %v249_v49 = vmax.f32 %v187_v47, 0.0  ;;  %v606_v50 = vpop.f32.mrb[6].mxu0 }
  0xf0   :  { %471 = vst.msk [vmem:[%s972_s5 + $0x28] sm:$0xff] %vm272_vm1, %v250_v48  ;;  %v202_v51 = vadd.f32 %v606_v50, %v803_v31  ;;  %v196_v52 = vpop.f32.mrb[7].mxu0 }
  0xf1   :  { %470 = vst.msk [vmem:[%s972_s5 + $0x20] sm:$0xff] %vm272_vm1, %v249_v49  ;;  %v197_v53 = vadd.f32 %v803_v31, %v196_v52  ;;  %633 = vmatprep.mubr.msk.f32.mxu1 %vm272_vm1, %v249_v49 }
  0xf2   :  { %v252_v54 = vmax.f32 %v202_v51, 0.0  ;;  %634 = vmatmul.mubr.msk.f32.gmra.mrb[4].mxu1 %vm272_vm1, %v250_v48 }
  0xf3   :  { %v251_v55 = vmax.f32 %v197_v53, 0.0  ;;  %v609_v56 = vpop.f32.mrb[8].mxu0 }
  0xf4   :  { %473 = vst.msk [vmem:[%s972_s5 + $0x38] sm:$0xff] %vm272_vm1, %v252_v54  ;;  %v212_v57 = vadd.f32 %v609_v56, %v803_v31  ;;  %v206_v58 = vpop.f32.mrb[9].mxu0 }
  0xf5   :  { %472 = vst.msk [vmem:[%s972_s5 + $0x30] sm:$0xff] %vm272_vm1, %v251_v55  ;;  %v207_v59 = vadd.f32 %v803_v31, %v206_v58  ;;  %636 = vmatprep.mubr.msk.f32.mxu1 %vm272_vm1, %v251_v55 }
  0xf6   :  { %v254_v60 = vmax.f32 %v212_v57, 0.0  ;;  %637 = vmatmul.mubr.msk.f32.gmra.mrb[6].mxu1 %vm272_vm1, %v252_v54 }
  0xf7   :  { %v253_v61 = vmax.f32 %v207_v59, 0.0  ;;  %v612_v62 = vpop.f32.mrb[10].mxu0 }
  0xf8   :  { %475 = vst.msk [vmem:[%s972_s5 + $0x48] sm:$0xff] %vm272_vm1, %v254_v60  ;;  %v222_v63 = vadd.f32 %v612_v62, %v803_v31  ;;  %v216_v0 = vpop.f32.mrb[11].mxu0 }
  0xf9   :  { %474 = vst.msk [vmem:[%s972_s5 + $0x40] sm:$0xff] %vm272_vm1, %v253_v61  ;;  %v217_v1 = vadd.f32 %v803_v31, %v216_v0  ;;  %639 = vmatprep.mubr.msk.f32.mxu1 %vm272_vm1, %v253_v61 }
  0xfa   :  { %v256_v2 = vmax.f32 %v222_v63, 0.0  ;;  %640 = vmatmul.mubr.msk.f32.gmra.mrb[8].mxu1 %vm272_vm1, %v254_v60 }
  0xfb   :  { %v255_v3 = vmax.f32 %v217_v1, 0.0  ;;  %v615_v4 = vpop.f32.mrb[12].mxu0 }
  0xfc   :  { %477 = vst.msk [vmem:[%s972_s5 + $0x58] sm:$0xff] %vm272_vm1, %v256_v2  ;;  %v232_v5 = vadd.f32 %v615_v4, %v803_v31  ;;  %v226_v6 = vpop.f32.mrb[13].mxu0 }
  0xfd   :  { %476 = vst.msk [vmem:[%s972_s5 + $0x50] sm:$0xff] %vm272_vm1, %v255_v3  ;;  %v227_v7 = vadd.f32 %v803_v31, %v226_v6  ;;  %642 = vmatprep.mubr.msk.f32.mxu1 %vm272_vm1, %v255_v3 }
  0xfe   :  { %v258_v8 = vmax.f32 %v232_v5, 0.0  ;;  %643 = vmatmul.mubr.msk.f32.gmra.mrb[10].mxu1 %vm272_vm1, %v256_v2 }
  0xff   :  { %v257_v9 = vmax.f32 %v227_v7, 0.0  ;;  %v618_v10 = vpop.f32.mrb[14].mxu0 }
 0x100   :  { %479 = vst.msk [vmem:[%s972_s5 + $0x68] sm:$0xff] %vm272_vm1, %v258_v8  ;;  %v242_v11 = vadd.f32 %v618_v10, %v803_v31  ;;  %v236_v12 = vpop.f32.mrb[15].mxu0 }
 0x101   :  { %478 = vst.msk [vmem:[%s972_s5 + $0x60] sm:$0xff] %vm272_vm1, %v257_v9  ;;  %v237_v13 = vadd.f32 %v803_v31, %v236_v12  ;;  %645 = vmatprep.mubr.msk.f32.mxu1 %vm272_vm1, %v257_v9 }
 0x102   :  { %v260_v14 = vmax.f32 %v242_v11, 0.0  ;;  %646 = vmatmul.mubr.msk.f32.gmra.mrb[12].mxu1 %vm272_vm1, %v258_v8 }
 0x103   :  { %v259_v15 = vmax.f32 %v237_v13, 0.0 }
 0x104   :  { %481 = vst.msk [vmem:[%s972_s5 + $0x78] sm:$0xff] %vm272_vm1, %v260_v14 }
 0x105   :  { %480 = vst.msk [vmem:[%s972_s5 + $0x70] sm:$0xff] %vm272_vm1, %v259_v15  ;;  %648 = vmatprep.mubr.msk.f32.mxu1 %vm272_vm1, %v259_v15 }
 0x106   :  { %649 = vmatmul.mubr.msk.f32.gmra.mrb[14].mxu1 %vm272_vm1, %v260_v14 }
 0x1bd   :  { %v629_v17 = vpop.f32.mrb[0].mxu1 }
 0x1be   :  { %v393_v18 = vadd.f32 %v629_v17, %v524_v16  ;;  %v387_v19 = vpop.f32.mrb[1].mxu1 }
 0x1bf   :  { %v388_v20 = vadd.f32 %v524_v16, %v387_v19 }
 0x1c0   :  { %484 = vst.msk [vmem:[%s974_s6 + $0x8] sm:$0xff] %vm482_vm2, %v393_v18 }
 0x1c1   :  { %483 = vst.msk [vmem:[%s974_s6] sm:$0xff] %vm482_vm2, %v388_v20  ;;  %v632_v21 = vpop.f32.mrb[2].mxu1 }
 0x1c2   :  { %v403_v22 = vadd.f32 %v632_v21, %v524_v16  ;;  %v397_v23 = vpop.f32.mrb[3].mxu1 }
 0x1c3   :  { %v398_v24 = vadd.f32 %v524_v16, %v397_v23 }
 0x1c4   :  { %486 = vst.msk [vmem:[%s974_s6 + $0x18] sm:$0xff] %vm482_vm2, %v403_v22 }
 0x1c5   :  { %485 = vst.msk [vmem:[%s974_s6 + $0x10] sm:$0xff] %vm482_vm2, %v398_v24  ;;  %v635_v25 = vpop.f32.mrb[4].mxu1 }
 0x1c6   :  { %v413_v26 = vadd.f32 %v635_v25, %v524_v16  ;;  %v407_v27 = vpop.f32.mrb[5].mxu1 }
 0x1c7   :  { %v408_v28 = vadd.f32 %v524_v16, %v407_v27 }
 0x1c8   :  { %488 = vst.msk [vmem:[%s974_s6 + $0x28] sm:$0xff] %vm482_vm2, %v413_v26 }
 0x1c9   :  { %487 = vst.msk [vmem:[%s974_s6 + $0x20] sm:$0xff] %vm482_vm2, %v408_v28  ;;  %v638_v29 = vpop.f32.mrb[6].mxu1 }
 0x1ca   :  { %v423_v30 = vadd.f32 %v638_v29, %v524_v16  ;;  %v417_v31 = vpop.f32.mrb[7].mxu1 }
 0x1cb   :  { %v418_v32 = vadd.f32 %v524_v16, %v417_v31 }
 0x1cc   :  { %490 = vst.msk [vmem:[%s974_s6 + $0x38] sm:$0xff] %vm482_vm2, %v423_v30 }
 0x1cd   :  { %489 = vst.msk [vmem:[%s974_s6 + $0x30] sm:$0xff] %vm482_vm2, %v418_v32  ;;  %v641_v33 = vpop.f32.mrb[8].mxu1 }
 0x1ce   :  { %v433_v34 = vadd.f32 %v641_v33, %v524_v16  ;;  %v427_v35 = vpop.f32.mrb[9].mxu1 }
 0x1cf   :  { %v428_v36 = vadd.f32 %v524_v16, %v427_v35 }
 0x1d0   :  { %492 = vst.msk [vmem:[%s974_s6 + $0x48] sm:$0xff] %vm482_vm2, %v433_v34 }
 0x1d1   :  { %491 = vst.msk [vmem:[%s974_s6 + $0x40] sm:$0xff] %vm482_vm2, %v428_v36  ;;  %v644_v37 = vpop.f32.mrb[10].mxu1 }
 0x1d2   :  { %v443_v38 = vadd.f32 %v644_v37, %v524_v16  ;;  %v437_v39 = vpop.f32.mrb[11].mxu1 }
 0x1d3   :  { %v438_v40 = vadd.f32 %v524_v16, %v437_v39 }
 0x1d4   :  { %494 = vst.msk [vmem:[%s974_s6 + $0x58] sm:$0xff] %vm482_vm2, %v443_v38 }
 0x1d5   :  { %493 = vst.msk [vmem:[%s974_s6 + $0x50] sm:$0xff] %vm482_vm2, %v438_v40  ;;  %v647_v41 = vpop.f32.mrb[12].mxu1 }
 0x1d6   :  { %v453_v42 = vadd.f32 %v647_v41, %v524_v16  ;;  %v447_v43 = vpop.f32.mrb[13].mxu1 }
 0x1d7   :  { %v448_v44 = vadd.f32 %v524_v16, %v447_v43 }
 0x1d8   :  { %496 = vst.msk [vmem:[%s974_s6 + $0x68] sm:$0xff] %vm482_vm2, %v453_v42 }
 0x1d9   :  { %495 = vst.msk [vmem:[%s974_s6 + $0x60] sm:$0xff] %vm482_vm2, %v448_v44  ;;  %v650_v45 = vpop.f32.mrb[14].mxu1 }
 0x1da   :  { %v463_v46 = vadd.f32 %v650_v45, %v524_v16  ;;  %v457_v47 = vpop.f32.mrb[15].mxu1 }
 0x1db   :  { %v458_v48 = vadd.f32 %v524_v16, %v457_v47 }
 0x1dc   :  { %498 = vst.msk [vmem:[%s974_s6 + $0x78] sm:$0xff] %vm482_vm2, %v463_v46 }
 0x1dd   :  { %497 = vst.msk [vmem:[%s974_s6 + $0x70] sm:$0xff] %vm482_vm2, %v458_v48 }

// kernel: foundation_stereo_forward.4
= control target key start
LH: loop header
LB: loop body
LE: loop exit
PB: predicated region body
PF: predicated region fallthrough
CT: control target
= control target key end

     0   :  { %vm153_vm0 = vcmask 1043456   ;;  %vm619_vm1 = vmmov 1   ;;  %vm56_vm3 = vcmask 97280   ;;  %s858_s0 = inlined_call_operand.vmem [shape: f32[256,12], index: 0, kind: input, shape index: {}]   ;;  %s859_s1 = inlined_call_operand.vmem [shape: f32[12,32], index: 1, kind: input, shape index: {}]   ;;  %s860_s2 = inlined_call_operand.vmem [shape: f32[1,32], index: 2, kind: input, shape index: {}]   ;;  %s861_s3 = inlined_call_operand.hbm [shape: f32[256,32], index: 3, kind: output, shape index: {}]  }
   0x1   :  { %v47_v0 = vld [vmem:[%s859_s1] sm:$0xff]  ;;  %v48_v1 = vld [vmem:[%s859_s1 + $0x8] sm:$0xf]  ;;  %vm584_vm2 = vmpackc.low %vm153_vm0, %vm619_vm1 }
   0x2   :  { %v15_v2 = vld [vmem:[%s858_s0] sm:$0xff]  ;;  %v583_v3 = vpack.c.bf16 %v48_v1, %v47_v0  ;;  %v16_v5 = vld [vmem:[%s858_s0 + $0x8] sm:$0xff]  ;;  %v17_v7 = vld [vmem:[%s858_s0 + $0x10] sm:$0xff] }
   0x3   :  { %v31_v4 = vld [vmem:[%s858_s0 + $0x80] sm:$0xff]  ;;  %535 = vmatprep.mubr.msk.f32.mxu0 %vm56_vm3, %v15_v2  ;;  %v32_v6 = vld [vmem:[%s858_s0 + $0x88] sm:$0xff]  ;;  %v33_v8 = vld [vmem:[%s858_s0 + $0x90] sm:$0xff] }
   0x4   :  { %559 = vmatprep.mubr.msk.f32.mxu1 %vm56_vm3, %v31_v4  ;;  %585 = vmatprep.subr.msk.bf16.mxu0 %vm584_vm2, %v583_v3  ;;  %v18_v9 = vld [vmem:[%s858_s0 + $0x18] sm:$0xff]  ;;  %v19_v11 = vld [vmem:[%s858_s0 + $0x20] sm:$0xff] }
   0x5   :  { %589 = vmatprep.subr.msk.bf16.mxu1 %vm584_vm2, %v583_v3  ;;  %588 = vmatpush3.bf16.msk.msra.mxu0 %vm584_vm2, %v583_v3  ;;  %v34_v10 = vld [vmem:[%s858_s0 + $0x98] sm:$0xff]  ;;  %v35_v12 = vld [vmem:[%s858_s0 + $0xa0] sm:$0xff] }
   0x6   :  { %590 = vmatpush3.bf16.msk.msra.mxu1 %vm584_vm2, %v583_v3 }
   0x8   :  { %536 = vmatmul.mubr.msk.f32.vlgmr.msra.gmra.mrb[0].mxu0 %vm56_vm3, %v16_v5 }
   0x9   :  { %560 = vmatmul.mubr.msk.f32.vlgmr.msra.gmra.mrb[0].mxu1 %vm56_vm3, %v32_v6  ;;  %538 = vmatprep.mubr.msk.f32.mxu0 %vm56_vm3, %v17_v7 }
   0xa   :  { %562 = vmatprep.mubr.msk.f32.mxu1 %vm56_vm3, %v33_v8 }
   0xc   :  { %539 = vmatmul.mubr.msk.f32.gmra.mrb[2].mxu0 %vm56_vm3, %v18_v9 }
   0xd   :  { %563 = vmatmul.mubr.msk.f32.gmra.mrb[2].mxu1 %vm56_vm3, %v34_v10 }
   0xe   :  { %8 = vsyncpa [#allocation3], 0  ;;  %541 = vmatprep.mubr.msk.f32.mxu0 %vm56_vm3, %v19_v11  ;;  %565 = vmatprep.mubr.msk.f32.mxu1 %vm56_vm3, %v35_v12  ;;  %v20_v13 = vld [vmem:[%s858_s0 + $0x28] sm:$0xff]  ;;  %v21_v15 = vld [vmem:[%s858_s0 + $0x30] sm:$0xff]  ;;  %vm414_vm4 = vcmask 261120  }
   0xf   :  { %v36_v14 = vld [vmem:[%s858_s0 + $0xa8] sm:$0xff]  ;;  %v37_v16 = vld [vmem:[%s858_s0 + $0xb0] sm:$0xff]  ;;  %v22_v17 = vld [vmem:[%s858_s0 + $0x38] sm:$0xff] }
  0x10   :  { %542 = vmatmul.mubr.msk.f32.gmra.mrb[4].mxu0 %vm56_vm3, %v20_v13  ;;  %v38_v18 = vld [vmem:[%s858_s0 + $0xb8] sm:$0xff]  ;;  %v23_v19 = vld [vmem:[%s858_s0 + $0x40] sm:$0xff]  ;;  %v24_v21 = vld [vmem:[%s858_s0 + $0x48] sm:$0xff] }
  0x11   :  { %566 = vmatmul.mubr.msk.f32.gmra.mrb[4].mxu1 %vm56_vm3, %v36_v14  ;;  %544 = vmatprep.mubr.msk.f32.mxu0 %vm56_vm3, %v21_v15  ;;  %v39_v20 = vld [vmem:[%s858_s0 + $0xc0] sm:$0xff]  ;;  %v40_v22 = vld [vmem:[%s858_s0 + $0xc8] sm:$0xff]  ;;  %v25_v23 = vld [vmem:[%s858_s0 + $0x50] sm:$0xff] }
  0x12   :  { %568 = vmatprep.mubr.msk.f32.mxu1 %vm56_vm3, %v37_v16  ;;  %v41_v24 = vld [vmem:[%s858_s0 + $0xd0] sm:$0xff]  ;;  %v26_v25 = vld [vmem:[%s858_s0 + $0x58] sm:$0xff]  ;;  %v27_v27 = vld [vmem:[%s858_s0 + $0x60] sm:$0xff] }
  0x13   :  { %v42_v26 = vld [vmem:[%s858_s0 + $0xd8] sm:$0xff]  ;;  %v43_v28 = vld [vmem:[%s858_s0 + $0xe0] sm:$0xff]  ;;  %v28_v29 = vld [vmem:[%s858_s0 + $0x68] sm:$0xff] }
  0x14   :  { %545 = vmatmul.mubr.msk.f32.gmra.mrb[6].mxu0 %vm56_vm3, %v22_v17  ;;  %v44_v30 = vld [vmem:[%s858_s0 + $0xe8] sm:$0xff]  ;;  %v29_v31 = vld [vmem:[%s858_s0 + $0x70] sm:$0xff]  ;;  %v30_v33 = vld [vmem:[%s858_s0 + $0x78] sm:$0xff] }
  0x15   :  { %569 = vmatmul.mubr.msk.f32.gmra.mrb[6].mxu1 %vm56_vm3, %v38_v18  ;;  %547 = vmatprep.mubr.msk.f32.mxu0 %vm56_vm3, %v23_v19  ;;  %v45_v32 = vld [vmem:[%s858_s0 + $0xf0] sm:$0xff]  ;;  %v46_v34 = vld [vmem:[%s858_s0 + $0xf8] sm:$0xff]  ;;  %v780_v35 = vld [vmem:[%s860_s2] ss:$0 sm:$0xff]  ;;  %s620_s0 = smov [#allocation2]  }
  0x16   :  { %571 = vmatprep.mubr.msk.f32.mxu1 %vm56_vm3, %v39_v20  ;;  %s452_s2 = sshll.u32 %s620_s0, 4  ;;  %s453_s2 = int_to_ptr.vmem [resolvable:$true] %s452_s2 }
  0x17   :  { %s595_s25 = scalar_lea.vmem %s453_s2, 4096  ;;  %p600_p1 = scmp.lt.s32.totalorder %s453_s2, %s453_s2 }
  0x18   :  { %548 = vmatmul.mubr.msk.f32.gmra.mrb[8].mxu0 %vm56_vm3, %v24_v21  ;;  %p596_p0 = scmp.ne.s32.totalorder %s453_s2, %s595_s25  ;;  %p601_p2 = scmp.lt.s32.totalorder %s595_s25, %s595_s25 }
  0x19   :  { %572 = vmatmul.mubr.msk.f32.gmra.mrb[8].mxu1 %vm56_vm3, %v40_v22  ;;  %550 = vmatprep.mubr.msk.f32.mxu0 %vm56_vm3, %v25_v23 }
  0x1a   :  { %574 = vmatprep.mubr.msk.f32.mxu1 %vm56_vm3, %v41_v24  ;;  %p602_p3 = por %p601_p2, %p600_p1 }
  0x1c   :  { %551 = vmatmul.mubr.msk.f32.gmra.mrb[10].mxu0 %vm56_vm3, %v26_v25  ;;  %p603_p4 = pnand %p602_p3, %p596_p0 }
  0x1d   :  { %575 = vmatmul.mubr.msk.f32.gmra.mrb[10].mxu1 %vm56_vm3, %v42_v26  ;;  %553 = vmatprep.mubr.msk.f32.mxu0 %vm56_vm3, %v27_v27 }
  0x1e   :  { %577 = vmatprep.mubr.msk.f32.mxu1 %vm56_vm3, %v43_v28 }
  0x20   :  { %554 = vmatmul.mubr.msk.f32.gmra.mrb[12].mxu0 %vm56_vm3, %v28_v29 }
  0x21   :  { %578 = vmatmul.mubr.msk.f32.gmra.mrb[12].mxu1 %vm56_vm3, %v44_v30  ;;  %556 = vmatprep.mubr.msk.f32.mxu0 %vm56_vm3, %v29_v31 }
  0x22   :  { %580 = vmatprep.mubr.msk.f32.mxu1 %vm56_vm3, %v45_v32 }
  0x24   :  { %557 = vmatmul.mubr.msk.f32.gmra.mrb[14].mxu0 %vm56_vm3, %v30_v33 }
  0x25   :  { %581 = vmatmul.mubr.msk.f32.gmra.mrb[14].mxu1 %vm56_vm3, %v46_v34 }
  0xdb   :  { %v537_v36 = vpop.f32.mrb[0].mxu0 }
  0xdc   :  { %v561_v37 = vpop.f32.mrb[0].mxu1  ;;  %v229_v38 = vadd.f32 %v537_v36, %v780_v35  ;;  %v223_v40 = vpop.f32.mrb[1].mxu0 }
  0xdd   :  { %v309_v39 = vadd.f32 %v561_v37, %v780_v35  ;;  %v303_v41 = vpop.f32.mrb[1].mxu1  ;;  %v224_v42 = vadd.f32 %v780_v35, %v223_v40 }
  0xde   :  { %v304_v43 = vadd.f32 %v780_v35, %v303_v41  ;;  %v383_v44 = vmax.f32 %v229_v38, 0.0 }
  0xdf   :  { %v399_v45 = vmax.f32 %v309_v39, 0.0  ;;  %v382_v46 = vmax.f32 %v224_v42, 0.0  ;;  %v540_v48 = vpop.f32.mrb[2].mxu0 }
  0xe0   :  { %v398_v47 = vmax.f32 %v304_v43, 0.0  ;;  %v564_v49 = vpop.f32.mrb[2].mxu1  ;;  %416 = vst.msk [vmem:[#allocation2 + $0x8] sm:$0xff] %vm414_vm4, %v383_v44  ;;  %v239_v50 = vadd.f32 %v540_v48, %v780_v35  ;;  %v233_v52 = vpop.f32.mrb[3].mxu0 }
  0xe1   :  { %432 = vst.msk [vmem:[#allocation2 + $0x88] sm:$0xff] %vm414_vm4, %v399_v45  ;;  %v319_v51 = vadd.f32 %v564_v49, %v780_v35  ;;  %v313_v53 = vpop.f32.mrb[3].mxu1  ;;  %415 = vst.msk [vmem:[#allocation2] sm:$0xff] %vm414_vm4, %v382_v46  ;;  %v234_v54 = vadd.f32 %v780_v35, %v233_v52 }
  0xe2   :  { %431 = vst.msk [vmem:[#allocation2 + $0x80] sm:$0xff] %vm414_vm4, %v398_v47  ;;  %v314_v55 = vadd.f32 %v780_v35, %v313_v53  ;;  %v385_v56 = vmax.f32 %v239_v50, 0.0 }
  0xe3   :  { %v401_v57 = vmax.f32 %v319_v51, 0.0  ;;  %v384_v58 = vmax.f32 %v234_v54, 0.0  ;;  %v543_v60 = vpop.f32.mrb[4].mxu0 }
  0xe4   :  { %v400_v59 = vmax.f32 %v314_v55, 0.0  ;;  %v567_v61 = vpop.f32.mrb[4].mxu1  ;;  %418 = vst.msk [vmem:[#allocation2 + $0x18] sm:$0xff] %vm414_vm4, %v385_v56  ;;  %v249_v62 = vadd.f32 %v543_v60, %v780_v35  ;;  %v243_v0 = vpop.f32.mrb[5].mxu0 }
  0xe5   :  { %434 = vst.msk [vmem:[#allocation2 + $0x98] sm:$0xff] %vm414_vm4, %v401_v57  ;;  %v329_v63 = vadd.f32 %v567_v61, %v780_v35  ;;  %v323_v1 = vpop.f32.mrb[5].mxu1  ;;  %417 = vst.msk [vmem:[#allocation2 + $0x10] sm:$0xff] %vm414_vm4, %v384_v58  ;;  %v244_v2 = vadd.f32 %v780_v35, %v243_v0 }
  0xe6   :  { %433 = vst.msk [vmem:[#allocation2 + $0x90] sm:$0xff] %vm414_vm4, %v400_v59  ;;  %v324_v3 = vadd.f32 %v780_v35, %v323_v1  ;;  %v387_v4 = vmax.f32 %v249_v62, 0.0 }
  0xe7   :  { %v403_v5 = vmax.f32 %v329_v63, 0.0  ;;  %v386_v6 = vmax.f32 %v244_v2, 0.0  ;;  %v546_v8 = vpop.f32.mrb[6].mxu0 }
  0xe8   :  { %v402_v7 = vmax.f32 %v324_v3, 0.0  ;;  %v570_v9 = vpop.f32.mrb[6].mxu1  ;;  %420 = vst.msk [vmem:[#allocation2 + $0x28] sm:$0xff] %vm414_vm4, %v387_v4  ;;  %v259_v10 = vadd.f32 %v546_v8, %v780_v35  ;;  %v253_v12 = vpop.f32.mrb[7].mxu0 }
  0xe9   :  { %436 = vst.msk [vmem:[#allocation2 + $0xa8] sm:$0xff] %vm414_vm4, %v403_v5  ;;  %v339_v11 = vadd.f32 %v570_v9, %v780_v35  ;;  %v333_v13 = vpop.f32.mrb[7].mxu1  ;;  %419 = vst.msk [vmem:[#allocation2 + $0x20] sm:$0xff] %vm414_vm4, %v386_v6  ;;  %v254_v14 = vadd.f32 %v780_v35, %v253_v12 }
  0xea   :  { %435 = vst.msk [vmem:[#allocation2 + $0xa0] sm:$0xff] %vm414_vm4, %v402_v7  ;;  %v334_v15 = vadd.f32 %v780_v35, %v333_v13  ;;  %v389_v16 = vmax.f32 %v259_v10, 0.0 }
  0xeb   :  { %v405_v17 = vmax.f32 %v339_v11, 0.0  ;;  %v388_v18 = vmax.f32 %v254_v14, 0.0  ;;  %v549_v20 = vpop.f32.mrb[8].mxu0 }
  0xec   :  { %v404_v19 = vmax.f32 %v334_v15, 0.0  ;;  %v573_v21 = vpop.f32.mrb[8].mxu1  ;;  %422 = vst.msk [vmem:[#allocation2 + $0x38] sm:$0xff] %vm414_vm4, %v389_v16  ;;  %v269_v22 = vadd.f32 %v549_v20, %v780_v35  ;;  %v263_v24 = vpop.f32.mrb[9].mxu0 }
  0xed   :  { %438 = vst.msk [vmem:[#allocation2 + $0xb8] sm:$0xff] %vm414_vm4, %v405_v17  ;;  %v349_v23 = vadd.f32 %v573_v21, %v780_v35  ;;  %v343_v25 = vpop.f32.mrb[9].mxu1  ;;  %421 = vst.msk [vmem:[#allocation2 + $0x30] sm:$0xff] %vm414_vm4, %v388_v18  ;;  %v264_v26 = vadd.f32 %v780_v35, %v263_v24 }
  0xee   :  { %437 = vst.msk [vmem:[#allocation2 + $0xb0] sm:$0xff] %vm414_vm4, %v404_v19  ;;  %v344_v27 = vadd.f32 %v780_v35, %v343_v25  ;;  %v391_v28 = vmax.f32 %v269_v22, 0.0 }
  0xef   :  { %v407_v29 = vmax.f32 %v349_v23, 0.0  ;;  %v390_v30 = vmax.f32 %v264_v26, 0.0  ;;  %v552_v32 = vpop.f32.mrb[10].mxu0 }
  0xf0   :  { %v406_v31 = vmax.f32 %v344_v27, 0.0  ;;  %v576_v33 = vpop.f32.mrb[10].mxu1  ;;  %424 = vst.msk [vmem:[#allocation2 + $0x48] sm:$0xff] %vm414_vm4, %v391_v28  ;;  %v279_v34 = vadd.f32 %v552_v32, %v780_v35  ;;  %v273_v37 = vpop.f32.mrb[11].mxu0 }
  0xf1   :  { %440 = vst.msk [vmem:[#allocation2 + $0xc8] sm:$0xff] %vm414_vm4, %v407_v29  ;;  %v359_v36 = vadd.f32 %v576_v33, %v780_v35  ;;  %v353_v38 = vpop.f32.mrb[11].mxu1  ;;  %423 = vst.msk [vmem:[#allocation2 + $0x40] sm:$0xff] %vm414_vm4, %v390_v30  ;;  %v274_v39 = vadd.f32 %v780_v35, %v273_v37 }
  0xf2   :  { %439 = vst.msk [vmem:[#allocation2 + $0xc0] sm:$0xff] %vm414_vm4, %v406_v31  ;;  %v354_v40 = vadd.f32 %v780_v35, %v353_v38  ;;  %v393_v41 = vmax.f32 %v279_v34, 0.0 }
  0xf3   :  { %v409_v42 = vmax.f32 %v359_v36, 0.0  ;;  %v392_v43 = vmax.f32 %v274_v39, 0.0  ;;  %v555_v45 = vpop.f32.mrb[12].mxu0 }
  0xf4   :  { %v408_v44 = vmax.f32 %v354_v40, 0.0  ;;  %v579_v46 = vpop.f32.mrb[12].mxu1  ;;  %426 = vst.msk [vmem:[#allocation2 + $0x58] sm:$0xff] %vm414_vm4, %v393_v41  ;;  %v289_v47 = vadd.f32 %v555_v45, %v780_v35  ;;  %v283_v49 = vpop.f32.mrb[13].mxu0 }
  0xf5   :  { %442 = vst.msk [vmem:[#allocation2 + $0xd8] sm:$0xff] %vm414_vm4, %v409_v42  ;;  %v369_v48 = vadd.f32 %v579_v46, %v780_v35  ;;  %v363_v50 = vpop.f32.mrb[13].mxu1  ;;  %425 = vst.msk [vmem:[#allocation2 + $0x50] sm:$0xff] %vm414_vm4, %v392_v43  ;;  %v284_v51 = vadd.f32 %v780_v35, %v283_v49 }
  0xf6   :  { %441 = vst.msk [vmem:[#allocation2 + $0xd0] sm:$0xff] %vm414_vm4, %v408_v44  ;;  %v364_v52 = vadd.f32 %v780_v35, %v363_v50  ;;  %v395_v53 = vmax.f32 %v289_v47, 0.0 }
  0xf7   :  { %v411_v54 = vmax.f32 %v369_v48, 0.0  ;;  %v394_v55 = vmax.f32 %v284_v51, 0.0  ;;  %v558_v57 = vpop.f32.mrb[14].mxu0 }
  0xf8   :  { %v410_v56 = vmax.f32 %v364_v52, 0.0  ;;  %v582_v58 = vpop.f32.mrb[14].mxu1  ;;  %428 = vst.msk [vmem:[#allocation2 + $0x68] sm:$0xff] %vm414_vm4, %v395_v53  ;;  %v299_v59 = vadd.f32 %v558_v57, %v780_v35  ;;  %v293_v61 = vpop.f32.mrb[15].mxu0 }
  0xf9   :  { %444 = vst.msk [vmem:[#allocation2 + $0xe8] sm:$0xff] %vm414_vm4, %v411_v54  ;;  %v379_v60 = vadd.f32 %v582_v58, %v780_v35  ;;  %v373_v62 = vpop.f32.mrb[15].mxu1  ;;  %427 = vst.msk [vmem:[#allocation2 + $0x60] sm:$0xff] %vm414_vm4, %v394_v55  ;;  %v294_v63 = vadd.f32 %v780_v35, %v293_v61 }
  0xfa   :  { %443 = vst.msk [vmem:[#allocation2 + $0xe0] sm:$0xff] %vm414_vm4, %v410_v56  ;;  %v374_v0 = vadd.f32 %v780_v35, %v373_v62  ;;  %v397_v1 = vmax.f32 %v299_v59, 0.0 }
  0xfb   :  { %v413_v2 = vmax.f32 %v379_v60, 0.0  ;;  %v396_v3 = vmax.f32 %v294_v63, 0.0 }
  0xfc   :  { %v412_v4 = vmax.f32 %v374_v0, 0.0  ;;  %430 = vst.msk [vmem:[#allocation2 + $0x78] sm:$0xff] %vm414_vm4, %v397_v1 }
  0xfd   :  { %446 = vst.msk [vmem:[#allocation2 + $0xf8] sm:$0xff] %vm414_vm4, %v413_v2  ;;  %429 = vst.msk [vmem:[#allocation2 + $0x70] sm:$0xff] %vm414_vm4, %v396_v3 }
  0xfe   :  { %445 = vst.msk [vmem:[#allocation2 + $0xf0] sm:$0xff] %vm414_vm4, %v412_v4 }
  0xff   :  { %606 = shalt.err (!%p603_p4)
}
 0x100   :  { %s607_s28 = scalar_lea.hbm %s861_s3, 4096 }
 0x101   :  { %p608_p5 = scmp.ne.s32.totalorder %s861_s3, %s607_s28  ;;  %p611_p6 = scmp.lt.u32.totalorder %s607_s28, %s861_s3 }
 0x103   :  { %p613_p7 = pnand %p611_p6, %p608_p5 }
 0x105   :  { %616 = shalt.err (!%p613_p7)
}
 0x106   :  { %s621_s6 = smov 128   ;;  %s622_s7 = smov 8  }
 0x107   :  { %458 = dma.vmem_to_hbm [thread:$0]  %s453_s2, 4096, %s861_s3, [#allocation3], %s621_s6, %s621_s6, %s622_s7  }
 0x108   :  { %617 = dma.done.wait [#allocation3], 4096  }
 0x109   :  { %618 = vsyncadd [#allocation3], 4294963200 }
 0x10a   :  { %462 = vsyncpa [#allocation3], 1 }

// kernel: foundation_stereo_forward.5
= control target key start
LH: loop header
LB: loop body
LE: loop exit
PB: predicated region body
PF: predicated region fallthrough
CT: control target
= control target key end

     0   :  { %vm102_vm0 = vcmask 1043456   ;;  %v5589_v0 = vmov 0.0|0.0   ;;  %vm5590_vm1 = vmmov 1   ;;  %v7848_v3 = vmov 0  ;;  %s7774_s5 = inlined_call_operand.vmem [shape: f32[12,28], index: 5, kind: input, shape index: {}]   ;;  %s7775_s6 = inlined_call_operand.vmem [shape: f32[12,28], index: 6, kind: input, shape index: {}]   ;;  %s7776_s2 = inlined_call_operand.vmem [shape: f32[1,8,8,12], index: 2, kind: input, shape index: {}]   ;;  %s7777_s3 = inlined_call_operand.vmem [shape: f32[1,8,11,12], index: 3, kind: input, shape index: {}]   ;;  %s7778_s4 = inlined_call_operand.vmem [shape: f32[32,28], index: 4, kind: input, shape index: {}]   ;;  %s7779_s0 = inlined_call_operand.vmem [shape: f32[1,8,8,32], index: 0, kind: input, shape index: {}]   ;;  %s7780_s1 = inlined_call_operand.vmem [shape: f32[1,8,11,32], index: 1, kind: input, shape index: {}]   ;;  %s7781_s8 = inlined_call_operand.vmem [shape: f32[28,1], index: 8, kind: input, shape index: {}]   ;;  %s7782_s7 = inlined_call_operand.vmem [shape: f32[1,28], index: 7, kind: input, shape index: {}]   ;;  %s7783_s9 = inlined_call_operand.vmem [shape: f32[1,8,8,1], index: 9, kind: output, shape index: {}]  }
   0x1   :  { %5355 = vmatprep.subr.bf16.mxu1 %v5589_v0  ;;  %v68_v1 = vld [vmem:[%s7774_s5] sm:$0xff]  ;;  %v69_v2 = vld [vmem:[%s7774_s5 + $0x8] sm:$0xf]  ;;  %vm5650_vm2 = vmpackc.low %vm102_vm0, %vm5590_vm1  ;;  %vm77_vm3 = vcmask 97280   ;;  %v231_v4 = vlaneseq  ;;  %vm5591_vm4 = vmmov 0   ;;  %v5592_v8 = vmov 0.0  }
   0x2   :  { %v7849_v3 = vsel %vm5650_vm2, 4294967295, %v7848_v3  ;;  %v5349_v5 = vpack.c.bf16 %v69_v2, %v68_v1  ;;  %v70_v6 = vld [vmem:[%s7775_s6] sm:$0xff]  ;;  %v71_v7 = vld [vmem:[%s7775_s6 + $0x8] sm:$0xf]  ;;  %5156 = vmatprep.mubr.msk.f32.mxu1 %vm5591_vm4, %v5592_v8  ;;  %v5593_v12 = vmov 1966171168  }
   0x3   :  { %7850 = vst [vmem:[#allocation2_spill] sm:$0xff] %v7849_v3  ;;  %v40_v9 = vld [vmem:[%s7776_s2] sm:$0xff]  ;;  %v5356_v10 = vpack.c.bf16 %v71_v7, %v70_v6  ;;  %v229_v13 = vunpack.c.l.s4 %v5593_v12  ;;  %v5669_v14 = vshrl.u32 %v231_v4, 7  ;;  %v41_v18 = vld [vmem:[%s7776_s2 + $0x8] sm:$0xff]  ;;  %v50_v19 = vld [vmem:[%s7777_s3 + $0x10] sm:$0xff]  ;;  %vm2066_vm5 = vcmask 261120  }
   0x4   :  { %5140 = vmatprep.mubr.msk.f32.mxu0 %vm77_vm3, %v40_v9  ;;  %v48_v11 = vld [vmem:[%s7777_s3] sm:$0xff]  ;;  %5351 = vmatprep.subr.msk.bf16.mxu0 %vm5650_vm2, %v5349_v5  ;;  %v4900_v15 = vld.sshfl [vmem:[%s7777_s3 + $0x8] sm:$0x13 pattern:$0x75316420]  ;;  %v42_v22 = vld [vmem:[%s7776_s2 + $0x10] sm:$0xff]  ;;  %v299_v23 = vcombine.high %v50_v19, %v50_v19 }
   0x5   :  { %7851 = vst [vmem:[#allocation3_spill] sm:$0xff] %v5669_v14  ;;  %5358 = vmatpush3.bf16.msk.msra.mxu1 %vm5650_vm2, %v5356_v10  ;;  %5354 = vmatpush3.bf16.msk.msra.mxu0 %vm5650_vm2, %v5349_v5  ;;  %v227_v16 = vcombine.high %v48_v11, %v48_v11  ;;  %v230_v17 = vunpack.c.0.s8 %v229_v13  ;;  %v283_v20 = vcombine.high %v4900_v15, %v4900_v15  ;;  %v4901_v21 = vld.sshfl [vmem:[%s7777_s3 + $0x18] sm:$0x13 pattern:$0x75316420]  ;;  %v64_v25 = vld [vmem:[%s7778_s4] sm:$0xff] }
   0x6   :  { %v355_v24 = vcombine.high %v4901_v21, %v4901_v21  ;;  %v65_v26 = vld [vmem:[%s7778_s4 + $0x8] sm:$0xff]  ;;  %v5704_v28 = vld [vmem:[%s7777_s3 + $0x20] sm:$0xff]  ;;  %v43_v37 = vld [vmem:[%s7776_s2 + $0x18] sm:$0xff]  ;;  %vm2855_vm6 = vcmp.ge.s32.totalorder %v5669_v14, 1  ;;  %vm3652_vm7 = vcmp.ge.s32.totalorder %v5669_v14, 2  ;;  %vm4265_vm8 = vcmp.ge.s32.totalorder %v5669_v14, 3 }
   0x7   :  { %v5699_v27 = vsub.s32 %v230_v17, %v5669_v14  ;;  %v5706_v29 = vpack.c.bf16 %v65_v26, %v64_v25  ;;  %v5711_v30 = vld.sshfl [vmem:[%s7777_s3 + $0x28] sm:$0x13 pattern:$0x75316420]  ;;  %v371_v31 = vcombine.high %v5704_v28, %v5704_v28  ;;  %v44_v40 = vld [vmem:[%s7776_s2 + $0x20] sm:$0xff]  ;;  %v46_v60 = vld [vmem:[%s7776_s2 + $0x30] sm:$0xff] }
   0x8   :  { %5141 = vmatmul.mubr.msk.f32.vlgmr.msra.gmra.mrb[0].mxu0 %vm77_vm3, %v41_v18  ;;  %v427_v32 = vcombine.high %v5711_v30, %v5711_v30  ;;  %v45_v55 = vld [vmem:[%s7776_s2 + $0x28] sm:$0xff]  ;;  %vm2626_vm9 = vcmask 228352   ;;  %vm4878_vm10 = vcmask 7168  }
   0x9   :  { %v234_v33 = vrot.slane %v48_v11, %v5699_v27  ;;  %v241_v34 = vrot.slane %v227_v16, %v5699_v27  ;;  %5143 = vmatprep.mubr.msk.f32.mxu0 %vm77_vm3, %v42_v22  ;;  %v290_v35 = vrot.slane %v4900_v15, %v5699_v27  ;;  %v297_v36 = vrot.slane %v283_v20, %v5699_v27  ;;  %v47_v11 = vld [vmem:[%s7776_s2 + $0x38] sm:$0xff] }
   0xa   :  { %v306_v38 = vrot.slane %v50_v19, %v5699_v27  ;;  %v313_v39 = vrot.slane %v299_v23, %v5699_v27  ;;  %v362_v41 = vrot.slane %v4901_v21, %v5699_v27  ;;  %v369_v42 = vrot.slane %v355_v24, %v5699_v27  ;;  %5360 = vmatprep.subr.bf16.mxu0 %v5706_v29 }
   0xb   :  { %v242_v43 = vcombine.high %v234_v33, %v234_v33  ;;  %v243_v44 = vcombine.high %v241_v34, %v241_v34  ;;  %v250_v45 = vrot.slane %v234_v33, %v5699_v27  ;;  %v257_v46 = vrot.slane %v241_v34, %v5699_v27  ;;  %5362 = vmatpush3.bf16.msra.mxu0 %v5706_v29 }
   0xc   :  { %v298_v47 = vcombine.high %v290_v35, %v290_v35  ;;  %v314_v48 = vcombine.high %v306_v38, %v306_v38  ;;  %v322_v49 = vrot.slane %v306_v38, %v5699_v27  ;;  %v329_v50 = vrot.slane %v313_v39, %v5699_v27  ;;  %5144 = vmatmul.mubr.msk.f32.gmra.mrb[2].mxu0 %vm77_vm3, %v43_v37 }
   0xd   :  { %v264_v51 = vrot.slane %v242_v43, %v5699_v27  ;;  %v271_v52 = vrot.slane %v243_v44, %v5699_v27  ;;  %v852_v53 = vcombine.low %v290_v35, %v297_v36  ;;  %5146 = vmatprep.mubr.msk.f32.mxu0 %vm77_vm3, %v44_v40  ;;  %v315_v54 = vcombine.high %v313_v39, %v313_v39 }
   0xe   :  { %v336_v56 = vrot.slane %v314_v48, %v5699_v27  ;;  %v344_v57 = vcombine.high %v322_v49, %v322_v49  ;;  %v853_v58 = vcombine.low %v298_v47, %v322_v49  ;;  %v345_v59 = vcombine.high %v329_v50, %v329_v50  ;;  %5378 = vmatprep.subr.bf16.mxu1 %v5706_v29 }
   0xf   :  { %v803_v61 = vcombine.low %v250_v45, %v264_v51  ;;  %v4908_v62 = vcombine.high %v250_v45, %v264_v51  ;;  %v805_v63 = vcombine.low %v257_v46, %v271_v52  ;;  %v4909_v0 = vcombine.high %v257_v46, %v271_v52  ;;  %v66_v45 = vld [vmem:[%s7778_s4 + $0x10] sm:$0xff] }
  0x10   :  { %v346_v1 = vcombine.high %v336_v56, %v336_v56  ;;  %v854_v2 = vcombine.low %v336_v56, %v344_v57  ;;  %v862_v4 = vrot.slane %v852_v53, %v5699_v27  ;;  %v869_v5 = vrot.slane %v853_v58, %v5699_v27  ;;  %5147 = vmatmul.mubr.msk.f32.gmra.mrb[4].mxu0 %vm77_vm3, %v45_v55  ;;  %v54_v51 = vld [vmem:[%s7777_s3 + $0x30] sm:$0xff]  ;;  %v5809_v58 = vld [vmem:[%s7779_s0] sm:$0xff] }
  0x11   :  { %v813_v6 = vrot.slane %v803_v61, %v5699_v27  ;;  %v820_v7 = vrot.slane %v4908_v62, %v5699_v27  ;;  %v827_v9 = vrot.slane %v805_v63, %v5699_v27  ;;  %v834_v10 = vrot.slane %v4909_v0, %v5699_v27  ;;  %5149 = vmatprep.mubr.msk.f32.mxu0 %vm77_vm3, %v46_v60  ;;  %v5821_v0 = vld [vmem:[%s7779_s0 + $0x8] sm:$0xff] }
  0x12   :  { %v855_v12 = vcombine.low %v346_v1, %v329_v50  ;;  %v876_v13 = vrot.slane %v854_v2, %v5699_v27  ;;  %v884_v15 = vcombine.low %v862_v4, %v869_v5  ;;  %v343_v16 = vrot.slane %v315_v54, %v5699_v27  ;;  %v2040_v1 = vld [vmem:[%s7780_s1 + $0x13] sm:$0xff] }
  0x13   :  { %v835_v17 = vcombine.low %v813_v6, %v820_v7  ;;  %v836_v18 = vcombine.low %v827_v9, %v834_v10  ;;  %v370_v19 = vcombine.high %v362_v41, %v362_v41  ;;  %v378_v20 = vrot.slane %v5704_v28, %v5699_v27 }
  0x14   :  { %v883_v21 = vrot.slane %v855_v12, %v5699_v27  ;;  %v892_v22 = vrot.slane %v884_v15, %v5699_v27  ;;  %v347_v23 = vcombine.high %v343_v16, %v343_v16  ;;  %v901_v24 = vcombine.low %v343_v16, %v345_v59  ;;  %5150 = vmatmul.mubr.msk.f32.gmra.mrb[6].mxu0 %vm77_vm3, %v47_v11  ;;  %v2039_v59 = vld [vmem:[%s7780_s1 + $0x3] sm:$0xff] }
  0x15   :  { %v843_v25 = vrot.slane %v835_v17, %v5699_v27  ;;  %v850_v26 = vrot.slane %v836_v18, %v5699_v27  ;;  %v386_v33 = vcombine.high %v378_v20, %v378_v20  ;;  %v394_v34 = vrot.slane %v378_v20, %v5699_v27  ;;  %v4903_v20 = vld.sshfl [vmem:[%s7777_s3 + $0x38] sm:$0x13 pattern:$0x75316420] }
  0x16   :  { %v885_v35 = vcombine.low %v876_v13, %v883_v21  ;;  %v902_v36 = vcombine.low %v347_v23, %v362_v41  ;;  %v903_v37 = vcombine.low %v369_v42, %v370_v19  ;;  %v911_v38 = vrot.slane %v901_v24, %v5699_v27  ;;  %v67_v41 = vld [vmem:[%s7778_s4 + $0x18] sm:$0xff] }
  0x17   :  { %v851_v39 = vcombine.low %v843_v25, %v850_v26  ;;  %v408_v40 = vrot.slane %v386_v33, %v5699_v27  ;;  %v385_v43 = vrot.slane %v371_v31, %v5699_v27  ;;  %v434_v44 = vrot.slane %v5711_v30, %v5699_v27 }
  0x18   :  { %v899_v42 = vrot.slane %v885_v35, %v5699_v27  ;;  %v918_v46 = vrot.slane %v902_v36, %v5699_v27  ;;  %v925_v47 = vrot.slane %v903_v37, %v5699_v27  ;;  %v441_v28 = vrot.slane %v427_v32, %v5699_v27  ;;  %v56_v35 = vld [vmem:[%s7777_s3 + $0x40] sm:$0xff] }
  0x19   :  { %5157 = vmatmul.mubr.msk.f32.vlgmr.msra.gmra.mrb[0].mxu1 %vm77_vm3, %v851_v39  ;;  %v904_v31 = vcombine.low %v394_v34, %v408_v40  ;;  %v387_v48 = vcombine.high %v385_v43, %v385_v43  ;;  %v401_v49 = vrot.slane %v385_v43, %v5699_v27  ;;  %v4910_v50 = vcombine.high %v394_v34, %v408_v40 }
  0x1a   :  { %5159 = vmatprep.mubr.msk.f32.mxu1 %vm5591_vm4, %v5592_v8  ;;  %v900_v52 = vcombine.low %v892_v22, %v899_v42  ;;  %v933_v53 = vcombine.low %v911_v38, %v918_v46  ;;  %v953_v54 = vcombine.low %v434_v44, %v441_v28  ;;  %v5800_v55 = vpack.c.bf16 %v67_v41, %v66_v45  ;;  %v4904_v28 = vld.sshfl [vmem:[%s7777_s3 + $0x48] sm:$0x13 pattern:$0x75316420] }
  0x1b   :  { %v932_v30 = vrot.slane %v904_v31, %v5699_v27  ;;  %v415_v32 = vrot.slane %v387_v48, %v5699_v27  ;;  %v960_v56 = vrot.slane %v4910_v50, %v5699_v27  ;;  %5380 = vmatpush3.bf16.msra.mxu1 %v5706_v29  ;;  %v442_v57 = vcombine.high %v434_v44, %v434_v44 }
  0x1c   :  { %v941_v60 = vrot.slane %v933_v53, %v5699_v27  ;;  %v981_v61 = vrot.slane %v953_v54, %v5699_v27  ;;  %5364 = vmatprep.subr.bf16.mxu0 %v5800_v55  ;;  %v443_v62 = vcombine.high %v54_v51, %v54_v51  ;;  %v450_v63 = vrot.slane %v54_v51, %v5699_v27 }
  0x1d   :  { %5160 = vmatmul.mubr.msk.f32.gmra.mrb[2].mxu1 %vm77_vm3, %v900_v52  ;;  %v934_v2 = vcombine.low %v925_v47, %v932_v30  ;;  %v951_v4 = vcombine.low %v401_v49, %v415_v32  ;;  %v4911_v5 = vcombine.high %v401_v49, %v415_v32  ;;  %5366 = vmatpush3.bf16.msra.mxu0 %v5800_v55 }
  0x1e   :  { %5162 = vmatprep.mubr.msk.f32.mxu1 %vm5591_vm4, %v5592_v8  ;;  %v457_v6 = vrot.slane %v443_v62, %v5699_v27  ;;  %v458_v7 = vcombine.high %v450_v63, %v450_v63  ;;  %v466_v9 = vrot.slane %v450_v63, %v5699_v27  ;;  %v2047_v10 = vmul.f32 %v2039_v59, %v5809_v58 }
  0x1f   :  { %v948_v11 = vrot.slane %v934_v2, %v5699_v27  ;;  %v967_v12 = vrot.slane %v951_v4, %v5699_v27  ;;  %v974_v13 = vrot.slane %v4911_v5, %v5699_v27  ;;  %v2048_v15 = vmul.f32 %v2040_v1, %v5821_v0  ;;  %5382 = vmatprep.subr.bf16.mxu1 %v5800_v55  ;;  %v58_v1 = vld [vmem:[%s7777_s3 + $0x50] sm:$0xff] }
  0x20   :  { %v459_v16 = vcombine.high %v457_v6, %v457_v6  ;;  %v473_v17 = vrot.slane %v457_v6, %v5699_v27  ;;  %v480_v18 = vrot.slane %v458_v7, %v5699_v27  ;;  %v488_v19 = vcombine.high %v466_v9, %v466_v9  ;;  %5197 = vmatprep.mubr.msk.f32.mxu0 %vm2066_vm5, %v2047_v10 }
  0x21   :  { %v949_v21 = vcombine.low %v941_v60, %v948_v11  ;;  %v982_v22 = vcombine.low %v960_v56, %v967_v12  ;;  %v983_v23 = vcombine.low %v974_v13, %v981_v61  ;;  %v999_v24 = vcombine.low %v442_v57, %v466_v9  ;;  %5198 = vmatmul.mubr.msk.f32.vlgmr.msra.gmra.mrb[8].mxu0 %vm2066_vm5, %v2048_v15 }
  0x22   :  { %v487_v25 = vrot.slane %v459_v16, %v5699_v27  ;;  %v489_v26 = vcombine.high %v473_v17, %v473_v17  ;;  %v490_v33 = vcombine.high %v480_v18, %v480_v18  ;;  %v1000_v34 = vcombine.low %v480_v18, %v488_v19  ;;  %5384 = vmatpush3.bf16.msra.mxu1 %v5800_v55 }
  0x23   :  { %5163 = vmatmul.mubr.msk.f32.gmra.mrb[4].mxu1 %vm77_vm3, %v949_v21  ;;  %v990_v36 = vrot.slane %v982_v22, %v5699_v27  ;;  %v997_v37 = vrot.slane %v983_v23, %v5699_v27  ;;  %v1009_v38 = vrot.slane %v999_v24, %v5699_v27  ;;  %v499_v39 = vcombine.high %v4903_v20, %v4903_v20 }
  0x24   :  { %5165 = vmatprep.mubr.msk.f32.mxu1 %vm5591_vm4, %v5592_v8  ;;  %v1001_v40 = vcombine.low %v490_v33, %v473_v17  ;;  %v1002_v43 = vcombine.low %v487_v25, %v489_v26  ;;  %v1016_v44 = vrot.slane %v1000_v34, %v5699_v27  ;;  %v491_v45 = vcombine.high %v487_v25, %v487_v25  ;;  %v4905_v26 = vld.sshfl [vmem:[%s7777_s3 + $0x58] sm:$0x13 pattern:$0x75316420] }
  0x25   :  { %v998_v41 = vcombine.low %v990_v36, %v997_v37  ;;  %v506_v42 = vrot.slane %v4903_v20, %v5699_v27  ;;  %v513_v46 = vrot.slane %v499_v39, %v5699_v27  ;;  %v522_v47 = vrot.slane %v56_v35, %v5699_v27  ;;  %5396 = vmatprep.subr.bf16.mxu1 %v5706_v29  ;;  %v2041_v36 = vld [vmem:[%s7780_s1 + $0x23] sm:$0xff] }
  0x26   :  { %v1023_v31 = vrot.slane %v1001_v40, %v5699_v27  ;;  %v1030_v48 = vrot.slane %v1002_v43, %v5699_v27  ;;  %v1031_v49 = vcombine.low %v1009_v38, %v1016_v44  ;;  %v515_v50 = vcombine.high %v56_v35, %v56_v35  ;;  %v5899_v35 = vld [vmem:[%s7779_s0 + $0x10] sm:$0xff] }
  0x27   :  { %5166 = vmatmul.mubr.msk.f32.gmra.mrb[6].mxu1 %vm77_vm3, %v998_v41  ;;  %v514_v51 = vcombine.high %v506_v42, %v506_v42  ;;  %v530_v52 = vcombine.high %v522_v47, %v522_v47  ;;  %v538_v53 = vrot.slane %v522_v47, %v5699_v27  ;;  %v1048_v54 = vcombine.low %v491_v45, %v506_v42  ;;  %v5912_v42 = vld [vmem:[%s7779_s0 + $0x18] sm:$0xff] }
  0x28   :  { %5168 = vmatprep.mubr.msk.f32.mxu1 %vm5591_vm4, %v5592_v8  ;;  %v1032_v30 = vcombine.low %v1023_v31, %v1030_v48  ;;  %v1039_v32 = vrot.slane %v1031_v49, %v5699_v27  ;;  %v529_v56 = vrot.slane %v515_v50, %v5699_v27  ;;  %v571_v57 = vcombine.high %v4904_v28, %v4904_v28 }
  0x29   :  { %v552_v59 = vrot.slane %v530_v52, %v5699_v27  ;;  %v1049_v60 = vcombine.low %v513_v46, %v514_v51  ;;  %v1058_v61 = vrot.slane %v1048_v54, %v5699_v27  ;;  %v578_v62 = vrot.slane %v4904_v28, %v5699_v27  ;;  %v2042_v46 = vld [vmem:[%s7780_s1 + $0x33] sm:$0xff] }
  0x2a   :  { %v1046_v63 = vrot.slane %v1032_v30, %v5699_v27  ;;  %v531_v2 = vcombine.high %v529_v56, %v529_v56  ;;  %v545_v4 = vrot.slane %v529_v56, %v5699_v27  ;;  %v585_v5 = vrot.slane %v571_v57, %v5699_v27 }
  0x2b   :  { %v1050_v6 = vcombine.low %v538_v53, %v552_v59  ;;  %v4912_v7 = vcombine.high %v538_v53, %v552_v59  ;;  %v1065_v9 = vrot.slane %v1049_v60, %v5699_v27  ;;  %v586_v10 = vcombine.high %v578_v62, %v578_v62  ;;  %v60_v60 = vld [vmem:[%s7777_s3 + $0x60] sm:$0xff] }
  0x2c   :  { %v1047_v11 = vcombine.low %v1039_v32, %v1046_v63  ;;  %v559_v12 = vrot.slane %v531_v2, %v5699_v27  ;;  %v594_v13 = vrot.slane %v58_v1, %v5699_v27  ;;  %v1099_v15 = vcombine.low %v578_v62, %v585_v5  ;;  %v5931_v62 = vld [vmem:[%s7779_s0 + $0x20] sm:$0xff]  ;;  %v5944_v5 = vld [vmem:[%s7779_s0 + $0x28] sm:$0xff] }
  0x2d   :  { %v1072_v16 = vrot.slane %v1050_v6, %v5699_v27  ;;  %v1079_v17 = vrot.slane %v4912_v7, %v5699_v27  ;;  %v1080_v18 = vcombine.low %v1058_v61, %v1065_v9  ;;  %v587_v19 = vcombine.high %v58_v1, %v58_v1  ;;  %v2043_v63 = vld [vmem:[%s7780_s1 + $0x43] sm:$0xff]  ;;  %v2044_v6 = vld [vmem:[%s7780_s1 + $0x53] sm:$0xff] }
  0x2e   :  { %5169 = vmatmul.mubr.msk.f32.gmra.mrb[8].mxu1 %vm77_vm3, %v1047_v11  ;;  %v610_v20 = vrot.slane %v594_v13, %v5699_v27  ;;  %v1097_v21 = vcombine.low %v545_v4, %v559_v12  ;;  %v4913_v22 = vcombine.high %v545_v4, %v559_v12  ;;  %v1121_v23 = vrot.slane %v1099_v15, %v5699_v27 }
  0x2f   :  { %5171 = vmatprep.mubr.msk.f32.mxu1 %vm5591_vm4, %v5592_v8  ;;  %v1081_v24 = vcombine.low %v1072_v16, %v1079_v17  ;;  %v1088_v25 = vrot.slane %v1080_v18, %v5699_v27  ;;  %v601_v33 = vrot.slane %v587_v19, %v5699_v27  ;;  %v602_v34 = vcombine.high %v594_v13, %v594_v13 }
  0x30   :  { %v1100_v37 = vcombine.low %v586_v10, %v610_v20  ;;  %v1107_v38 = vrot.slane %v1097_v21, %v5699_v27  ;;  %v1114_v39 = vrot.slane %v4913_v22, %v5699_v27  ;;  %v632_v40 = vcombine.high %v610_v20, %v610_v20  ;;  %v4906_v21 = vld.sshfl [vmem:[%s7777_s3 + $0x68] sm:$0x13 pattern:$0x75316420] }
  0x31   :  { %v1095_v43 = vrot.slane %v1081_v24, %v5699_v27  ;;  %v603_v44 = vcombine.high %v601_v33, %v601_v33  ;;  %v617_v45 = vrot.slane %v601_v33, %v5699_v27  ;;  %v624_v41 = vrot.slane %v602_v34, %v5699_v27  ;;  %v2045_v33 = vld [vmem:[%s7780_s1 + $0x63] sm:$0xff] }
  0x32   :  { %v1128_v47 = vrot.slane %v1100_v37, %v5699_v27  ;;  %v1129_v28 = vcombine.low %v1107_v38, %v1114_v39  ;;  %v650_v31 = vrot.slane %v4905_v26, %v5699_v27  ;;  %v2049_v48 = vmul.f32 %v2041_v36, %v5899_v35 }
  0x33   :  { %v1096_v49 = vcombine.low %v1088_v25, %v1095_v43  ;;  %v631_v50 = vrot.slane %v603_v44, %v5699_v27  ;;  %v633_v51 = vcombine.high %v617_v45, %v617_v45  ;;  %v634_v52 = vcombine.high %v624_v41, %v624_v41  ;;  %v62_v25 = vld [vmem:[%s7777_s3 + $0x70] sm:$0xff] }
  0x34   :  { %v1130_v53 = vcombine.low %v1121_v23, %v1128_v47  ;;  %v1137_v54 = vrot.slane %v1129_v28, %v5699_v27  ;;  %v1146_v30 = vcombine.low %v624_v41, %v632_v40  ;;  %5200 = vmatprep.mubr.msk.f32.mxu0 %vm2066_vm5, %v2049_v48  ;;  %v2050_v32 = vmul.f32 %v2042_v46, %v5912_v42 }
  0x35   :  { %5172 = vmatmul.mubr.msk.f32.gmra.mrb[10].mxu1 %vm77_vm3, %v1096_v49  ;;  %v635_v56 = vcombine.high %v631_v50, %v631_v50  ;;  %v1147_v57 = vcombine.low %v634_v52, %v617_v45  ;;  %v1148_v59 = vcombine.low %v631_v50, %v633_v51  ;;  %v643_v61 = vcombine.high %v4905_v26, %v4905_v26  ;;  %v5969_v26 = vld [vmem:[%s7779_s0 + $0x30] sm:$0xff] }
  0x36   :  { %5174 = vmatprep.mubr.msk.f32.mxu1 %vm5591_vm4, %v5592_v8  ;;  %v1144_v1 = vrot.slane %v1130_v53, %v5699_v27  ;;  %v1156_v2 = vrot.slane %v1146_v30, %v5699_v27  ;;  %5201 = vmatmul.mubr.msk.f32.gmra.mrb[10].mxu0 %vm2066_vm5, %v2050_v32  ;;  %v658_v4 = vcombine.high %v650_v31, %v650_v31  ;;  %v5992_v53 = vld [vmem:[%s7779_s0 + $0x38] sm:$0xff] }
  0x37   :  { %v1149_v7 = vcombine.low %v635_v56, %v650_v31  ;;  %v1163_v9 = vrot.slane %v1147_v57, %v5699_v27  ;;  %v1170_v10 = vrot.slane %v1148_v59, %v5699_v27  ;;  %v657_v11 = vrot.slane %v643_v61, %v5699_v27 }
  0x38   :  { %v1145_v12 = vcombine.low %v1137_v54, %v1144_v1  ;;  %v659_v13 = vcombine.high %v60_v60, %v60_v60  ;;  %v666_v15 = vrot.slane %v60_v60, %v5699_v27  ;;  %v2051_v16 = vmul.f32 %v2043_v63, %v5931_v62  ;;  %v2046_v54 = vld [vmem:[%s7780_s1 + $0x73] sm:$0xff] }
  0x39   :  { %v1177_v17 = vrot.slane %v1149_v7, %v5699_v27  ;;  %v1178_v18 = vcombine.low %v1156_v2, %v1163_v9  ;;  %v1195_v19 = vcombine.low %v657_v11, %v658_v4  ;;  %v2052_v20 = vmul.f32 %v2044_v6, %v5944_v5  ;;  %v4907_v1 = vld.sshfl [vmem:[%s7777_s3 + $0x78] sm:$0x13 pattern:$0x75316420] }
  0x3a   :  { %5175 = vmatmul.mubr.msk.f32.gmra.mrb[12].mxu1 %vm77_vm3, %v1145_v12  ;;  %v673_v22 = vrot.slane %v659_v13, %v5699_v27  ;;  %v674_v23 = vcombine.high %v666_v15, %v666_v15  ;;  %v682_v24 = vrot.slane %v666_v15, %v5699_v27  ;;  %5203 = vmatprep.mubr.msk.f32.mxu0 %vm2066_vm5, %v2051_v16 }
  0x3b   :  { %5177 = vmatprep.mubr.msk.f32.mxu1 %vm5591_vm4, %v5592_v8  ;;  %v1179_v34 = vcombine.low %v1170_v10, %v1177_v17  ;;  %v1186_v36 = vrot.slane %v1178_v18, %v5699_v27  ;;  %v1205_v37 = vrot.slane %v1195_v19, %v5699_v27  ;;  %5204 = vmatmul.mubr.msk.f32.gmra.mrb[12].mxu0 %vm2066_vm5, %v2052_v20 }
  0x3c   :  { %v675_v38 = vcombine.high %v673_v22, %v673_v22  ;;  %v689_v39 = vrot.slane %v673_v22, %v5699_v27  ;;  %v696_v40 = vrot.slane %v674_v23, %v5699_v27  ;;  %v715_v43 = vcombine.high %v4906_v21, %v4906_v21 }
  0x3d   :  { %v1193_v44 = vrot.slane %v1179_v34, %v5699_v27  ;;  %v722_v45 = vrot.slane %v4906_v21, %v5699_v27  ;;  %v738_v41 = vrot.slane %v62_v25, %v5699_v27  ;;  %v2053_v46 = vmul.f32 %v2045_v33, %v5969_v26 }
  0x3e   :  { %v703_v47 = vrot.slane %v675_v38, %v5699_v27  ;;  %v1196_v28 = vcombine.low %v682_v24, %v696_v40  ;;  %v4914_v31 = vcombine.high %v682_v24, %v696_v40  ;;  %v729_v48 = vrot.slane %v715_v43, %v5699_v27 }
  0x3f   :  { %v1194_v49 = vcombine.low %v1186_v36, %v1193_v44  ;;  %v730_v50 = vcombine.high %v722_v45, %v722_v45  ;;  %v746_v51 = vcombine.high %v738_v41, %v738_v41  ;;  %v754_v52 = vrot.slane %v738_v41, %v5699_v27  ;;  %5206 = vmatprep.mubr.msk.f32.mxu0 %vm2066_vm5, %v2053_v46  ;;  %v3636_v44 = vld [vmem:[%s7780_s1 + $0x1] sm:$0xff] }
  0x40   :  { %v1198_v30 = vcombine.low %v689_v39, %v703_v47  ;;  %v1212_v32 = vrot.slane %v1196_v28, %v5699_v27  ;;  %v1219_v56 = vrot.slane %v4914_v31, %v5699_v27  ;;  %v4915_v57 = vcombine.high %v689_v39, %v703_v47 }
  0x41   :  { %5178 = vmatmul.mubr.msk.f32.gmra.mrb[14].mxu1 %vm77_vm3, %v1194_v49  ;;  %v768_v59 = vrot.slane %v746_v51, %v5699_v27  ;;  %v776_v60 = vcombine.high %v754_v52, %v754_v52  ;;  %v1245_v61 = vcombine.low %v722_v45, %v729_v48  ;;  %v1246_v63 = vcombine.low %v730_v50, %v754_v52  ;;  %v3637_v45 = vld [vmem:[%s7780_s1 + $0x11] sm:$0xff]  ;;  %v4249_v50 = vld [vmem:[%s7780_s1] sm:$0xff] }
  0x42   :  { %5180 = vmatprep.mubr.msk.f32.mxu1 %vm5591_vm4, %v5592_v8  ;;  %v1226_v2 = vrot.slane %v1198_v30, %v5699_v27  ;;  %v1227_v4 = vcombine.low %v1205_v37, %v1212_v32  ;;  %v1254_v6 = vrot.slane %v4915_v57, %v5699_v27  ;;  %v2054_v7 = vmul.f32 %v2046_v54, %v5992_v53  ;;  %v4250_v51 = vld [vmem:[%s7780_s1 + $0x10] sm:$0xff]  ;;  %v4251_v52 = vld [vmem:[%s7780_s1 + $0x20] sm:$0xff] }
  0x43   :  { %v1247_v9 = vcombine.low %v768_v59, %v776_v60  ;;  %v1261_v10 = vrot.slane %v1245_v61, %v5699_v27  ;;  %v1268_v11 = vrot.slane %v1246_v63, %v5699_v27  ;;  %v731_v12 = vcombine.high %v62_v25, %v62_v25  ;;  %v4253_v57 = vld [vmem:[%s7780_s1 + $0x40] sm:$0xff]  ;;  %v4256_v61 = vld [vmem:[%s7780_s1 + $0x70] sm:$0xff] }
  0x44   :  { %v1228_v13 = vcombine.low %v1219_v56, %v1226_v2  ;;  %v1235_v15 = vrot.slane %v1227_v4, %v5699_v27  ;;  %5207 = vmatmul.mubr.msk.f32.gmra.mrb[14].mxu0 %vm2066_vm5, %v2054_v7  ;;  %v778_v16 = vcombine.high %v768_v59, %v768_v59  ;;  %v787_v17 = vcombine.high %v4907_v1, %v4907_v1  ;;  %v4252_v56 = vld [vmem:[%s7780_s1 + $0x30] sm:$0xff]  ;;  %v4255_v60 = vld [vmem:[%s7780_s1 + $0x60] sm:$0xff] }
  0x45   :  { %v1275_v18 = vrot.slane %v1247_v9, %v5699_v27  ;;  %v1276_v19 = vcombine.low %v1254_v6, %v1261_v10  ;;  %v745_v20 = vrot.slane %v731_v12, %v5699_v27  ;;  %v794_v21 = vrot.slane %v4907_v1, %v5699_v27  ;;  %v4254_v59 = vld [vmem:[%s7780_s1 + $0x50] sm:$0xff]  ;;  %v2839_v12 = vld [vmem:[%s7780_s1 + $0x2] sm:$0xff] }
  0x46   :  { %v1242_v22 = vrot.slane %v1228_v13, %v5699_v27  ;;  %v801_v23 = vrot.slane %v787_v17, %v5699_v27  ;;  %v3644_v48 = vmul.f32 %v3636_v44, %v5809_v58  ;;  %v3645_v49 = vmul.f32 %v3637_v45, %v5821_v0  ;;  %v3640_v44 = vld [vmem:[%s7780_s1 + $0x41] sm:$0xff] }
  0x47   :  { %v1277_v24 = vcombine.low %v1268_v11, %v1275_v18  ;;  %v1284_v25 = vrot.slane %v1276_v19, %v5699_v27  ;;  %v747_v33 = vcombine.high %v745_v20, %v745_v20  ;;  %v761_v34 = vrot.slane %v745_v20, %v5699_v27  ;;  %v2840_v18 = vld [vmem:[%s7780_s1 + $0x12] sm:$0xff]  ;;  %v2841_v20 = vld [vmem:[%s7780_s1 + $0x22] sm:$0xff] }
  0x48   :  { %v1243_v36 = vcombine.low %v1235_v15, %v1242_v22  ;;  %v802_v37 = vcombine.high %v794_v21, %v794_v21  ;;  %v6065_v2 = vmul.f32 %v4249_v50, %v5809_v58  ;;  %v6068_v4 = vmul.f32 %v4250_v51, %v5821_v0 }
  0x49   :  { %v1291_v38 = vrot.slane %v1277_v24, %v5699_v27  ;;  %v775_v39 = vrot.slane %v747_v33, %v5699_v27  ;;  %v777_v40 = vcombine.high %v761_v34, %v761_v34  ;;  %v1293_v43 = vcombine.low %v778_v16, %v761_v34  ;;  %v2845_v33 = vld [vmem:[%s7780_s1 + $0x62] sm:$0xff] }
  0x4a   :  { %5181 = vmatmul.mubr.msk.f32.gmra.mrb[16].mxu1 %vm77_vm3, %v1243_v36  ;;  %v1296_v41 = vcombine.low %v801_v23, %v802_v37  ;;  %v6071_v6 = vmul.f32 %v4251_v52, %v5899_v35  ;;  %v6074_v7 = vmul.f32 %v4252_v56, %v5912_v42  ;;  %v6077_v9 = vmul.f32 %v4253_v57, %v5931_v62  ;;  %v2843_v23 = vld [vmem:[%s7780_s1 + $0x42] sm:$0xff]  ;;  %v2846_v37 = vld [vmem:[%s7780_s1 + $0x72] sm:$0xff] }
  0x4b   :  { %5183 = vmatprep.mubr.msk.f32.mxu1 %vm5591_vm4, %v5592_v8  ;;  %v1292_v46 = vcombine.low %v1284_v25, %v1291_v38  ;;  %v779_v47 = vcombine.high %v775_v39, %v775_v39  ;;  %v1294_v28 = vcombine.low %v775_v39, %v777_v40  ;;  %v1303_v31 = vrot.slane %v1293_v43, %v5699_v27  ;;  %v2844_v25 = vld [vmem:[%s7780_s1 + $0x52] sm:$0xff]  ;;  %v3638_v39 = vld [vmem:[%s7780_s1 + $0x21] sm:$0xff] }
  0x4c   :  { %v1324_v32 = vrot.slane %v1296_v41, %v5699_v27  ;;  %v4263_v13 = vmul.f32 %v4255_v60, %v5969_v26  ;;  %v4264_v15 = vmul.f32 %v4256_v61, %v5992_v53  ;;  %v2847_v17 = vmul.f32 %v2839_v12, %v5809_v58  ;;  %v2842_v58 = vld [vmem:[%s7780_s1 + $0x32] sm:$0xff] }
  0x4d   :  { %v1295_v54 = vcombine.low %v779_v47, %v794_v21  ;;  %v1310_v30 = vrot.slane %v1294_v28, %v5699_v27  ;;  %v2848_v21 = vmul.f32 %v2840_v18, %v5821_v0  ;;  %v2849_v22 = vmul.f32 %v2841_v20, %v5899_v35  ;;  %v3639_v43 = vld [vmem:[%s7780_s1 + $0x31] sm:$0xff] }
  0x4e   :  { %5184 = vmatmul.mubr.msk.f32.gmra.mrb[18].mxu1 %vm77_vm3, %v1292_v46  ;;  %v2850_v24 = vmul.f32 %v2842_v58, %v5912_v42  ;;  %v2851_v0 = vmul.f32 %v2843_v23, %v5931_v62  ;;  %v2852_v34 = vmul.f32 %v2844_v25, %v5944_v5  ;;  %v2853_v36 = vmul.f32 %v2845_v33, %v5969_v26  ;;  %v3642_v46 = vld [vmem:[%s7780_s1 + $0x61] sm:$0xff]  ;;  %v3643_v47 = vld [vmem:[%s7780_s1 + $0x71] sm:$0xff] }
  0x4f   :  { %5186 = vmatprep.mubr.msk.f32.mxu1 %vm5591_vm4, %v5592_v8  ;;  %v1317_v63 = vrot.slane %v1295_v54, %v5699_v27  ;;  %v1325_v1 = vcombine.low %v1303_v31, %v1310_v30  ;;  %v6080_v8 = vmul.f32 %v4254_v59, %v5944_v5  ;;  %v2854_v38 = vmul.f32 %v2846_v37, %v5992_v53  ;;  %v76_v28 = vld [vmem:[%s7781_s8 + $0x18] sm:$0xf] }
  0x50   :  { %v3646_v40 = vmul.f32 %v3638_v39, %v5899_v35  ;;  %v3647_v45 = vmul.f32 %v3639_v43, %v5912_v42  ;;  %v3648_v41 = vmul.f32 %v3640_v44, %v5931_v62  ;;  %v3641_v35 = vld [vmem:[%s7780_s1 + $0x51] sm:$0xff]  ;;  %v3650_v62 = vmul.f32 %v3642_v46, %v5969_v26 }
  0x51   :  { %v1326_v10 = vcombine.low %v1317_v63, %v1324_v32  ;;  %v1333_v11 = vrot.slane %v1325_v1, %v5699_v27  ;;  %v3649_v42 = vmul.f32 %v3641_v35, %v5944_v5  ;;  %v74_v5 = vld [vmem:[%s7781_s8 + $0x8] sm:$0xff] }
  0x53   :  { %v1340_v16 = vrot.slane %v1326_v10, %v5699_v27 }
  0x55   :  { %v1341_v19 = vcombine.low %v1333_v11, %v1340_v16 }
  0x57   :  { %5187 = vmatmul.mubr.msk.f32.gmra.mrb[20].mxu1 %vm77_vm3, %v1341_v19 }
  0x58   :  { %5237 = vmatprep.mubr.msk.f32.mxu1 %vm2066_vm5, %v2847_v17 }
  0x5b   :  { %5238 = vmatmul.mubr.msk.f32.vlgmr.msra.gmra.mrb[22].mxu1 %vm2066_vm5, %v2848_v21 }
  0x5c   :  { %5240 = vmatprep.mubr.msk.f32.mxu1 %vm2066_vm5, %v2849_v22  ;;  %5398 = vmatpush3.bf16.msra.mxu1 %v5706_v29 }
  0x5d   :  { %5400 = vmatprep.subr.bf16.mxu1 %v5800_v55 }
  0x5f   :  { %5241 = vmatmul.mubr.msk.f32.gmra.mrb[24].mxu1 %vm2066_vm5, %v2850_v24 }
  0x60   :  { %5243 = vmatprep.mubr.msk.f32.mxu1 %vm2066_vm5, %v2851_v0  ;;  %5402 = vmatpush3.bf16.msra.mxu1 %v5800_v55 }
  0x61   :  { %5414 = vmatprep.subr.bf16.mxu1 %v5706_v29 }
  0x63   :  { %5244 = vmatmul.mubr.msk.f32.gmra.mrb[26].mxu1 %vm2066_vm5, %v2852_v34 }
  0x64   :  { %5246 = vmatprep.mubr.msk.f32.mxu1 %vm2066_vm5, %v2853_v36 }
  0x67   :  { %5247 = vmatmul.mubr.msk.f32.gmra.mrb[28].mxu1 %vm2066_vm5, %v2854_v38 }
  0x68   :  { %5277 = vmatprep.mubr.msk.f32.mxu1 %vm2066_vm5, %v3644_v48 }
  0x6b   :  { %5278 = vmatmul.mubr.msk.f32.vlgmr.msra.gmra.mrb[30].mxu1 %vm2066_vm5, %v3645_v49 }
  0x6c   :  { %5280 = vmatprep.mubr.msk.f32.mxu1 %vm2066_vm5, %v3646_v40  ;;  %5416 = vmatpush3.bf16.msra.mxu1 %v5706_v29  ;;  %v3651_v29 = vmul.f32 %v3643_v47, %v5992_v53  ;;  %v75_v53 = vld [vmem:[%s7781_s8 + $0x10] sm:$0xff] }
  0x6d   :  { %5418 = vmatprep.subr.bf16.mxu1 %v5800_v55  ;;  %v6196_v31 = vpack.c.bf16 %v76_v28, %v75_v53 }
  0x6f   :  { %5281 = vmatmul.mubr.msk.f32.gmra.mrb[32].mxu1 %vm2066_vm5, %v3647_v45  ;;  %7853 = vst [vmem:[#allocation5_spill] sm:$0xff] %v6196_v31 }
  0x70   :  { %5283 = vmatprep.mubr.msk.f32.mxu1 %vm2066_vm5, %v3648_v41  ;;  %5420 = vmatpush3.bf16.msra.mxu1 %v5800_v55  ;;  %v73_v55 = vld [vmem:[%s7781_s8] sm:$0xff] }
  0x71   :  { %v6186_v26 = vpack.c.bf16 %v74_v5, %v73_v55 }
  0x73   :  { %5284 = vmatmul.mubr.msk.f32.gmra.mrb[34].mxu1 %vm2066_vm5, %v3649_v42  ;;  %7852 = vst [vmem:[#allocation4_spill] sm:$0xff] %v6186_v26  ;;  %5368 = vmatprep.subr.bf16.mxu0 %v6186_v26 }
  0x74   :  { %5286 = vmatprep.mubr.msk.f32.mxu1 %vm2066_vm5, %v3650_v62  ;;  %5370 = vmatpush3.bf16.msra.mxu0 %v6186_v26 }
  0x75   :  { %5373 = vmatprep.subr.msk.bf16.mxu0 %vm5650_vm2, %v6196_v31 }
  0x77   :  { %5287 = vmatmul.mubr.msk.f32.gmra.mrb[36].mxu1 %vm2066_vm5, %v3651_v29 }
  0x78   :  { %5317 = vmatprep.mubr.msk.f32.mxu1 %vm2066_vm5, %v6065_v2  ;;  %5376 = vmatpush3.bf16.msk.msra.mxu0 %vm5650_vm2, %v6196_v31 }
  0x79   :  { %5386 = vmatprep.subr.bf16.mxu0 %v6186_v26 }
  0x7b   :  { %5318 = vmatmul.mubr.msk.f32.vlgmr.msra.gmra.mrb[38].mxu1 %vm2066_vm5, %v6068_v4 }
  0x7c   :  { %5320 = vmatprep.mubr.msk.f32.mxu1 %vm2066_vm5, %v6071_v6 }
  0x7f   :  { %5321 = vmatmul.mubr.msk.f32.gmra.mrb[40].mxu1 %vm2066_vm5, %v6074_v7 }
  0x80   :  { %5323 = vmatprep.mubr.msk.f32.mxu1 %vm2066_vm5, %v6077_v9 }
  0x83   :  { %5324 = vmatmul.mubr.msk.f32.gmra.mrb[42].mxu1 %vm2066_vm5, %v6080_v8 }
  0x84   :  { %5326 = vmatprep.mubr.msk.f32.mxu1 %vm2066_vm5, %v4263_v13 }
  0x87   :  { %5327 = vmatmul.mubr.msk.f32.gmra.mrb[44].mxu1 %vm2066_vm5, %v4264_v15 }
  0xdb   :  { %v5142_v48 = vpop.f32.mrb[0].mxu0 }
  0xdc   :  { %v6205_v49 = vpop.f32.mrb[1].mxu0  ;;  %v6228_v4 = vsel %vm2855_vm6, %v5142_v48, 0.0  ;;  %v6242_v9 = vsel %vm3652_vm7, %v5142_v48, 0.0  ;;  %v6332_v55 = vsel %vm4265_vm8, %v5142_v48, 0.0 }
  0xdd   :  { %7854 = vst [vmem:[#allocation6_spill] sm:$0xff] %v6205_v49  ;;  %v6233_v6 = vsel %vm2855_vm6, %v6205_v49, 0.0  ;;  %7861 = vst [vmem:[#allocation13_spill] sm:$0xff] %v6242_v9  ;;  %v6263_v18 = vsel %vm3652_vm7, %v6205_v49, 0.0 }
  0xde   :  { %7864 = vst [vmem:[#allocation16_spill] sm:$0xff] %v6263_v18  ;;  %7873 = vst [vmem:[#allocation25_spill] sm:$0xff] %v6332_v55 }
  0xdf   :  { %v6207_v50 = vpop.f32.mrb[2].mxu0 }
  0xe0   :  { %7855 = vst [vmem:[#allocation7_spill] sm:$0xff] %v6207_v50  ;;  %v6209_v51 = vpop.f32.mrb[3].mxu0  ;;  %v6238_v7 = vsel %vm2855_vm6, %v6207_v50, 0.0  ;;  %v6278_v22 = vsel %vm3652_vm7, %v6207_v50, 0.0 }
  0xe1   :  { %7856 = vst [vmem:[#allocation8_spill] sm:$0xff] %v6209_v51  ;;  %v6252_v13 = vsel %vm2855_vm6, %v6209_v51, 0.0  ;;  %7866 = vst [vmem:[#allocation18_spill] sm:$0xff] %v6278_v22  ;;  %v6298_v37 = vsel %vm3652_vm7, %v6209_v51, 0.0 }
  0xe2   :  { %7862 = vst [vmem:[#allocation14_spill] sm:$0xff] %v6252_v13  ;;  %7869 = vst [vmem:[#allocation21_spill] sm:$0xff] %v6298_v37 }
  0xe3   :  { %v6211_v52 = vpop.f32.mrb[4].mxu0 }
  0xe4   :  { %7857 = vst [vmem:[#allocation9_spill] sm:$0xff] %v6211_v52  ;;  %v6213_v54 = vpop.f32.mrb[5].mxu0  ;;  %v6258_v17 = vsel %vm2855_vm6, %v6211_v52, 0.0  ;;  %v6319_v42 = vsel %vm3652_vm7, %v6211_v52, 0.0 }
  0xe5   :  { %7858 = vst [vmem:[#allocation10_spill] sm:$0xff] %v6213_v54  ;;  %7863 = vst [vmem:[#allocation15_spill] sm:$0xff] %v6258_v17  ;;  %v6273_v21 = vsel %vm2855_vm6, %v6213_v54, 0.0  ;;  %v6328_v29 = vsel %vm3652_vm7, %v6213_v54, 0.0 }
  0xe6   :  { %7865 = vst [vmem:[#allocation17_spill] sm:$0xff] %v6273_v21  ;;  %7871 = vst [vmem:[#allocation23_spill] sm:$0xff] %v6319_v42 }
  0xe7   :  { %v6215_v30 = vpop.f32.mrb[6].mxu0  ;;  %7872 = vst [vmem:[#allocation24_spill] sm:$0xff] %v6328_v29 }
  0xe8   :  { %7859 = vst [vmem:[#allocation11_spill] sm:$0xff] %v6215_v30  ;;  %v6217_v32 = vpop.f32.mrb[7].mxu0  ;;  %v6293_v36 = vsel %vm2855_vm6, %v6215_v30, 0.0 }
  0xe9   :  { %7860 = vst [vmem:[#allocation12_spill] sm:$0xff] %v6217_v32  ;;  %7868 = vst [vmem:[#allocation20_spill] sm:$0xff] %v6293_v36  ;;  %v6314_v46 = vsel %vm2855_vm6, %v6217_v32, 0.0 }
  0xea   :  { %7870 = vst [vmem:[#allocation22_spill] sm:$0xff] %v6314_v46 }
  0xec   :  { %v1433_v56 = vpop.f32.mrb[0].mxu1 }
  0xed   :  { %v1498_v57 = vcombine.high %v1433_v56, %v1433_v56  ;;  %v1505_v59 = vrot.slane %v1433_v56, %v5699_v27  ;;  %v5158_v60 = vpop.f32.mrb[1].mxu1  ;;  %v6341_v56 = vsel %vm3652_vm7, %v6215_v30, 0.0 }
  0xee   :  { %7874 = vst [vmem:[#allocation26_spill] sm:$0xff] %v6341_v56 }
  0xef   :  { %v1512_v61 = vrot.slane %v1498_v57, %v5699_v27  ;;  %v1513_v63 = vcombine.high %v1505_v59, %v1505_v59  ;;  %v6224_v1 = vrot.slane %v1505_v59, %v5699_v27 }
  0xf0   :  { %v1438_v2 = vpop.f32.mrb[2].mxu1 }
  0xf1   :  { %v1514_v8 = vcombine.high %v1512_v61, %v1512_v61  ;;  %v6245_v10 = vrot.slane %v1513_v63, %v5699_v27  ;;  %v1543_v11 = vcombine.high %v6224_v1, %v6224_v1  ;;  %v5161_v12 = vpop.f32.mrb[3].mxu1  ;;  %v1547_v15 = vcombine.high %v1438_v2, %v1438_v2 }
  0xf2   :  { %v1554_v16 = vrot.slane %v1438_v2, %v5699_v27  ;;  %v6302_v38 = vrot.slane %v1512_v61, %v5699_v27 }
  0xf3   :  { %v6266_v19 = vrot.slane %v1514_v8, %v5699_v27  ;;  %v4962_v20 = vcombine.high %v6224_v1, %v6245_v10  ;;  %v6281_v58 = vcombine.low %v6245_v10, %v1543_v11  ;;  %v4405_v23 = vcombine.low %v6224_v1, %v6245_v10 }
  0xf4   :  { %v1561_v24 = vrot.slane %v1547_v15, %v5699_v27  ;;  %v1562_v0 = vcombine.high %v1554_v16, %v1554_v16  ;;  %v5199_v25 = vpop.f32.mrb[8].mxu0  ;;  %v6305_v40 = vrot.slane %v1554_v16, %v5699_v27  ;;  %v1544_v57 = vcombine.high %v6302_v38, %v6302_v38 }
  0xf5   :  { %7867 = vst [vmem:[#allocation19_spill] sm:$0xff] %v6281_v58  ;;  %v6286_v33 = vadd.f32 %v5199_v25, %v5142_v48  ;;  %v6288_v34 = vpop.f32.mrb[9].mxu0  ;;  %v1546_v62 = vcombine.high %v6266_v19, %v6266_v19  ;;  %v1545_v59 = vcombine.high %v6245_v10, %v6245_v10  ;;  %v6348_v48 = vrot.slane %v4962_v20, %v5699_v27 }
  0xf6   :  { %v1563_v39 = vcombine.high %v1561_v24, %v1561_v24  ;;  %v6308_v43 = vrot.slane %v1562_v0, %v5699_v27  ;;  %v1443_v44 = vpop.f32.mrb[4].mxu1  ;;  %v6351_v60 = vrot.slane %v1561_v24, %v5699_v27  ;;  %v1592_v12 = vcombine.high %v6305_v40, %v6305_v40 }
  0xf7   :  { %v1596_v45 = vcombine.high %v1443_v44, %v1443_v44  ;;  %v1603_v41 = vrot.slane %v1443_v44, %v5699_v27  ;;  %v5164_v35 = vpop.f32.mrb[5].mxu1  ;;  %7875 = vst [vmem:[#allocation27_spill] sm:$0xff] %v6348_v48  ;;  %v2198_v10 = vcombine.low %v1546_v62, %v6305_v40  ;;  %v2197_v56 = vcombine.low %v6266_v19, %v1544_v57 }
  0xf8   :  { %v6335_v5 = vrot.slane %v1563_v39, %v5699_v27 }
  0xf9   :  { %v1610_v53 = vrot.slane %v1596_v45, %v5699_v27  ;;  %v1611_v28 = vcombine.high %v1603_v41, %v1603_v41  ;;  %v6354_v1 = vrot.slane %v1603_v41, %v5699_v27  ;;  %v6455_v57 = vrot.slane %v2197_v56, %v5699_v27 }
  0xfa   :  { %v1448_v61 = vpop.f32.mrb[6].mxu1  ;;  %v4936_v25 = vcombine.high %v6351_v60, %v6335_v5  ;;  %v1595_v56 = vcombine.high %v6335_v5, %v6335_v5 }
  0xfb   :  { %v1612_v63 = vcombine.high %v1610_v53, %v1610_v53  ;;  %v6357_v2 = vrot.slane %v1611_v28, %v5699_v27  ;;  %v1645_v8 = vcombine.high %v1448_v61, %v1448_v61  ;;  %v5167_v11 = vpop.f32.mrb[7].mxu1  ;;  %v6363_v15 = vrot.slane %v1610_v53, %v5699_v27  ;;  %7887 = vst [vmem:[#allocation39_spill] sm:$0xff] %v6455_v57 }
  0xfc   :  { %v1652_v16 = vrot.slane %v1448_v61, %v5699_v27  ;;  %v6393_v61 = vrot.slane %v4405_v23, %v5699_v27 }
  0xfd   :  { %7876 = vst [vmem:[#allocation28_spill] sm:$0xff] %v6363_v15  ;;  %v6367_v20 = vrot.slane %v1612_v63, %v5699_v27  ;;  %v1643_v24 = vcombine.high %v6357_v2, %v6357_v2  ;;  %v2246_v0 = vcombine.low %v6354_v1, %v6357_v2  ;;  %v4937_v39 = vcombine.high %v6354_v1, %v6357_v2 }
  0xfe   :  { %v6378_v44 = vrot.slane %v1645_v8, %v5699_v27  ;;  %v1660_v45 = vcombine.high %v1652_v16, %v1652_v16  ;;  %v6381_v41 = vrot.slane %v1652_v16, %v5699_v27  ;;  %7879 = vst [vmem:[#allocation31_spill] sm:$0xff] %v6393_v61  ;;  %v2199_v63 = vcombine.low %v6308_v43, %v1592_v12 }
  0xff   :  { %7877 = vst [vmem:[#allocation29_spill] sm:$0xff] %v6367_v20  ;;  %v1644_v35 = vcombine.high %v6367_v20, %v6367_v20  ;;  %v2248_v62 = vcombine.low %v6363_v15, %v6367_v20  ;;  %v6388_v53 = vcombine.low %v1643_v24, %v6363_v15  ;;  %v6405_v24 = vrot.slane %v4936_v25, %v5699_v27 }
 0x100   :  { %7878 = vst [vmem:[#allocation30_spill] sm:$0xff] %v6381_v41  ;;  %v1661_v8 = vcombine.high %v6378_v44, %v6378_v44  ;;  %v6399_v11 = vrot.slane %v1660_v45, %v5699_v27  ;;  %v6408_v28 = vrot.slane %v2246_v0, %v5699_v27  ;;  %v6412_v12 = vrot.slane %v2198_v10, %v5699_v27 }
 0x101   :  { %v6402_v16 = vcombine.low %v1644_v35, %v6381_v41  ;;  %v1453_v47 = vpop.f32.mrb[8].mxu1  ;;  %7882 = vst [vmem:[#allocation34_spill] sm:$0xff] %v6405_v24  ;;  %v2276_v23 = vrot.slane %v2248_v62, %v5699_v27  ;;  %v6420_v15 = vrot.slane %v4937_v39, %v5699_v27  ;;  %v2196_v39 = vcombine.low %v1545_v59, %v6302_v38 }
 0x102   :  { %7880 = vst [vmem:[#allocation32_spill] sm:$0xff] %v6399_v11  ;;  %7883 = vst [vmem:[#allocation35_spill] sm:$0xff] %v6408_v28  ;;  %v6415_v20 = vrot.slane %v1661_v8, %v5699_v27  ;;  %v5170_v35 = vpop.f32.mrb[9].mxu1  ;;  %v1694_v0 = vcombine.high %v1453_v47, %v1453_v47  ;;  %v1701_v61 = vrot.slane %v1453_v47, %v5699_v27 }
 0x103   :  { %7881 = vst [vmem:[#allocation33_spill] sm:$0xff] %v6402_v16  ;;  %7884 = vst [vmem:[#allocation36_spill] sm:$0xff] %v6412_v12  ;;  %v2277_v10 = vcombine.low %v6405_v24, %v6408_v28  ;;  %v2278_v8 = vcombine.low %v6420_v15, %v2276_v23  ;;  %v2158_v35 = vadd.f32 %v6288_v34, %v6205_v49 }
 0x104   :  { %7885 = vst [vmem:[#allocation37_spill] sm:$0xff] %v6420_v15  ;;  %v1693_v62 = vcombine.high %v6415_v20, %v6415_v20  ;;  %v1708_v45 = vrot.slane %v1694_v0, %v5699_v27  ;;  %v1709_v55 = vcombine.high %v1701_v61, %v1701_v61  ;;  %v6435_v25 = vrot.slane %v1701_v61, %v5699_v27 }
 0x105   :  { %v2285_v47 = vrot.slane %v2277_v10, %v5699_v27  ;;  %v2292_v14 = vrot.slane %v2278_v8, %v5699_v27  ;;  %v6441_v29 = vrot.slane %v2196_v39, %v5699_v27  ;;  %v2227_v23 = vrot.slane %v2199_v63, %v5699_v27 }
 0x106   :  { %v1594_v34 = vcombine.high %v6308_v43, %v6308_v43  ;;  %v1710_v59 = vcombine.high %v1708_v45, %v1708_v45  ;;  %v6447_v0 = vrot.slane %v1709_v55, %v5699_v27  ;;  %v1739_v61 = vcombine.high %v6435_v25, %v6435_v25 }
 0x107   :  { %7886 = vst [vmem:[#allocation38_spill] sm:$0xff] %v6441_v29  ;;  %v6452_v10 = vcombine.low %v1693_v62, %v6435_v25  ;;  %v2293_v8 = vcombine.low %v2285_v47, %v2292_v14  ;;  %v2229_v39 = vcombine.low %v6412_v12, %v2227_v23  ;;  %v6459_v49 = vrot.slane %v1708_v45, %v5699_v27 }
 0x108   :  { %v1458_v63 = vpop.f32.mrb[10].mxu1  ;;  %v6462_v42 = vrot.slane %v1710_v59, %v5699_v27  ;;  %v1741_v55 = vcombine.high %v6447_v0, %v6447_v0  ;;  %v6471_v47 = vcombine.low %v6447_v0, %v1739_v61  ;;  %v2228_v23 = vcombine.low %v6441_v29, %v6455_v57 }
 0x109   :  { %v5173_v28 = vpop.f32.mrb[11].mxu1  ;;  %v5202_v14 = vpop.f32.mrb[10].mxu0  ;;  %v2597_v45 = vadd.f32 %v2293_v8, %v6286_v33  ;;  %v2243_v61 = vrot.slane %v2229_v39, %v5699_v27  ;;  %v6489_v33 = vcombine.low %v1594_v34, %v6351_v60  ;;  %v1750_v15 = vrot.slane %v1458_v63, %v5699_v27 }
 0x10a   :  { %7888 = vst [vmem:[#allocation40_spill] sm:$0xff] %v6471_v47  ;;  %v2167_v59 = vpop.f32.mrb[11].mxu0  ;;  %v7889_v28 = vcombine.low %v6305_v40, %v6308_v43  ;;  %v6485_v24 = vcombine.low %v1741_v55, %v6459_v49  ;;  %v2236_v8 = vrot.slane %v2228_v23, %v5699_v27  ;;  %v1743_v47 = vcombine.high %v1458_v63, %v1458_v63  ;;  %v6509_v63 = vld [vmem:[%s7782_s7] ss:$0 sm:$0xff] }
 0x10b   :  { %7891 = vst [vmem:[#allocation42_spill] sm:$0xff] %v6489_v33  ;;  %v1742_v40 = vcombine.high %v6462_v42, %v6462_v42  ;;  %v6498_v55 = vadd.f32 %v5202_v14, %v6207_v50  ;;  %v6501_v39 = vadd.f32 %v2167_v59, %v6209_v51  ;;  %v6504_v34 = vcombine.low %v1595_v56, %v6354_v1 }
 0x10c   :  { %v6482_v62 = vrot.slane %v7889_v28, %v5699_v27  ;;  %v2244_v23 = vcombine.low %v2236_v8, %v2243_v61  ;;  %v1757_v28 = vrot.slane %v1743_v47, %v5699_v27  ;;  %v1758_v16 = vcombine.high %v1750_v15, %v1750_v15 }
 0x10d   :  { %v1463_v43 = vpop.f32.mrb[12].mxu1  ;;  %v2611_v14 = vadd.f32 %v6509_v63, %v2597_v45  ;;  %v1766_v59 = vrot.slane %v1750_v15, %v5699_v27 }
 0x10e   :  { %7890 = vst [vmem:[#allocation41_spill] sm:$0xff] %v6482_v62  ;;  %v5176_v33 = vpop.f32.mrb[13].mxu1  ;;  %v6512_v37 = vpop.f32.mrb[12].mxu0  ;;  %v1792_v51 = vcombine.high %v1463_v43, %v1463_v43  ;;  %v1799_v56 = vrot.slane %v1463_v43, %v5699_v27  ;;  %v2596_v29 = vadd.f32 %v2244_v23, %v2158_v35  ;;  %v1759_v22 = vcombine.high %v1757_v28, %v1757_v28 }
 0x10f   :  { %v6517_v50 = vpop.f32.mrb[13].mxu0  ;;  %v6520_v57 = vrot.slane %v1757_v28, %v5699_v27  ;;  %v1780_v47 = vrot.slane %v1758_v16, %v5699_v27  ;;  %v1788_v61 = vcombine.high %v1766_v59, %v1766_v59  ;;  %v6523_v33 = vcombine.low %v1742_v40, %v1766_v59 }
 0x110   :  { %v1806_v8 = vrot.slane %v1792_v51, %v5699_v27  ;;  %v1807_v45 = vcombine.high %v1799_v56, %v1799_v56  ;;  %v2610_v15 = vadd.f32 %v6509_v63, %v2596_v29  ;;  %v6528_v12 = vrot.slane %v1759_v22, %v5699_v27 }
 0x111   :  { %v1789_v35 = vcombine.high %v6520_v57, %v6520_v57  ;;  %v2343_v43 = vcombine.low %v6459_v49, %v6462_v42  ;;  %v2619_v23 = vmax.f32 %v2611_v14, 0.0  ;;  %v6534_v28 = vcombine.low %v1780_v47, %v1788_v61 }
 0x112   :  { %v1808_v16 = vcombine.high %v1806_v8, %v1806_v8  ;;  %v4938_v40 = vcombine.high %v6459_v49, %v6462_v42  ;;  %v6540_v51 = vrot.slane %v6378_v44, %v5699_v27  ;;  %v2618_v29 = vmax.f32 %v2610_v15, 0.0 }
 0x113   :  { %7892 = vst [vmem:[#allocation43_spill] sm:$0xff] %v6534_v28  ;;  %v6543_v22 = vcombine.low %v6528_v12, %v1789_v35  ;;  %v1791_v14 = vcombine.high %v6528_v12, %v6528_v12  ;;  %v6550_v61 = vrot.slane %v1799_v56, %v5699_v27  ;;  %v6553_v9 = vrot.slane %v1807_v45, %v5699_v27 }
 0x114   :  { %7893 = vst [vmem:[#allocation44_spill] sm:$0xff] %v6540_v51  ;;  %v1468_v18 = vpop.f32.mrb[14].mxu1  ;;  %v6556_v44 = vrot.slane %v1808_v16, %v5699_v27  ;;  %v2345_v46 = vcombine.low %v1766_v59, %v1780_v47  ;;  %v4939_v35 = vcombine.high %v1766_v59, %v1780_v47  ;;  %5217 = vmatprep.mubr.msk.f32.mxu0 %vm2626_vm9, %v2618_v29 }
 0x115   :  { %7894 = vst [vmem:[#allocation45_spill] sm:$0xff] %v6543_v22  ;;  %v5179_v15 = vpop.f32.mrb[15].mxu1  ;;  %v1841_v22 = vcombine.high %v1468_v18, %v1468_v18  ;;  %v1848_v58 = vrot.slane %v1468_v18, %v5699_v27  ;;  %v6563_v56 = vcombine.low %v1791_v14, %v6550_v61  ;;  %v6566_v45 = vrot.slane %v2343_v43, %v5699_v27 }
 0x116   :  { %v1840_v36 = vcombine.high %v6556_v44, %v6556_v44  ;;  %v6569_v16 = vrot.slane %v4938_v40, %v5699_v27  ;;  %5218 = vmatmul.mubr.msk.f32.vlgmr.msra.gmra.mrb[16].mxu0 %vm2626_vm9, %v2619_v23  ;;  %v1690_v47 = vcombine.high %v6381_v41, %v6381_v41  ;;  %v1691_v18 = vcombine.high %v6540_v51, %v6540_v51 }
 0x117   :  { %7895 = vst [vmem:[#allocation46_spill] sm:$0xff] %v6566_v45  ;;  %v6572_v59 = vpop.f32.mrb[14].mxu0  ;;  %v6579_v29 = vrot.slane %v1806_v8, %v5699_v27  ;;  %v1855_v14 = vrot.slane %v1841_v22, %v5699_v27  ;;  %5388 = vmatpush3.bf16.msra.mxu0 %v6186_v26  ;;  %v1692_v23 = vcombine.high %v6399_v11, %v6399_v11 }
 0x118   :  { %7896 = vst [vmem:[#allocation47_spill] sm:$0xff] %v6569_v16  ;;  %v6582_v43 = vpop.f32.mrb[15].mxu0  ;;  %v1839_v40 = vcombine.high %v6553_v9, %v6553_v9  ;;  %v1856_v15 = vcombine.high %v1848_v58, %v1848_v58  ;;  %v6590_v21 = vrot.slane %v1848_v58, %v5699_v27  ;;  %5391 = vmatprep.subr.msk.bf16.mxu0 %vm5650_vm2, %v6196_v31 }
 0x119   :  { %v2325_v8 = vrot.slane %v6452_v10, %v5699_v27  ;;  %v1857_v22 = vcombine.high %v1855_v14, %v1855_v14  ;;  %v6598_v17 = vrot.slane %v2345_v46, %v5699_v27  ;;  %v2374_v41 = vrot.slane %v4939_v35, %v5699_v27 }
 0x11a   :  { %v1837_v62 = vcombine.high %v6550_v61, %v6550_v61  ;;  %v6604_v48 = vrot.slane %v1856_v15, %v5699_v27  ;;  %v6607_v58 = vcombine.low %v1840_v36, %v6590_v21  ;;  %v2375_v13 = vcombine.low %v6566_v45, %v6569_v16 }
 0x11b   :  { %7897 = vst [vmem:[#allocation48_spill] sm:$0xff] %v6598_v17  ;;  %v1838_v10 = vcombine.high %v6579_v29, %v6579_v29  ;;  %v6614_v46 = vrot.slane %v1857_v22, %v5699_v27  ;;  %v2376_v35 = vcombine.low %v6598_v17, %v2374_v41  ;;  %v2294_v28 = vcombine.low %v6399_v11, %v1690_v47 }
 0x11c   :  { %7898 = vst [vmem:[#allocation49_spill] sm:$0xff] %v6607_v58  ;;  %5394 = vmatpush3.bf16.msk.msra.mxu0 %vm5650_vm2, %v6196_v31  ;;  %v2394_v36 = vcombine.low %v1839_v40, %v6579_v29  ;;  %v6623_v15 = vrot.slane %v1855_v14, %v5699_v27  ;;  %v2383_v16 = vrot.slane %v2375_v13, %v5699_v27 }
 0x11d   :  { %7899 = vst [vmem:[#allocation50_spill] sm:$0xff] %v6614_v46  ;;  %v1473_v22 = vpop.f32.mrb[16].mxu1  ;;  %5404 = vmatprep.subr.bf16.mxu0 %v6186_v26  ;;  %v2390_v41 = vrot.slane %v2376_v35, %v5699_v27  ;;  %v2295_v47 = vcombine.low %v1692_v23, %v6540_v51  ;;  %v2296_v3 = vcombine.low %v6415_v20, %v1691_v18 }
 0x11e   :  { %v6633_v31 = vrot.slane %v2294_v28, %v5699_v27  ;;  %v5182_v40 = vpop.f32.mrb[17].mxu1  ;;  %v1889_v14 = vcombine.high %v6614_v46, %v6614_v46  ;;  %v1890_v17 = vcombine.high %v1473_v22, %v1473_v22  ;;  %v1897_v58 = vrot.slane %v1473_v22, %v5699_v27 }
 0x11f   :  { %v6640_v13 = vadd.f32 %v6512_v37, %v6211_v52  ;;  %v2391_v26 = vcombine.low %v2383_v16, %v2390_v41  ;;  %v6643_v35 = vrot.slane %v2295_v47, %v5699_v27  ;;  %v6646_v18 = vrot.slane %v2296_v3, %v5699_v27 }
 0x120   :  { %7900 = vst [vmem:[#allocation51_spill] sm:$0xff] %v6633_v31  ;;  %v2442_v28 = vcombine.low %v6623_v15, %v6614_v46  ;;  %v4940_v23 = vcombine.high %v6590_v21, %v6604_v48  ;;  %v1904_v40 = vrot.slane %v1890_v17, %v5699_v27  ;;  %v1905_v22 = vcombine.high %v1897_v58, %v1897_v58 }
 0x121   :  { %7901 = vst [vmem:[#allocation52_spill] sm:$0xff] %v6643_v35  ;;  %7902 = vst [vmem:[#allocation53_spill] sm:$0xff] %v6646_v18  ;;  %v6654_v45 = vrot.slane %v1897_v58, %v5699_v27  ;;  %v1478_v37 = vpop.f32.mrb[18].mxu1  ;;  %v2599_v16 = vadd.f32 %v2391_v26, %v6498_v55  ;;  %v2326_v41 = vcombine.low %v6633_v31, %v6643_v35 }
 0x122   :  { %v2327_v3 = vcombine.low %v6646_v18, %v2325_v8  ;;  %v4941_v47 = vcombine.high %v6623_v15, %v6614_v46  ;;  %v5185_v52 = vpop.f32.mrb[19].mxu1  ;;  %v1906_v11 = vcombine.high %v1904_v40, %v1904_v40  ;;  %v6663_v51 = vrot.slane %v1904_v40, %v5699_v27 }
 0x123   :  { %v6666_v17 = vrot.slane %v1905_v22, %v5699_v27  ;;  %v6669_v58 = vcombine.low %v1889_v14, %v6654_v45  ;;  %v2613_v26 = vadd.f32 %v6509_v63, %v2599_v16  ;;  %v2334_v55 = vrot.slane %v2326_v41, %v5699_v27 }
 0x124   :  { %v2341_v8 = vrot.slane %v2327_v3, %v5699_v27  ;;  %v6675_v31 = vrot.slane %v2442_v28, %v5699_v27  ;;  %v2395_v52 = vcombine.low %v6556_v44, %v1838_v10  ;;  %v6683_v14 = vrot.slane %v4940_v23, %v5699_v27 }
 0x125   :  { %v1937_v40 = vcombine.high %v6666_v17, %v6666_v17  ;;  %v2444_v22 = vcombine.low %v6654_v45, %v6666_v17  ;;  %v6686_v16 = vrot.slane %v1906_v11, %v5699_v27  ;;  %v1936_v41 = vcombine.high %v6663_v51, %v6663_v51 }
 0x126   :  { %7903 = vst [vmem:[#allocation54_spill] sm:$0xff] %v6675_v31  ;;  %7904 = vst [vmem:[#allocation55_spill] sm:$0xff] %v6683_v14  ;;  %v2342_v35 = vcombine.low %v2334_v55, %v2341_v8  ;;  %v6697_v18 = vrot.slane %v4941_v47, %v5699_v27  ;;  %v2473_v23 = vcombine.low %v6683_v14, %v6675_v31  ;;  %v2621_v55 = vmax.f32 %v2613_v26, 0.0 }
 0x127   :  { %v2472_v10 = vrot.slane %v2444_v22, %v5699_v27  ;;  %v6694_v3 = vcombine.low %v1937_v40, %v6663_v51  ;;  %v2178_v8 = vadd.f32 %v6517_v50, %v6213_v54  ;;  %v2393_v46 = vcombine.low %v6553_v9, %v1837_v62 }
 0x128   :  { %v2598_v11 = vadd.f32 %v2342_v35, %v6501_v39  ;;  %v2481_v22 = vrot.slane %v2473_v23, %v5699_v27  ;;  %v6709_v40 = vrot.slane %v6563_v56, %v5699_v27  ;;  %v6712_v47 = vrot.slane %v2394_v36, %v5699_v27 }
 0x129   :  { %7905 = vst [vmem:[#allocation56_spill] sm:$0xff] %v6694_v3  ;;  %v2474_v28 = vcombine.low %v6697_v18, %v2472_v10  ;;  %v6716_v39 = vrot.slane %v2393_v46, %v5699_v27  ;;  %v2423_v50 = vrot.slane %v2395_v52, %v5699_v27  ;;  %v1938_v62 = vcombine.high %v6686_v16, %v6686_v16 }
 0x12a   :  { %7906 = vst [vmem:[#allocation57_spill] sm:$0xff] %v6709_v40  ;;  %v2612_v26 = vadd.f32 %v6509_v63, %v2598_v11  ;;  %v1483_v35 = vpop.f32.mrb[20].mxu1  ;;  %v1939_v23 = vcombine.high %v1478_v37, %v1478_v37  ;;  %v1946_v56 = vrot.slane %v1478_v37, %v5699_v27  ;;  %v6725_v36 = vadd.f32 %v6572_v59, %v6215_v30 }
 0x12b   :  { %7907 = vst [vmem:[#allocation58_spill] sm:$0xff] %v6716_v39  ;;  %v2488_v10 = vrot.slane %v2474_v28, %v5699_v27  ;;  %v5188_v54 = vpop.f32.mrb[21].mxu1  ;;  %v2424_v46 = vcombine.low %v6709_v40, %v6716_v39  ;;  %v2425_v52 = vcombine.low %v6712_v47, %v2423_v50  ;;  %v6732_v3 = vadd.f32 %v6582_v43, %v6217_v32 }
 0x12c   :  { %v2620_v11 = vmax.f32 %v2612_v26, 0.0  ;;  %v1953_v28 = vrot.slane %v1939_v23, %v5699_v27  ;;  %v1954_v31 = vcombine.high %v1946_v56, %v1946_v56  ;;  %v6736_v37 = vrot.slane %v1946_v56, %v5699_v27 }
 0x12d   :  { %v2489_v14 = vcombine.low %v2481_v22, %v2488_v10  ;;  %v2432_v59 = vrot.slane %v2424_v46, %v5699_v27  ;;  %v2439_v26 = vrot.slane %v2425_v52, %v5699_v27  ;;  %v2490_v50 = vcombine.low %v6686_v16, %v1936_v41 }
 0x12e   :  { %5220 = vmatprep.mubr.msk.f32.mxu0 %vm2626_vm9, %v2620_v11  ;;  %v5239_v43 = vpop.f32.mrb[22].mxu1  ;;  %v1955_v10 = vcombine.high %v1953_v28, %v1953_v28  ;;  %v6746_v23 = vrot.slane %v1953_v28, %v5699_v27  ;;  %v6749_v56 = vrot.slane %v1954_v31, %v5699_v27  ;;  %v1984_v41 = vcombine.high %v6736_v37, %v6736_v37 }
 0x12f   :  { %v2601_v22 = vadd.f32 %v2489_v14, %v6640_v13  ;;  %5221 = vmatmul.mubr.msk.f32.gmra.mrb[18].mxu0 %vm2626_vm9, %v2621_v55  ;;  %v6752_v54 = vpop.f32.mrb[23].mxu1  ;;  %v2440_v46 = vcombine.low %v2432_v59, %v2439_v26  ;;  %v2491_v11 = vcombine.low %v1938_v62, %v6736_v37  ;;  %v1988_v52 = vcombine.high %v1483_v35, %v1483_v35 }
 0x130   :  { %7908 = vst [vmem:[#allocation59_spill] sm:$0xff] %v6746_v23  ;;  %v6759_v14 = vrot.slane %v1955_v10, %v5699_v27  ;;  %v1985_v31 = vcombine.high %v6746_v23, %v6746_v23  ;;  %v1986_v55 = vcombine.high %v6749_v56, %v6749_v56  ;;  %v7910_v28 = vcombine.high %v6435_v25, %v6447_v0 }
 0x131   :  { %v2615_v13 = vadd.f32 %v6509_v63, %v2601_v22  ;;  %v2600_v26 = vadd.f32 %v2440_v46, %v2178_v8  ;;  %v2492_v62 = vcombine.low %v6749_v56, %v1984_v41  ;;  %v6773_v22 = vrot.slane %v2490_v50, %v5699_v27 }
 0x132   :  { %7909 = vst [vmem:[#allocation60_spill] sm:$0xff] %v6759_v14  ;;  %v6769_v59 = vrot.slane %v7910_v28, %v5699_v27  ;;  %v6775_v10 = vpop.f32.mrb[24].mxu1  ;;  %v1987_v32 = vcombine.high %v6759_v14, %v6759_v14  ;;  %v2493_v40 = vcombine.low %v1986_v55, %v6746_v23  ;;  %v6786_v8 = vcombine.low %v6759_v14, %v1985_v31  ;;  %v7943_v14 = vld [vmem:[#allocation17_spill] sm:$0xff] }
 0x133   :  { %7911 = vst [vmem:[#allocation61_spill] sm:$0xff] %v6773_v22  ;;  %v2623_v30 = vmax.f32 %v2615_v13, 0.0  ;;  %v6782_v25 = vpop.f32.mrb[25].mxu1  ;;  %v2614_v0 = vadd.f32 %v6509_v63, %v2600_v26  ;;  %v6789_v50 = vrot.slane %v2491_v11, %v5699_v27  ;;  %v6792_v46 = vrot.slane %v2492_v62, %v5699_v27 }
 0x134   :  { %7912 = vst [vmem:[#allocation62_spill] sm:$0xff] %v6786_v8  ;;  %v2521_v41 = vrot.slane %v2493_v40, %v5699_v27  ;;  %v1995_v13 = vrot.slane %v1483_v35, %v5699_v27  ;;  %v2002_v55 = vrot.slane %v1988_v52, %v5699_v27  ;;  %v2962_v28 = vadd.f32 %v5239_v43, %v6228_v4 }
 0x135   :  { %7913 = vst [vmem:[#allocation63_spill] sm:$0xff] %v6789_v50  ;;  %7914 = vst [vmem:[#allocation64_spill] sm:$0xff] %v6792_v46  ;;  %v2622_v39 = vmax.f32 %v2614_v0, 0.0  ;;  %v2522_v26 = vcombine.low %v6773_v22, %v6789_v50  ;;  %v7915_v31 = vcombine.high %v6351_v60, %v6351_v60  ;;  %v7916_v62 = vcombine.high %v6354_v1, %v6354_v1 }
 0x136   :  { %v6808_v8 = vpop.f32.mrb[26].mxu1  ;;  %v2523_v52 = vcombine.low %v6792_v46, %v2521_v41  ;;  %v2003_v4 = vcombine.high %v1995_v13, %v1995_v13  ;;  %v2004_v35 = vcombine.high %v2002_v55, %v2002_v55  ;;  %v6835_v1 = vrot.slane %v2002_v55, %v5699_v27 }
 0x137   :  { %v3044_v11 = vcombine.low %v6335_v5, %v7915_v31  ;;  %v3046_v40 = vcombine.low %v6357_v2, %v7916_v62  ;;  %v6817_v0 = vpop.f32.mrb[27].mxu1  ;;  %v6824_v31 = vrot.slane %v1995_v13, %v5699_v27  ;;  %v6828_v62 = vrot.slane %v6504_v34, %v5699_v27  ;;  %5223 = vmatprep.mubr.msk.f32.mxu0 %vm2626_vm9, %v2622_v39 }
 0x138   :  { %v2530_v43 = vrot.slane %v2522_v26, %v5699_v27  ;;  %v2537_v41 = vrot.slane %v2523_v52, %v5699_v27  ;;  %5224 = vmatmul.mubr.msk.f32.gmra.mrb[20].mxu0 %vm2626_vm9, %v2623_v30  ;;  %v3075_v34 = vrot.slane %v6388_v53, %v5699_v27  ;;  %v1888_v30 = vcombine.high %v6604_v48, %v6604_v48 }
 0x139   :  { %7917 = vst [vmem:[#allocation65_spill] sm:$0xff] %v6828_v62  ;;  %v6838_v2 = vcombine.low %v1987_v32, %v6824_v31  ;;  %v6841_v22 = vrot.slane %v3044_v11, %v5699_v27  ;;  %v6852_v55 = vrot.slane %v3046_v40, %v5699_v27  ;;  %v7920_v53 = vcombine.high %v6654_v45, %v6666_v17 }
 0x13a   :  { %v6845_v39 = vpop.f32.mrb[28].mxu1  ;;  %v2538_v26 = vcombine.low %v2530_v43, %v2537_v41  ;;  %v6872_v50 = vrot.slane %v2003_v4, %v5699_v27  ;;  %v6876_v45 = vrot.slane %v2004_v35, %v5699_v27  ;;  %v2957_v13 = vadd.f32 %v6752_v54, %v6233_v6 }
 0x13b   :  { %7918 = vst [vmem:[#allocation66_spill] sm:$0xff] %v6841_v22  ;;  %7919 = vst [vmem:[#allocation67_spill] sm:$0xff] %v6852_v55  ;;  %v6854_v32 = vpop.f32.mrb[29].mxu1  ;;  %v6862_v52 = vrot.slane %v7920_v53, %v5699_v27  ;;  %v3076_v43 = vcombine.low %v6841_v22, %v6828_v62  ;;  %v3077_v11 = vcombine.low %v6852_v55, %v3075_v34 }
 0x13c   :  { %v2602_v41 = vadd.f32 %v2538_v26, %v6732_v3  ;;  %v2996_v35 = vcombine.low %v6302_v38, %v6266_v19  ;;  %v4963_v17 = vcombine.high %v6302_v38, %v6266_v19  ;;  %v2972_v53 = vadd.f32 %v6775_v10, %v6238_v7  ;;  %v7928_v38 = vld [vmem:[#allocation43_spill] sm:$0xff] }
 0x13d   :  { %7921 = vst [vmem:[#allocation68_spill] sm:$0xff] %v6862_v52  ;;  %v3084_v4 = vrot.slane %v3076_v43, %v5699_v27  ;;  %v3091_v34 = vrot.slane %v3077_v11, %v5699_v27  ;;  %v7922_v6 = vcombine.high %v6459_v49, %v6459_v49  ;;  %v6903_v43 = vrot.slane %v6485_v24, %v5699_v27  ;;  %v7929_v24 = vld [vmem:[#allocation14_spill] sm:$0xff] }
 0x13e   :  { %v6884_v40 = vpop.f32.mrb[30].mxu1  ;;  %v2616_v3 = vadd.f32 %v6509_v63, %v2602_v41  ;;  %v6906_v52 = vrot.slane %v2996_v35, %v5699_v27  ;;  %v6910_v19 = vrot.slane %v6523_v33, %v5699_v27  ;;  %v6913_v7 = vrot.slane %v4963_v17, %v5699_v27  ;;  %v7931_v35 = vld [vmem:[#allocation44_spill] sm:$0xff] }
 0x13f   :  { %v6891_v26 = vpop.f32.mrb[31].mxu1  ;;  %v3143_v54 = vcombine.low %v6462_v42, %v7922_v6  ;;  %7923 = vst [vmem:[#allocation69_spill] sm:$0xff] %v6903_v43  ;;  %v3092_v41 = vcombine.low %v3084_v4, %v3091_v34  ;;  %v3173_v42 = vrot.slane %v7928_v38, %v5699_v27  ;;  %v2967_v10 = vadd.f32 %v6782_v25, %v7929_v24  ;;  %v7930_v34 = vld [vmem:[#allocation27_spill] sm:$0xff]  ;;  %v7932_v38 = vld [vmem:[#allocation41_spill] sm:$0xff]  ;;  %v7933_v24 = vld [vmem:[#allocation30_spill] sm:$0xff] }
 0x140   :  { %v2624_v11 = vmax.f32 %v2616_v3, 0.0  ;;  %7924 = vst [vmem:[#allocation70_spill] sm:$0xff] %v6906_v52  ;;  %7925 = vst [vmem:[#allocation71_spill] sm:$0xff] %v6910_v19  ;;  %v3027_v33 = vcombine.low %v7930_v34, %v6906_v52  ;;  %v3095_v17 = vcombine.low %v7931_v35, %v6415_v20  ;;  %v4965_v6 = vcombine.high %v7931_v35, %v6415_v20  ;;  %v7934_v52 = vld [vmem:[#allocation32_spill] sm:$0xff] }
 0x141   :  { %7926 = vst [vmem:[#allocation72_spill] sm:$0xff] %v6913_v7  ;;  %v6916_v49 = vrot.slane %v3143_v54, %v5699_v27  ;;  %v6924_v4 = vadd.f32 %v3092_v41, %v2962_v28  ;;  %v3028_v25 = vcombine.low %v6913_v7, %v7932_v38  ;;  %v3175_v41 = vcombine.low %v6910_v19, %v3173_v42 }
 0x142   :  { %v6922_v3 = vpop.f32.mrb[32].mxu1  ;;  %5226 = vmatprep.mubr.msk.f32.mxu0 %vm2626_vm9, %v2624_v11  ;;  %v7935_v34 = vcombine.low %v7933_v24, %v7934_v52  ;;  %v2035_v20 = vcombine.high %v6872_v50, %v6872_v50  ;;  %v3035_v11 = vrot.slane %v3027_v33, %v5699_v27  ;;  %v7937_v35 = vcombine.high %v7933_v24, %v7934_v52  ;;  %v7939_v24 = vld [vmem:[#allocation15_spill] sm:$0xff] }
 0x143   :  { %7927 = vst [vmem:[#allocation73_spill] sm:$0xff] %v6916_v49  ;;  %v6933_v54 = vpop.f32.mrb[33].mxu1  ;;  %v3174_v28 = vcombine.low %v6903_v43, %v6916_v49  ;;  %v6956_v43 = vrot.slane %v3095_v17, %v5699_v27  ;;  %v3042_v42 = vrot.slane %v3028_v25, %v5699_v27  ;;  %v3124_v19 = vrot.slane %v4965_v6, %v5699_v27 }
 0x144   :  { %v6944_v62 = vrot.slane %v7935_v34, %v5699_v27  ;;  %v6953_v38 = vrot.slane %v7937_v35, %v5699_v27  ;;  %v3189_v34 = vrot.slane %v3175_v41, %v5699_v27  ;;  %v2539_v33 = vcombine.low %v6824_v31, %v6872_v50 }
 0x145   :  { %v3182_v49 = vrot.slane %v3174_v28, %v5699_v27  ;;  %v2982_v17 = vadd.f32 %v6808_v8, %v7939_v24  ;;  %v7940_v25 = vcombine.high %v6590_v21, %v6590_v21  ;;  %v3043_v41 = vcombine.low %v3035_v11, %v3042_v42 }
 0x146   :  { %7936 = vst [vmem:[#allocation43_spill] sm:$0xff] %v6944_v62  ;;  %7938 = vst [vmem:[#allocation14_spill] sm:$0xff] %v6953_v38  ;;  %v6962_v7 = vpop.f32.mrb[34].mxu1  ;;  %v3125_v52 = vcombine.low %v6944_v62, %v6953_v38  ;;  %v3126_v55 = vcombine.low %v6956_v43, %v3124_v19  ;;  %v3241_v22 = vcombine.low %v1888_v30, %v6623_v15  ;;  %v7942_v38 = vld [vmem:[#allocation50_spill] sm:$0xff] }
 0x147   :  { %v3240_v28 = vcombine.low %v6604_v48, %v7940_v25  ;;  %v6974_v35 = vpop.f32.mrb[35].mxu1  ;;  %v3190_v6 = vcombine.low %v3182_v49, %v3189_v34  ;;  %v7941_v62 = vcombine.high %v6623_v15, %v6623_v15  ;;  %v2977_v25 = vadd.f32 %v6817_v0, %v7943_v14 }
 0x148   :  { %v3133_v46 = vrot.slane %v3125_v52, %v5699_v27  ;;  %v3395_v23 = vadd.f32 %v3043_v41, %v2957_v13  ;;  %v3140_v49 = vrot.slane %v3126_v55, %v5699_v27  ;;  %v6990_v19 = vrot.slane %v3241_v22, %v5699_v27 }
 0x149   :  { %v3242_v8 = vcombine.low %v7942_v38, %v7941_v62  ;;  %v6984_v24 = vrot.slane %v3240_v28, %v5699_v27  ;;  %v3398_v11 = vadd.f32 %v3190_v6, %v2972_v53  ;;  %v4942_v15 = vcombine.high %v6824_v31, %v6872_v50 }
 0x14a   :  { %v6992_v30 = vpop.f32.mrb[36].mxu1  ;;  %v7944_v38 = vcombine.high %v6520_v57, %v6528_v12  ;;  %v7946_v0 = vcombine.low %v6550_v61, %v6553_v9  ;;  %v7947_v55 = vcombine.high %v6835_v1, %v6835_v1  ;;  %v3141_v42 = vcombine.low %v3133_v46, %v3140_v49  ;;  %v7951_v49 = vld [vmem:[#allocation20_spill] sm:$0xff] }
 0x14b   :  { %v6997_v62 = vrot.slane %v3242_v8, %v5699_v27  ;;  %v7011_v13 = vpop.f32.mrb[37].mxu1  ;;  %v3272_v34 = vcombine.low %v6984_v24, %v6990_v19  ;;  %v7948_v52 = vcombine.high %v6550_v61, %v6553_v9  ;;  %v7949_v41 = vrot.slane %v6669_v58, %v5699_v27 }
 0x14c   :  { %v7003_v14 = vrot.slane %v7944_v38, %v5699_v27  ;;  %v7009_v22 = vrot.slane %v7946_v0, %v5699_v27  ;;  %v3341_v53 = vcombine.low %v6876_v45, %v7947_v55  ;;  %v7950_v8 = vcombine.low %v6579_v29, %v6556_v44 }
 0x14d   :  { %v7023_v28 = vrot.slane %v7948_v52, %v5699_v27  ;;  %v3273_v6 = vcombine.low %v6997_v62, %v7949_v41  ;;  %v2992_v0 = vadd.f32 %v6845_v39, %v7951_v49  ;;  %v2541_v9 = vcombine.low %v6835_v1, %v6876_v45 }
 0x14e   :  { %7945 = vst [vmem:[#allocation44_spill] sm:$0xff] %v7003_v14  ;;  %v3222_v38 = vrot.slane %v7950_v8, %v5699_v27  ;;  %v3223_v46 = vcombine.low %v7003_v14, %v7009_v22  ;;  %v4943_v61 = vcombine.high %v6835_v1, %v6876_v45  ;;  %v7042_v58 = vrot.slane %v2539_v33, %v5699_v27  ;;  %v7046_v52 = vpop.f32.mrb[38].mxu1  ;;  %v7972_v14 = vld [vmem:[#allocation47_spill] sm:$0xff] }
 0x14f   :  { %v7044_v55 = vadd.f32 %v3141_v42, %v2967_v10  ;;  %v3280_v44 = vrot.slane %v3272_v34, %v5699_v27  ;;  %v3287_v29 = vrot.slane %v3273_v6, %v5699_v27  ;;  %v7952_v39 = vcombine.high %v6824_v31, %v6824_v31  ;;  %v7055_v49 = vpop.f32.mrb[39].mxu1  ;;  %v7955_v31 = vld [vmem:[#allocation22_spill] sm:$0xff] }
 0x150   :  { %v3224_v41 = vcombine.low %v7023_v28, %v3222_v38  ;;  %v3231_v45 = vrot.slane %v3223_v46, %v5699_v27  ;;  %v3340_v10 = vcombine.low %v2035_v20, %v6835_v1  ;;  %v7061_v33 = vrot.slane %v6838_v2, %v5699_v27 }
 0x151   :  { %v3339_v8 = vcombine.low %v6872_v50, %v7952_v39  ;;  %v3369_v42 = vrot.slane %v3341_v53, %v5699_v27  ;;  %v3288_v34 = vcombine.low %v3280_v44, %v3287_v29  ;;  %v2987_v50 = vadd.f32 %v6854_v32, %v7955_v31 }
 0x152   :  { %7953 = vst [vmem:[#allocation41_spill] sm:$0xff] %v7061_v33  ;;  %v3238_v6 = vrot.slane %v3224_v41, %v5699_v27  ;;  %v7071_v39 = vrot.slane %v4942_v15, %v5699_v27  ;;  %v7074_v1 = vrot.slane %v3340_v10, %v5699_v27  ;;  %v3289_v2 = vcombine.low %v6663_v51, %v6686_v16  ;;  %v7080_v53 = vpop.f32.mrb[40].mxu1 }
 0x153   :  { %v7066_v38 = vrot.slane %v3339_v8, %v5699_v27  ;;  %v4968_v20 = vcombine.high %v6663_v51, %v6686_v16  ;;  %v3400_v46 = vadd.f32 %v3288_v34, %v2982_v17  ;;  %v7957_v32 = vcombine.low %v6736_v37, %v6749_v56  ;;  %v7090_v41 = vpop.f32.mrb[41].mxu1 }
 0x154   :  { %7956 = vst [vmem:[#allocation32_spill] sm:$0xff] %v7074_v1  ;;  %v3239_v44 = vcombine.low %v3231_v45, %v3238_v6  ;;  %v3371_v8 = vcombine.low %v7074_v1, %v3369_v42  ;;  %v7094_v10 = vrot.slane %v3289_v2, %v5699_v27  ;;  %v7961_v16 = vcombine.high %v6736_v37, %v6749_v56  ;;  %v7962_v42 = vld [vmem:[#allocation13_spill] sm:$0xff] }
 0x155   :  { %7954 = vst [vmem:[#allocation30_spill] sm:$0xff] %v7066_v38  ;;  %v3370_v29 = vcombine.low %v7061_v33, %v7066_v38  ;;  %v7088_v15 = vrot.slane %v7957_v32, %v5699_v27  ;;  %v7097_v51 = vrot.slane %v4968_v20, %v5699_v27  ;;  %v7105_v45 = vadd.f32 %v6509_v63, %v6924_v4 }
 0x156   :  { %7959 = vst [vmem:[#allocation50_spill] sm:$0xff] %v7094_v10  ;;  %v3320_v17 = vrot.slane %v7961_v16, %v5699_v27  ;;  %v7108_v34 = vadd.f32 %v6509_v63, %v3395_v23  ;;  %v3399_v6 = vadd.f32 %v3239_v44, %v2977_v25  ;;  %v7112_v31 = vadd.f32 %v6884_v40, %v7962_v42  ;;  %v7119_v32 = vpop.f32.mrb[42].mxu1  ;;  %v7963_v40 = vld [vmem:[#allocation16_spill] sm:$0xff] }
 0x157   :  { %7958 = vst [vmem:[#allocation15_spill] sm:$0xff] %v7088_v15  ;;  %7960 = vst [vmem:[#allocation17_spill] sm:$0xff] %v7097_v51  ;;  %v3378_v2 = vrot.slane %v3370_v29, %v5699_v27  ;;  %v3385_v20 = vrot.slane %v3371_v8, %v5699_v27  ;;  %v3321_v37 = vcombine.low %v7094_v10, %v7097_v51  ;;  %v7130_v29 = vpop.f32.mrb[43].mxu1  ;;  %v7968_v10 = vld [vmem:[#allocation18_spill] sm:$0xff] }
 0x158   :  { %v3322_v56 = vcombine.low %v7088_v15, %v3320_v17  ;;  %v7122_v4 = vrot.slane %v2541_v9, %v5699_v27  ;;  %v2570_v23 = vrot.slane %v4943_v61, %v5699_v27  ;;  %v7126_v25 = vadd.f32 %v6509_v63, %v3398_v11  ;;  %7964 = vst [vmem:[#allocation20_spill] sm:$0xff] %v7130_v29  ;;  %v7965_v11 = vld [vmem:[#allocation19_spill] sm:$0xff]  ;;  %v7966_v15 = vld [vmem:[#allocation36_spill] sm:$0xff]  ;;  %v7970_v61 = vld [vmem:[#allocation46_spill] sm:$0xff] }
 0x159   :  { %v3754_v44 = vadd.f32 %v6891_v26, %v7963_v40  ;;  %v3386_v8 = vcombine.low %v3378_v2, %v3385_v20  ;;  %v3329_v16 = vrot.slane %v3321_v37, %v5699_v27  ;;  %v3817_v42 = vcombine.low %v6351_v60, %v6335_v5  ;;  %v7967_v26 = vld [vmem:[#allocation39_spill] sm:$0xff]  ;;  %v7969_v5 = vld [vmem:[#allocation38_spill] sm:$0xff]  ;;  %v7980_v2 = vld [vmem:[#allocation52_spill] sm:$0xff] }
 0x15a   :  { %v3336_v17 = vrot.slane %v3322_v56, %v5699_v27  ;;  %v2571_v9 = vcombine.low %v7042_v58, %v7071_v39  ;;  %v3799_v51 = vrot.slane %v7965_v11, %v5699_v27  ;;  %v3801_v40 = vcombine.low %v7967_v26, %v7966_v15  ;;  %v7146_v38 = vpop.f32.mrb[44].mxu1  ;;  %v7971_v11 = vld [vmem:[#allocation48_spill] sm:$0xff] }
 0x15b   :  { %v3402_v20 = vadd.f32 %v3386_v8, %v2992_v0  ;;  %v3769_v56 = vadd.f32 %v6922_v3, %v7968_v10  ;;  %v3875_v33 = vcombine.low %v6769_v59, %v7970_v61  ;;  %v3876_v29 = vcombine.low %v7972_v14, %v7971_v11  ;;  %v7154_v15 = vpop.f32.mrb[45].mxu1 }
 0x15c   :  { %v3337_v37 = vcombine.low %v3329_v16, %v3336_v17  ;;  %v3800_v60 = vcombine.low %v3799_v51, %v7969_v5  ;;  %v3815_v1 = vrot.slane %v3801_v40, %v5699_v27  ;;  %7973 = vst [vmem:[#allocation22_spill] sm:$0xff] %v7154_v15  ;;  %v3824_v16 = vrot.slane %v3817_v42, %v5699_v27  ;;  %v7976_v5 = vld [vmem:[#allocation34_spill] sm:$0xff] }
 0x15d   :  { %v2572_v3 = vcombine.low %v7122_v4, %v2570_v23  ;;  %v7161_v10 = vadd.f32 %v6509_v63, %v7044_v55  ;;  %v3883_v59 = vrot.slane %v3875_v33, %v5699_v27  ;;  %v3890_v17 = vrot.slane %v3876_v29, %v5699_v27  ;;  %v7974_v55 = vld [vmem:[#allocation21_spill] sm:$0xff] }
 0x15e   :  { %v3401_v8 = vadd.f32 %v3337_v37, %v2987_v50  ;;  %v3808_v51 = vrot.slane %v3800_v60, %v5699_v27  ;;  %v7167_v14 = vadd.f32 %v6509_v63, %v3400_v46  ;;  %v7170_v61 = vadd.f32 %v6509_v63, %v3399_v6  ;;  %v7975_v37 = vld [vmem:[#allocation33_spill] sm:$0xff]  ;;  %v7978_v46 = vld [vmem:[#allocation35_spill] sm:$0xff] }
 0x15f   :  { %v2579_v50 = vrot.slane %v2571_v9, %v5699_v27  ;;  %v2586_v23 = vrot.slane %v2572_v3, %v5699_v27  ;;  %v3891_v26 = vcombine.low %v3883_v59, %v3890_v17  ;;  %v3764_v40 = vadd.f32 %v6933_v54, %v7974_v55  ;;  %v7977_v60 = vld [vmem:[#allocation37_spill] sm:$0xff]  ;;  %v7982_v59 = vld [vmem:[#allocation23_spill] sm:$0xff] }
 0x160   :  { %v3816_v42 = vcombine.low %v3808_v51, %v3815_v1  ;;  %v3849_v33 = vrot.slane %v7975_v37, %v5699_v27  ;;  %v3825_v29 = vcombine.low %v3824_v16, %v7976_v5  ;;  %v3826_v11 = vcombine.low %v7978_v46, %v7977_v60  ;;  %v7979_v6 = vld [vmem:[#allocation53_spill] sm:$0xff]  ;;  %v7981_v1 = vld [vmem:[#allocation51_spill] sm:$0xff] }
 0x161   :  { %v2587_v0 = vcombine.low %v2579_v50, %v2586_v23  ;;  %v3851_v15 = vcombine.low %v7980_v2, %v7979_v6  ;;  %v7185_v3 = vadd.f32 %v3891_v26, %v3769_v56  ;;  %v3779_v54 = vadd.f32 %v6962_v7, %v7982_v59  ;;  %v7986_v26 = vld [vmem:[#allocation24_spill] sm:$0xff]  ;;  %v7987_v46 = vld [vmem:[#allocation45_spill] sm:$0xff]  ;;  %v7988_v6 = vld [vmem:[#allocation58_spill] sm:$0xff] }
 0x162   :  { %v7183_v9 = vadd.f32 %v3816_v42, %v3754_v44  ;;  %v3850_v51 = vcombine.low %v3849_v33, %v7981_v1  ;;  %v3413_v17 = vmax.f32 %v7161_v10, 0.0  ;;  %v7983_v50 = vcombine.low %v6590_v21, %v6604_v48  ;;  %v7984_v42 = vld [vmem:[#allocation54_spill] sm:$0xff] }
 0x163   :  { %v2603_v16 = vadd.f32 %v2587_v0, %v6725_v36  ;;  %v3865_v55 = vrot.slane %v3851_v15, %v5699_v27  ;;  %v3416_v44 = vmax.f32 %v7167_v14, 0.0  ;;  %v3415_v56 = vmax.f32 %v7170_v61, 0.0  ;;  %v7985_v0 = vld [vmem:[#allocation55_spill] sm:$0xff]  ;;  %v7989_v59 = vld [vmem:[#allocation26_spill] sm:$0xff] }
 0x164   :  { %v3924_v2 = vrot.slane %v7983_v50, %v5699_v27  ;;  %v3858_v23 = vrot.slane %v3850_v51, %v5699_v27  ;;  %v3926_v7 = vcombine.low %v7984_v42, %v6697_v18  ;;  %v3840_v10 = vrot.slane %v3826_v11, %v5699_v27 }
 0x165   :  { %v2617_v36 = vadd.f32 %v6509_v63, %v2603_v16  ;;  %v3774_v37 = vadd.f32 %v6974_v35, %v7986_v26  ;;  %v7208_v21 = vadd.f32 %v6509_v63, %v3402_v20  ;;  %v3833_v48 = vrot.slane %v3825_v29, %v5699_v27  ;;  %v7990_v20 = vld [vmem:[#allocation59_spill] sm:$0xff]  ;;  %v7991_v16 = vld [vmem:[#allocation60_spill] sm:$0xff] }
 0x166   :  { %v3925_v15 = vcombine.low %v3924_v2, %v7985_v0  ;;  %v3866_v33 = vcombine.low %v3858_v23, %v3865_v55  ;;  %v3940_v5 = vrot.slane %v3926_v7, %v5699_v27  ;;  %v3899_v11 = vrot.slane %v7987_v46, %v5699_v27  ;;  %v7993_v23 = vld [vmem:[#allocation57_spill] sm:$0xff]  ;;  %v7999_v46 = vld [vmem:[#allocation63_spill] sm:$0xff] }
 0x167   :  { %v2625_v60 = vmax.f32 %v2617_v36, 0.0  ;;  %v3901_v1 = vcombine.low %v7988_v6, %v6712_v47  ;;  %v3789_v35 = vadd.f32 %v6992_v30, %v7989_v59  ;;  %v7992_v29 = vcombine.high %v7990_v20, %v7991_v16  ;;  %v7994_v47 = vld [vmem:[#allocation12_spill] sm:$0xff]  ;;  %v8001_v6 = vld [vmem:[#allocation42_spill] sm:$0xff]  ;;  %v8003_v20 = vld [vmem:[#allocation61_spill] sm:$0xff] }
 0x168   :  { %v3933_v18 = vrot.slane %v3925_v15, %v5699_v27  ;;  %v4002_v51 = vadd.f32 %v3866_v33, %v3764_v40  ;;  %v3976_v50 = vcombine.low %v7071_v39, %v7122_v4  ;;  %v3900_v42 = vcombine.low %v3899_v11, %v7993_v23  ;;  %v8000_v11 = vld [vmem:[#allocation25_spill] sm:$0xff] }
 0x169   :  { %v3974_v55 = vrot.slane %v7992_v29, %v5699_v27  ;;  %5227 = vmatmul.mubr.msk.f32.gmra.mrb[22].mxu0 %vm2626_vm9, %v2625_v60  ;;  %v3915_v7 = vrot.slane %v3901_v1, %v5699_v27  ;;  %v3661_v36 = vsel %vm3652_vm7, %v7994_v47, 0.0  ;;  %v3841_v30 = vcombine.low %v3833_v48, %v3840_v10  ;;  %v8007_v23 = vld [vmem:[#allocation65_spill] sm:$0xff] }
 0x16a   :  { %v3941_v2 = vcombine.low %v3933_v18, %v3940_v5  ;;  %v7996_v0 = vmax.f32 %v7108_v34, 0.0  ;;  %v3990_v39 = vrot.slane %v3976_v50, %v5699_v27  ;;  %v3784_v4 = vadd.f32 %v7011_v13, %v3661_v36  ;;  %v7997_v5 = vld [vmem:[#allocation56_spill] sm:$0xff] }
 0x16b   :  { %v3975_v15 = vcombine.low %v3974_v55, %v7042_v58  ;;  %v3908_v33 = vrot.slane %v3900_v42, %v5699_v27  ;;  %v3949_v60 = vrot.slane %v7997_v5, %v5699_v27  ;;  %v7998_v18 = vld [vmem:[#allocation64_spill] sm:$0xff]  ;;  %v3409_v34 = vadd.f32 %v6509_v63, %v3401_v8 }
 0x16c   :  { %5257 = vmatprep.mubr.msk.f32.mxu0 %vm2626_vm9, %v7996_v0  ;;  %v7237_v26 = vadd.f32 %v3941_v2, %v3779_v54  ;;  %v3951_v10 = vcombine.low %v7999_v46, %v7998_v18  ;;  %v4372_v58 = vadd.f32 %v7046_v52, %v8000_v11  ;;  %v4437_v13 = vrot.slane %v8001_v6, %v5699_v27  ;;  %v8004_v8 = vld [vmem:[#allocation4_spill] sm:$0xff]  ;;  %v8005_v52 = vld [vmem:[#allocation66_spill] sm:$0xff]  ;;  %v8006_v2 = vld [vmem:[#allocation67_spill] sm:$0xff] }
 0x16d   :  { %v3983_v48 = vrot.slane %v3975_v15, %v5699_v27  ;;  %v4001_v54 = vadd.f32 %v3841_v30, %v7112_v31  ;;  %v8002_v1 = vmax.f32 %v7105_v45, 0.0  ;;  %v3916_v59 = vcombine.low %v3908_v33, %v3915_v7  ;;  %v8008_v31 = vld [vmem:[#allocation6_spill] sm:$0xff]  ;;  %v8009_v0 = vld [vmem:[#allocation5_spill] sm:$0xff]  ;;  %v8012_v18 = vld [vmem:[#allocation31_spill] sm:$0xff] }
 0x16e   :  { %v3950_v16 = vcombine.low %v3949_v60, %v8003_v20  ;;  %v3965_v29 = vrot.slane %v3951_v10, %v5699_v27  ;;  %v4438_v50 = vcombine.low %v4437_v13, %v8005_v52  ;;  %v4439_v42 = vcombine.low %v8007_v23, %v8006_v2  ;;  %v8011_v60 = vld [vmem:[#allocation27_spill] sm:$0xff]  ;;  %v8014_v11 = vld [vmem:[#allocation72_spill] sm:$0xff]  ;;  %v8015_v6 = vld [vmem:[#allocation70_spill] sm:$0xff] }
 0x16f   :  { %5258 = vmatmul.mubr.msk.f32.vlgmr.msra.gmra.mrb[24].mxu0 %vm2626_vm9, %v8002_v1  ;;  %v3991_v55 = vcombine.low %v3983_v48, %v3990_v39  ;;  %v4268_v45 = vsel %vm4265_vm8, %v8008_v31, 0.0  ;;  %v3418_v7 = vmax.f32 %v7208_v21, 0.0  ;;  %v4004_v36 = vadd.f32 %v3916_v59, %v3774_v37  ;;  %v8020_v52 = vld [vmem:[#allocation8_spill] sm:$0xff]  ;;  %v8022_v23 = vld [vmem:[#allocation29_spill] sm:$0xff] }
 0x170   :  { %5406 = vmatpush3.bf16.msra.mxu0 %v8004_v8  ;;  %5260 = vmatprep.mubr.msk.f32.mxu0 %vm2626_vm9, %v3413_v17  ;;  %v3958_v30 = vrot.slane %v3950_v16, %v5699_v27  ;;  %v4367_v17 = vadd.f32 %v7055_v49, %v4268_v45  ;;  %v4446_v33 = vrot.slane %v4438_v50, %v5699_v27  ;;  %v3417_v10 = vmax.f32 %v3409_v34, 0.0  ;;  %v8018_v16 = vld [vmem:[#allocation71_spill] sm:$0xff]  ;;  %v8021_v2 = vld [vmem:[#allocation28_spill] sm:$0xff] }
 0x171   :  { %5409 = vmatprep.subr.msk.bf16.mxu0 %vm5650_vm2, %v8009_v0  ;;  %v7270_v39 = vadd.f32 %v3991_v55, %v3789_v35  ;;  %v4453_v5 = vrot.slane %v4439_v42, %v5699_v27  ;;  %v4413_v46 = vcombine.low %v8012_v18, %v8011_v60  ;;  %v4009_v37 = vadd.f32 %v6509_v63, %v4001_v54  ;;  %v8026_v18 = vld [vmem:[#allocation43_spill] sm:$0xff] }
 0x172   :  { %v8013_v21 = vmax.f32 %v7126_v25, 0.0  ;;  %v3966_v48 = vcombine.low %v3958_v30, %v3965_v29  ;;  %v4414_v49 = vcombine.low %v8015_v6, %v8014_v11  ;;  %v4008_v35 = vadd.f32 %v6509_v63, %v7183_v9  ;;  %v8016_v25 = vld [vmem:[#allocation7_spill] sm:$0xff]  ;;  %v8019_v29 = vld [vmem:[#allocation73_spill] sm:$0xff] }
 0x173   :  { %v7286_v13 = vadd.f32 %v6509_v63, %v7185_v3  ;;  %v4454_v34 = vcombine.low %v4446_v33, %v4453_v5  ;;  %v4271_v54 = vsel %vm4265_vm8, %v8016_v25, 0.0  ;;  %v4421_v9 = vrot.slane %v4413_v46, %v5699_v27  ;;  %v8024_v30 = vld [vmem:[#allocation69_spill] sm:$0xff] }
 0x174   :  { %5261 = vmatmul.mubr.msk.f32.gmra.mrb[26].mxu0 %vm2626_vm9, %v8013_v21  ;;  %v4006_v1 = vadd.f32 %v3966_v48, %v3784_v4  ;;  %v4428_v59 = vrot.slane %v4414_v49, %v5699_v27  ;;  %v4382_v3 = vadd.f32 %v7080_v53, %v4271_v54  ;;  %v4489_v55 = vcombine.low %v8019_v29, %v8018_v16  ;;  %v8032_v16 = vld [vmem:[#allocation44_spill] sm:$0xff] }
 0x175   :  { %5263 = vmatprep.mubr.msk.f32.mxu0 %vm2626_vm9, %v3415_v56  ;;  %5412 = vmatpush3.bf16.msk.msra.mxu0 %vm5650_vm2, %v8009_v0  ;;  %v7301_v61 = vadd.f32 %v4454_v34, %v4372_v58  ;;  %v8017_v56 = vld [vmem:[#allocation40_spill] sm:$0xff]  ;;  %v4270_v4 = vsel %vm4265_vm8, %v8020_v52, 0.0  ;;  %v4010_v50 = vadd.f32 %v6509_v63, %v4002_v51  ;;  %v8023_v42 = vcombine.high %v8021_v2, %v8022_v23  ;;  %v8025_v51 = vld [vmem:[#allocation14_spill] sm:$0xff]  ;;  %v8035_v2 = vld [vmem:[#allocation41_spill] sm:$0xff] }
 0x176   :  { %5422 = vmatprep.subr.bf16.mxu0 %v8004_v8  ;;  %v4487_v20 = vrot.slane %v8017_v56, %v5699_v27  ;;  %v4429_v53 = vcombine.low %v4421_v9, %v4428_v59  ;;  %v4377_v58 = vadd.f32 %v7090_v41, %v4270_v4  ;;  %v4017_v45 = vmax.f32 %v4009_v37, 0.0  ;;  %v8027_v41 = vld [vmem:[#allocation9_spill] sm:$0xff]  ;;  %v8030_v56 = vld [vmem:[#allocation10_spill] sm:$0xff] }
 0x177   :  { %v4462_v31 = vrot.slane %v8023_v42, %v5699_v27  ;;  %v4503_v5 = vrot.slane %v4489_v55, %v5699_v27  ;;  %v4464_v14 = vcombine.low %v8025_v51, %v6956_v43  ;;  %v4016_v60 = vmax.f32 %v4008_v35, 0.0  ;;  %v8036_v42 = vld [vmem:[#allocation32_spill] sm:$0xff] }
 0x178   :  { %5264 = vmatmul.mubr.msk.f32.gmra.mrb[28].mxu0 %vm2626_vm9, %v3416_v44  ;;  %v4488_v33 = vcombine.low %v4487_v20, %v8024_v30  ;;  %v4613_v44 = vadd.f32 %v4429_v53, %v4367_v17  ;;  %v4273_v21 = vsel %vm4265_vm8, %v8027_v41, 0.0  ;;  %v4019_v48 = vmax.f32 %v7286_v13, 0.0  ;;  %v8028_v17 = vld [vmem:[#allocation49_spill] sm:$0xff]  ;;  %v8040_v51 = vld [vmem:[#allocation68_spill] sm:$0xff] }
 0x179   :  { %5266 = vmatprep.mubr.msk.f32.mxu0 %vm2626_vm9, %v3417_v10  ;;  %v4463_v46 = vcombine.low %v4462_v31, %v8026_v18  ;;  %v4478_v10 = vrot.slane %v4464_v14, %v5699_v27  ;;  %v4392_v11 = vadd.f32 %v7119_v32, %v4273_v21  ;;  %v4018_v6 = vmax.f32 %v4010_v50, 0.0  ;;  %v8037_v31 = vld [vmem:[#allocation30_spill] sm:$0xff]  ;;  %v8042_v41 = vld [vmem:[#allocation17_spill] sm:$0xff] }
 0x17a   :  { %v4496_v37 = vrot.slane %v4488_v33, %v5699_v27  ;;  %v4537_v49 = vrot.slane %v8028_v17, %v5699_v27  ;;  %v4539_v35 = vcombine.low %v6990_v19, %v6997_v62  ;;  %v4012_v34 = vadd.f32 %v6509_v63, %v4004_v36  ;;  %v8031_v36 = vld [vmem:[#allocation20_spill] sm:$0xff] }
 0x17b   :  { %v4471_v43 = vrot.slane %v4463_v46, %v5699_v27  ;;  %v8029_v32 = vcombine.low %v6520_v57, %v6528_v12  ;;  %v4272_v19 = vsel %vm4265_vm8, %v8030_v56, 0.0  ;;  %v4274_v30 = vsel %vm4265_vm8, %v7994_v47, 0.0  ;;  %v8041_v46 = vld [vmem:[#allocation15_spill] sm:$0xff] }
 0x17c   :  { %5267 = vmatmul.mubr.msk.f32.gmra.mrb[30].mxu0 %vm2626_vm9, %v3418_v7  ;;  %v4504_v13 = vcombine.low %v4496_v37, %v4503_v5  ;;  %v4514_v7 = vcombine.low %v7009_v22, %v7023_v28  ;;  %v4538_v9 = vcombine.low %v4537_v49, %v6984_v24  ;;  %v4553_v59 = vrot.slane %v4539_v35, %v5699_v27  ;;  %v8033_v22 = vld [vmem:[#allocation11_spill] sm:$0xff]  ;;  %v8034_v28 = vld [vmem:[#allocation62_spill] sm:$0xff] }
 0x17d   :  { %5297 = vmatprep.mubr.msk.f32.mxu0 %vm2626_vm9, %v4016_v60  ;;  %v4512_v25 = vrot.slane %v8029_v32, %v5699_v27  ;;  %v4479_v54 = vcombine.low %v4471_v43, %v4478_v10  ;;  %v4387_v20 = vadd.f32 %v8031_v36, %v4272_v19  ;;  %v4275_v24 = vsel %vm4265_vm8, %v8033_v22, 0.0  ;;  %v8039_v5 = vld [vmem:[#allocation50_spill] sm:$0xff] }
 0x17e   :  { %v4616_v62 = vadd.f32 %v4504_v13, %v4382_v3  ;;  %v4528_v12 = vrot.slane %v4514_v7, %v5699_v27  ;;  %v4546_v55 = vrot.slane %v4538_v9, %v5699_v27  ;;  %v4587_v52 = vrot.slane %v8034_v28, %v5699_v27 }
 0x17f   :  { %v4513_v29 = vcombine.low %v4512_v25, %v8032_v16  ;;  %v4615_v57 = vadd.f32 %v4479_v54, %v4377_v58  ;;  %v4013_v3 = vadd.f32 %v6509_v63, %v7237_v26  ;;  %v4020_v4 = vmax.f32 %v4012_v34, 0.0  ;;  %v5588_v63 = vld [vmem:[%s7782_s7] ss:$0 sm:$0xff] }
 0x180   :  { %5298 = vmatmul.mubr.msk.f32.vlgmr.msra.gmra.mrb[32].mxu0 %vm2626_vm9, %v4017_v45  ;;  %v4402_v53 = vadd.f32 %v7146_v38, %v4275_v24  ;;  %v4554_v58 = vcombine.low %v4546_v55, %v4553_v59  ;;  %v4588_v23 = vcombine.low %v4587_v52, %v8035_v2  ;;  %v4589_v45 = vcombine.low %v8037_v31, %v8036_v42 }
 0x181   :  { %v4521_v50 = vrot.slane %v4513_v29, %v5699_v27  ;;  %5424 = vmatpush3.bf16.msra.mxu0 %v8004_v8  ;;  %5300 = vmatprep.mubr.msk.f32.mxu0 %vm2626_vm9, %v4018_v6  ;;  %v4014_v26 = vadd.f32 %v5588_v63, %v4006_v1  ;;  %v8038_v8 = vld [vmem:[#allocation22_spill] sm:$0xff]  ;;  %v4563_v14 = vcombine.low %v8040_v51, %v8039_v5  ;;  %v4021_v1 = vmax.f32 %v4013_v3, 0.0 }
 0x182   :  { %5427 = vmatprep.subr.msk.bf16.mxu0 %vm5650_vm2, %v8009_v0  ;;  %v4397_v33 = vadd.f32 %v8038_v8, %v4274_v30  ;;  %v4618_v60 = vadd.f32 %v4554_v58, %v4392_v11  ;;  %v4596_v18 = vrot.slane %v4588_v23, %v5699_v27  ;;  %v4603_v47 = vrot.slane %v4589_v45, %v5699_v27 }
 0x183   :  { %v4529_v38 = vcombine.low %v4521_v50, %v4528_v12  ;;  %v4564_v21 = vcombine.low %v8042_v41, %v8041_v46  ;;  %v4015_v37 = vadd.f32 %v5588_v63, %v7270_v39  ;;  %v4022_v11 = vmax.f32 %v4014_v26, 0.0 }
 0x184   :  { %5301 = vmatmul.mubr.msk.f32.gmra.mrb[34].mxu0 %vm2626_vm9, %v4019_v48  ;;  %v4604_v10 = vcombine.low %v4596_v18, %v4603_v47  ;;  %v4621_v6 = vadd.f32 %v5588_v63, %v4613_v44  ;;  %v4571_v43 = vrot.slane %v4563_v14, %v5699_v27  ;;  %v4622_v15 = vadd.f32 %v5588_v63, %v7301_v61 }
 0x185   :  { %v4617_v40 = vadd.f32 %v4529_v38, %v4387_v20  ;;  %5303 = vmatprep.mubr.msk.f32.mxu0 %vm2626_vm9, %v4020_v4  ;;  %5430 = vmatpush3.bf16.msk.msra.mxu0 %vm5650_vm2, %v8009_v0  ;;  %v4578_v48 = vrot.slane %v4564_v21, %v5699_v27  ;;  %v4023_v35 = vmax.f32 %v4015_v37, 0.0  ;;  %v4623_v34 = vadd.f32 %v5588_v63, %v4615_v57 }
 0x186   :  { %v4620_v17 = vadd.f32 %v4604_v10, %v4402_v53  ;;  %v4629_v0 = vmax.f32 %v4621_v6, 0.0  ;;  %v4630_v39 = vmax.f32 %v4622_v15, 0.0  ;;  %v4624_v44 = vadd.f32 %v5588_v63, %v4616_v62 }
 0x187   :  { %v4579_v49 = vcombine.low %v4571_v43, %v4578_v48  ;;  %v4631_v32 = vmax.f32 %v4623_v34, 0.0  ;;  %v4625_v27 = vadd.f32 %v5588_v63, %v4617_v40  ;;  %v4626_v7 = vadd.f32 %v5588_v63, %v4618_v60 }
 0x188   :  { %5304 = vmatmul.mubr.msk.f32.gmra.mrb[36].mxu0 %vm2626_vm9, %v4021_v1  ;;  %v4632_v25 = vmax.f32 %v4624_v44, 0.0  ;;  %v4628_v59 = vadd.f32 %v5588_v63, %v4620_v17 }
 0x189   :  { %5306 = vmatprep.mubr.msk.f32.mxu0 %vm2626_vm9, %v4022_v11  ;;  %v4619_v13 = vadd.f32 %v4579_v49, %v4397_v33  ;;  %v4633_v54 = vmax.f32 %v4625_v27, 0.0  ;;  %v4634_v61 = vmax.f32 %v4626_v7, 0.0 }
 0x18a   :  { %v4636_v19 = vmax.f32 %v4628_v59, 0.0 }
 0x18b   :  { %v4627_v9 = vadd.f32 %v5588_v63, %v4619_v13 }
 0x18c   :  { %5307 = vmatmul.mubr.msk.f32.gmra.mrb[38].mxu0 %vm2626_vm9, %v4023_v35 }
 0x18d   :  { %5337 = vmatprep.mubr.msk.f32.mxu0 %vm2626_vm9, %v4629_v0  ;;  %v4635_v56 = vmax.f32 %v4627_v9, 0.0 }
 0x190   :  { %5338 = vmatmul.mubr.msk.f32.vlgmr.msra.gmra.mrb[40].mxu0 %vm2626_vm9, %v4630_v39 }
 0x191   :  { %5340 = vmatprep.mubr.msk.f32.mxu0 %vm2626_vm9, %v4631_v32 }
 0x194   :  { %5341 = vmatmul.mubr.msk.f32.gmra.mrb[42].mxu0 %vm2626_vm9, %v4632_v25 }
 0x195   :  { %5343 = vmatprep.mubr.msk.f32.mxu0 %vm2626_vm9, %v4633_v54 }
 0x198   :  { %5344 = vmatmul.mubr.msk.f32.gmra.mrb[44].mxu0 %vm2626_vm9, %v4634_v61 }
 0x199   :  { %5346 = vmatprep.mubr.msk.f32.mxu0 %vm2626_vm9, %v4635_v56 }
 0x19c   :  { %5347 = vmatmul.mubr.msk.f32.gmra.mrb[46].mxu0 %vm2626_vm9, %v4636_v19 }
 0x1e9   :  { %v7406_v62 = vpop.f32.mrb[16].mxu0 }
 0x1ea   :  { %v7408_v36 = vpop.f32.mrb[17].mxu0  ;;  %v2760_v57 = vsub.f32 -inf, %v7406_v62  ;;  %v2784_v55 = vsub.f32 %v7406_v62, %v7406_v62 }
 0x1eb   :  { %v2759_v22 = vsub.f32 -inf, %v7408_v36  ;;  %v2783_v24 = vsub.f32 %v7408_v36, %v7408_v36 }
 0x1ec   :  { %v2769_v28 = vmul.f32 1.442695, %v2760_v57  ;;  %v2793_v3 = vmul.f32 1.442695, %v2784_v55 }
 0x1ed   :  { %v2767_v50 = vmul.f32 1.442695, %v2759_v22  ;;  %v2791_v58 = vmul.f32 1.442695, %v2783_v24 }
 0x1ee   :  { %5444 = vpow2.f32 %v2769_v28 }
 0x1ef   :  { %5446 = vpow2.f32 %v2793_v3 }
 0x1f0   :  { %5448 = vpow2.f32 %v2767_v50 }
 0x1f1   :  { %5450 = vpow2.f32 %v2791_v58 }
 0x1f8   :  { %v5445_v5 = vpop.eup %5444 }
 0x1f9   :  { %v5447_v14 = vpop.eup %5446  ;;  %v2808_v46 = vmul.f32 0.0, %v5445_v5 }
 0x1fa   :  { %v5449_v60 = vpop.eup %5448  ;;  %v2824_v1 = vmul.f32 0.0, %v5447_v14 }
 0x1fb   :  { %v5451_v47 = vpop.eup %5450  ;;  %v2807_v37 = vmul.f32 0.0, %v5449_v60  ;;  %v7438_v43 = vadd.f32 %v5447_v14, %v2808_v46 }
 0x1fc   :  { %v2823_v10 = vmul.f32 0.0, %v5451_v47  ;;  %v7448_v44 = vadd.f32 %v2824_v1, %v2808_v46 }
 0x1fd   :  { %v7450_v32 = vadd.f32 %v5451_v47, %v2807_v37 }
 0x1fe   :  { %v7452_v54 = vadd.f32 %v2823_v10, %v2807_v37 }
 0x202   :  { %v7410_v20 = vpop.f32.mrb[18].mxu0 }
 0x203   :  { %v7412_v16 = vpop.f32.mrb[19].mxu0  ;;  %v2762_v52 = vsub.f32 -inf, %v7410_v20  ;;  %v2786_v4 = vsub.f32 %v7410_v20, %v7410_v20 }
 0x204   :  { %v2761_v53 = vsub.f32 -inf, %v7412_v16  ;;  %v2785_v23 = vsub.f32 %v7412_v16, %v7412_v16 }
 0x205   :  { %v2773_v2 = vmul.f32 1.442695, %v2762_v52  ;;  %v2797_v42 = vmul.f32 1.442695, %v2786_v4 }
 0x206   :  { %v2771_v45 = vmul.f32 1.442695, %v2761_v53  ;;  %v2795_v63 = vmul.f32 1.442695, %v2785_v23 }
 0x207   :  { %5452 = vpow2.f32 %v2773_v2 }
 0x208   :  { %5454 = vpow2.f32 %v2797_v42 }
 0x209   :  { %5456 = vpow2.f32 %v2771_v45 }
 0x20a   :  { %5458 = vpow2.f32 %v2795_v63 }
 0x20b   :  { %v7414_v29 = vpop.f32.mrb[20].mxu0 }
 0x20c   :  { %v7416_v12 = vpop.f32.mrb[21].mxu0  ;;  %v2764_v31 = vsub.f32 -inf, %v7414_v29  ;;  %v2788_v30 = vsub.f32 %v7414_v29, %v7414_v29 }
 0x20d   :  { %v2763_v38 = vsub.f32 -inf, %v7416_v12  ;;  %v2787_v33 = vsub.f32 %v7416_v12, %v7416_v12 }
 0x20e   :  { %v2777_v26 = vmul.f32 1.442695, %v2764_v31  ;;  %v2801_v8 = vmul.f32 1.442695, %v2788_v30 }
 0x20f   :  { %v2775_v51 = vmul.f32 1.442695, %v2763_v38  ;;  %v2799_v18 = vmul.f32 1.442695, %v2787_v33 }
 0x210   :  { %5460 = vpow2.f32 %v2777_v26 }
 0x211   :  { %5462 = vpow2.f32 %v2801_v8  ;;  %v5453_v40 = vpop.eup %5452 }
 0x212   :  { %5464 = vpow2.f32 %v2775_v51  ;;  %v5455_v41 = vpop.eup %5454  ;;  %v2810_v48 = vmul.f32 0.0, %v5453_v40 }
 0x213   :  { %v5457_v21 = vpop.eup %5456  ;;  %5466 = vpow2.f32 %v2799_v18  ;;  %v2826_v0 = vmul.f32 0.0, %v5455_v41 }
 0x214   :  { %v5459_v6 = vpop.eup %5458  ;;  %v2809_v34 = vmul.f32 0.0, %v5457_v21  ;;  %v7454_v19 = vadd.f32 %v5455_v41, %v2810_v48 }
 0x215   :  { %v2825_v9 = vmul.f32 0.0, %v5459_v6  ;;  %v7459_v24 = vadd.f32 %v2826_v0, %v2810_v48 }
 0x216   :  { %v7461_v28 = vadd.f32 %v5459_v6, %v2809_v34 }
 0x217   :  { %v7469_v58 = vadd.f32 %v2825_v9, %v2809_v34 }
 0x21a   :  { %v5461_v15 = vpop.eup %5460 }
 0x21b   :  { %v5463_v7 = vpop.eup %5462  ;;  %v2812_v57 = vmul.f32 0.0, %v5461_v15 }
 0x21c   :  { %v5465_v3 = vpop.eup %5464  ;;  %v2828_v4 = vmul.f32 0.0, %v5463_v7 }
 0x21d   :  { %v5467_v31 = vpop.eup %5466  ;;  %v7474_v45 = vadd.f32 %v5463_v7, %v2812_v57  ;;  %v2811_v38 = vmul.f32 0.0, %v5465_v3 }
 0x21e   :  { %v7482_v51 = vadd.f32 %v2828_v4, %v2812_v57  ;;  %v2827_v60 = vmul.f32 0.0, %v5467_v31 }
 0x21f   :  { %v7496_v48 = vadd.f32 %v5467_v31, %v2811_v38 }
 0x23c   :  { %v7436_v11 = vpop.f32.mrb[22].mxu0 }
 0x23d   :  { %v2766_v17 = vsub.f32 -inf, %v7436_v11  ;;  %v2790_v49 = vsub.f32 %v7436_v11, %v7436_v11  ;;  %v7443_v35 = vpop.f32.mrb[23].mxu0 }
 0x23e   :  { %v2765_v13 = vsub.f32 -inf, %v7443_v35  ;;  %v2789_v39 = vsub.f32 %v7443_v35, %v7443_v35 }
 0x23f   :  { %v2781_v27 = vmul.f32 1.442695, %v2766_v17  ;;  %v2805_v25 = vmul.f32 1.442695, %v2790_v49 }
 0x240   :  { %v2779_v61 = vmul.f32 1.442695, %v2765_v13  ;;  %v2803_v59 = vmul.f32 1.442695, %v2789_v39 }
 0x241   :  { %5468 = vpow2.f32 %v2781_v27 }
 0x242   :  { %v5259_v56 = vpop.f32.mrb[24].mxu0  ;;  %5470 = vpow2.f32 %v2805_v25 }
 0x243   :  { %v7457_v55 = vmax.f32 %v7406_v62, %v5259_v56  ;;  %v3509_v22 = vpop.f32.mrb[25].mxu0  ;;  %5472 = vpow2.f32 %v2779_v61 }
 0x244   :  { %v7464_v52 = vmax.f32 %v7408_v36, %v3509_v22  ;;  %5474 = vpow2.f32 %v2803_v59  ;;  %v7504_v59 = vadd.f32 %v2827_v60, %v2811_v38 }
 0x245   :  { %v3557_v50 = vsub.f32 %v7406_v62, %v7457_v55  ;;  %v3581_v53 = vsub.f32 %v5259_v56, %v7457_v55 }
 0x246   :  { %v3556_v2 = vsub.f32 %v7408_v36, %v7464_v52  ;;  %v3580_v23 = vsub.f32 %v3509_v22, %v7464_v52 }
 0x247   :  { %v5262_v42 = vpop.f32.mrb[26].mxu0  ;;  %v3566_v30 = vmul.f32 1.442695, %v3557_v50  ;;  %v3590_v63 = vmul.f32 1.442695, %v3581_v53 }
 0x248   :  { %v7477_v26 = vmax.f32 %v7410_v20, %v5262_v42  ;;  %v3519_v62 = vpop.f32.mrb[27].mxu0  ;;  %v3564_v8 = vmul.f32 1.442695, %v3556_v2  ;;  %v3588_v33 = vmul.f32 1.442695, %v3580_v23 }
 0x249   :  { %v7480_v5 = vmax.f32 %v7412_v16, %v3519_v62  ;;  %5476 = vpow2.f32 %v3566_v30 }
 0x24a   :  { %v3559_v36 = vsub.f32 %v7410_v20, %v7477_v26  ;;  %v3583_v14 = vsub.f32 %v5262_v42, %v7477_v26  ;;  %5478 = vpow2.f32 %v3590_v63 }
 0x24b   :  { %v3558_v18 = vsub.f32 %v7412_v16, %v7480_v5  ;;  %v3582_v47 = vsub.f32 %v3519_v62, %v7480_v5  ;;  %v5265_v40 = vpop.f32.mrb[28].mxu0  ;;  %5480 = vpow2.f32 %v3564_v8  ;;  %v5469_v6 = vpop.eup %5468 }
 0x24c   :  { %v3570_v46 = vmul.f32 1.442695, %v3559_v36  ;;  %v3594_v41 = vmul.f32 1.442695, %v3583_v14  ;;  %v7491_v21 = vmax.f32 %v7414_v29, %v5265_v40  ;;  %v3529_v1 = vpop.f32.mrb[29].mxu0  ;;  %5482 = vpow2.f32 %v3588_v33  ;;  %v5471_v49 = vpop.eup %5470 }
 0x24d   :  { %v3568_v37 = vmul.f32 1.442695, %v3558_v18  ;;  %v3592_v20 = vmul.f32 1.442695, %v3582_v47  ;;  %v7494_v10 = vmax.f32 %v7416_v12, %v3529_v1  ;;  %v2814_v15 = vmul.f32 0.0, %v5469_v6  ;;  %v5473_v39 = vpop.eup %5472 }
 0x24e   :  { %5484 = vpow2.f32 %v3570_v46  ;;  %v3561_v16 = vsub.f32 %v7414_v29, %v7491_v21  ;;  %v3585_v17 = vsub.f32 %v5265_v40, %v7491_v21  ;;  %v2830_v27 = vmul.f32 0.0, %v5471_v49  ;;  %v5475_v61 = vpop.eup %5474 }
 0x24f   :  { %5486 = vpow2.f32 %v3594_v41  ;;  %v3560_v0 = vsub.f32 %v7416_v12, %v7494_v10  ;;  %v3584_v34 = vsub.f32 %v3529_v1, %v7494_v10  ;;  %v5268_v13 = vpop.f32.mrb[30].mxu0  ;;  %v2813_v29 = vmul.f32 0.0, %v5473_v39 }
 0x250   :  { %5488 = vpow2.f32 %v3568_v37  ;;  %v3574_v25 = vmul.f32 1.442695, %v3561_v16  ;;  %v3598_v7 = vmul.f32 1.442695, %v3585_v17  ;;  %v3539_v9 = vpop.f32.mrb[31].mxu0  ;;  %v7506_v57 = vadd.f32 %v5471_v49, %v2814_v15 }
 0x251   :  { %5490 = vpow2.f32 %v3592_v20  ;;  %v3572_v56 = vmul.f32 1.442695, %v3560_v0  ;;  %v2829_v22 = vmul.f32 0.0, %v5475_v61  ;;  %v3596_v12 = vmul.f32 1.442695, %v3584_v34 }
 0x252   :  { %5492 = vpow2.f32 %v3574_v25  ;;  %v7508_v3 = vadd.f32 %v2830_v27, %v2814_v15  ;;  %v7511_v4 = vmax.f32 %v7436_v11, %v5268_v13  ;;  %v7514_v50 = vmax.f32 %v7443_v35, %v3539_v9 }
 0x253   :  { %5494 = vpow2.f32 %v3598_v7  ;;  %v5299_v53 = vpop.f32.mrb[32].mxu0  ;;  %v5477_v2 = vpop.eup %5476  ;;  %v7516_v23 = vadd.f32 %v5475_v61, %v2813_v29  ;;  %v7518_v42 = vadd.f32 %v2829_v22, %v2813_v29 }
 0x254   :  { %5496 = vpow2.f32 %v3572_v56  ;;  %v7521_v31 = vmax.f32 %v7457_v55, %v5299_v53  ;;  %v7523_v30 = vpop.f32.mrb[33].mxu0  ;;  %v5479_v63 = vpop.eup %5478  ;;  %v3605_v62 = vmul.f32 %v5477_v2, %v7438_v43  ;;  %v3621_v38 = vmul.f32 %v5477_v2, %v7448_v44 }
 0x255   :  { %5498 = vpow2.f32 %v3596_v12  ;;  %v3563_v8 = vsub.f32 %v7436_v11, %v7511_v4  ;;  %v5481_v33 = vpop.eup %5480  ;;  %v3587_v36 = vsub.f32 %v5268_v13, %v7511_v4  ;;  %v3562_v14 = vsub.f32 %v7443_v35, %v7514_v50 }
 0x256   :  { %v3586_v60 = vsub.f32 %v3539_v9, %v7514_v50  ;;  %v4162_v18 = vsub.f32 %v7457_v55, %v7521_v31  ;;  %v5483_v47 = vpop.eup %5482  ;;  %v7535_v40 = vadd.f32 %v5479_v63, %v3605_v62  ;;  %v7537_v43 = vadd.f32 %v5479_v63, %v3621_v38 }
 0x257   :  { %v3604_v44 = vmul.f32 %v5481_v33, %v7450_v32  ;;  %v3620_v11 = vmul.f32 %v5481_v33, %v7452_v54  ;;  %v5302_v46 = vpop.f32.mrb[34].mxu0  ;;  %v3578_v1 = vmul.f32 1.442695, %v3563_v8  ;;  %v3602_v37 = vmul.f32 1.442695, %v3587_v36 }
 0x258   :  { %v5485_v41 = vpop.eup %5484  ;;  %v3576_v20 = vmul.f32 1.442695, %v3562_v14  ;;  %v4186_v35 = vsub.f32 %v5299_v53, %v7521_v31  ;;  %v4124_v15 = vpop.f32.mrb[35].mxu0  ;;  %v3600_v54 = vmul.f32 1.442695, %v3586_v60 }
 0x259   :  { %v5487_v6 = vpop.eup %5486  ;;  %v7542_v16 = vadd.f32 %v5483_v47, %v3604_v44  ;;  %v7544_v55 = vadd.f32 %v5483_v47, %v3620_v11  ;;  %v3607_v17 = vmul.f32 %v5485_v41, %v7454_v19  ;;  %v3623_v49 = vmul.f32 %v5485_v41, %v7459_v24 }
 0x25a   :  { %v5489_v32 = vpop.eup %5488  ;;  %5500 = vpow2.f32 %v3578_v1  ;;  %v4171_v0 = vmul.f32 1.442695, %v4162_v18  ;;  %v4195_v34 = vmul.f32 1.442695, %v4186_v35  ;;  %v7556_v19 = vmax.f32 %v7464_v52, %v7523_v30 }
 0x25b   :  { %v5491_v13 = vpop.eup %5490  ;;  %v7548_v39 = vadd.f32 %v5487_v6, %v3607_v17  ;;  %v7550_v27 = vadd.f32 %v5487_v6, %v3623_v49  ;;  %v3606_v25 = vmul.f32 %v5489_v32, %v7461_v28  ;;  %v3622_v7 = vmul.f32 %v5489_v32, %v7469_v58  ;;  %v5305_v9 = vpop.f32.mrb[36].mxu0 }
 0x25c   :  { %v5493_v61 = vpop.eup %5492  ;;  %5502 = vpow2.f32 %v3602_v37  ;;  %v7559_v24 = vmax.f32 %v7477_v26, %v5302_v46  ;;  %v7562_v29 = vmax.f32 %v7480_v5, %v4124_v15  ;;  %v4134_v56 = vpop.f32.mrb[37].mxu0  ;;  %v4161_v63 = vsub.f32 %v7464_v52, %v7556_v19 }
 0x25d   :  { %v5495_v22 = vpop.eup %5494  ;;  %v7564_v12 = vadd.f32 %v5491_v13, %v3606_v25  ;;  %v7566_v28 = vadd.f32 %v5491_v13, %v3622_v7  ;;  %v3609_v58 = vmul.f32 %v5493_v61, %v7474_v45  ;;  %v3625_v53 = vmul.f32 %v5493_v61, %v7482_v51 }
 0x25e   :  { %v5497_v2 = vpop.eup %5496  ;;  %5504 = vpow2.f32 %v3576_v20  ;;  %v4185_v62 = vsub.f32 %v7523_v30, %v7556_v19  ;;  %v4164_v38 = vsub.f32 %v7477_v26, %v7559_v24  ;;  %v4169_v60 = vmul.f32 1.442695, %v4161_v63 }
 0x25f   :  { %v5499_v8 = vpop.eup %5498  ;;  %v7576_v33 = vadd.f32 %v5495_v22, %v3609_v58  ;;  %v7578_v36 = vadd.f32 %v5495_v22, %v3625_v53  ;;  %v3608_v45 = vmul.f32 %v5497_v2, %v7496_v48  ;;  %v3624_v51 = vmul.f32 %v5497_v2, %v7504_v59  ;;  %v5308_v14 = vpop.f32.mrb[38].mxu0 }
 0x260   :  { %5506 = vpow2.f32 %v3600_v54  ;;  %v4193_v18 = vmul.f32 1.442695, %v4185_v62  ;;  %v4175_v52 = vmul.f32 1.442695, %v4164_v38  ;;  %v4188_v26 = vsub.f32 %v5302_v46, %v7559_v24  ;;  %v7587_v44 = vpop.f32.mrb[39].mxu0 }
 0x261   :  { %v7582_v47 = vadd.f32 %v5499_v8, %v3608_v45  ;;  %v7584_v30 = vadd.f32 %v5499_v8, %v3624_v51  ;;  %5508 = vpow2.f32 %v4171_v0  ;;  %v4163_v48 = vsub.f32 %v7480_v5, %v7562_v29 }
 0x262   :  { %5510 = vpow2.f32 %v4195_v34  ;;  %v4187_v59 = vsub.f32 %v4124_v15, %v7562_v29  ;;  %v7593_v11 = vmax.f32 %v7491_v21, %v5305_v9  ;;  %v4199_v41 = vmul.f32 1.442695, %v4188_v26 }
 0x263   :  { %5512 = vpow2.f32 %v4169_v60  ;;  %v7596_v1 = vmax.f32 %v7494_v10, %v4134_v56  ;;  %v7599_v37 = vmax.f32 %v7511_v4, %v5308_v14  ;;  %v7601_v46 = vpop.f32.mrb[40].mxu0  ;;  %v4173_v35 = vmul.f32 1.442695, %v4163_v48 }
 0x264   :  { %v5501_v20 = vpop.eup %5500  ;;  %5514 = vpow2.f32 %v4193_v18  ;;  %v4197_v6 = vmul.f32 1.442695, %v4187_v59  ;;  %v4166_v5 = vsub.f32 %v7491_v21, %v7593_v11  ;;  %v7605_v17 = vpop.f32.mrb[41].mxu0  ;;  %v4190_v32 = vsub.f32 %v5305_v9, %v7593_v11 }
 0x265   :  { %v3611_v49 = vmul.f32 %v5501_v20, %v7506_v57  ;;  %v3627_v15 = vmul.f32 %v5501_v20, %v7508_v3  ;;  %5516 = vpow2.f32 %v4175_v52  ;;  %v4165_v34 = vsub.f32 %v7494_v10, %v7596_v1 }
 0x266   :  { %v5503_v54 = vpop.eup %5502  ;;  %5518 = vpow2.f32 %v4199_v41  ;;  %v4179_v0 = vmul.f32 1.442695, %v4166_v5  ;;  %v4189_v13 = vsub.f32 %v4134_v56, %v7596_v1  ;;  %v4203_v7 = vmul.f32 1.442695, %v4190_v32 }
 0x267   :  { %v7613_v25 = vadd.f32 %v5503_v54, %v3611_v49  ;;  %v7615_v21 = vadd.f32 %v5503_v54, %v3627_v15  ;;  %5520 = vpow2.f32 %v4173_v35  ;;  %v7617_v57 = vpop.f32.mrb[42].mxu0  ;;  %v4177_v61 = vmul.f32 1.442695, %v4165_v34 }
 0x268   :  { %v5505_v3 = vpop.eup %5504  ;;  %5522 = vpow2.f32 %v4197_v6  ;;  %v4201_v9 = vmul.f32 1.442695, %v4189_v13  ;;  %v4168_v22 = vsub.f32 %v7511_v4, %v7599_v37  ;;  %v7621_v58 = vpop.f32.mrb[43].mxu0  ;;  %v4192_v53 = vsub.f32 %v5308_v14, %v7599_v37 }
 0x269   :  { %v3610_v10 = vmul.f32 %v5505_v3, %v7516_v23  ;;  %v3626_v56 = vmul.f32 %v5505_v3, %v7518_v42  ;;  %5524 = vpow2.f32 %v4179_v0  ;;  %v7628_v62 = vmax.f32 %v7514_v50, %v7587_v44 }
 0x26a   :  { %v5507_v2 = vpop.eup %5506  ;;  %5526 = vpow2.f32 %v4203_v7  ;;  %v4183_v63 = vmul.f32 1.442695, %v4168_v22  ;;  %v4767_v38 = vmax.f32 %v7521_v31, %v7601_v46  ;;  %v4207_v23 = vmul.f32 1.442695, %v4192_v53 }
 0x26b   :  { %v5509_v4 = vpop.eup %5508  ;;  %v7632_v8 = vadd.f32 %v5507_v2, %v3610_v10  ;;  %v7634_v45 = vadd.f32 %v5507_v2, %v3626_v56  ;;  %5528 = vpow2.f32 %v4177_v61  ;;  %v7636_v42 = vpop.f32.mrb[44].mxu0  ;;  %v4167_v18 = vsub.f32 %v7514_v50, %v7628_v62 }
 0x26c   :  { %v5511_v51 = vpop.eup %5510  ;;  %v4210_v14 = vmul.f32 %v5509_v4, %v7535_v40  ;;  %v4226_v60 = vmul.f32 %v5509_v4, %v7537_v43  ;;  %5530 = vpow2.f32 %v4201_v9  ;;  %v7642_v52 = vpop.f32.mrb[45].mxu0  ;;  %v4191_v59 = vsub.f32 %v7587_v44, %v7628_v62 }
 0x26d   :  { %v5513_v26 = vpop.eup %5512  ;;  %v4234_v48 = vmul.f32 2.0, %v5511_v51  ;;  %5532 = vpow2.f32 %v4183_v63  ;;  %v4775_v41 = vsub.f32 %v7521_v31, %v4767_v38  ;;  %v4181_v49 = vmul.f32 1.442695, %v4167_v18 }
 0x26e   :  { %v5515_v20 = vpop.eup %5514  ;;  %v7647_v35 = vadd.f32 %v5511_v51, %v4210_v14  ;;  %v4209_v40 = vmul.f32 %v5513_v26, %v7542_v16  ;;  %v4225_v43 = vmul.f32 %v5513_v26, %v7544_v55  ;;  %5534 = vpow2.f32 %v4207_v23 }
 0x26f   :  { %v5517_v6 = vpop.eup %5516  ;;  %v7651_v50 = vadd.f32 %v4234_v48, %v4226_v60  ;;  %v4233_v5 = vmul.f32 2.0, %v5515_v20  ;;  %v4205_v15 = vmul.f32 1.442695, %v4191_v59  ;;  %v7653_v32 = vpop.f32.mrb[46].mxu0  ;;  %v4784_v34 = vmul.f32 1.442695, %v4775_v41 }
 0x270   :  { %v5519_v54 = vpop.eup %5518  ;;  %v7655_v44 = vadd.f32 %v5515_v20, %v4209_v40  ;;  %v4212_v31 = vmul.f32 %v5517_v6, %v7548_v39  ;;  %v4228_v0 = vmul.f32 %v5517_v6, %v7550_v27  ;;  %v7659_v16 = vpop.f32.mrb[47].mxu0  ;;  %5536 = vpow2.f32 %v4181_v49 }
 0x271   :  { %v5521_v55 = vpop.eup %5520  ;;  %v7661_v13 = vadd.f32 %v4233_v5, %v4225_v43  ;;  %v4236_v7 = vmul.f32 2.0, %v5519_v54  ;;  %v4799_v3 = vsub.f32 %v7601_v46, %v4767_v38  ;;  %5538 = vpow2.f32 %v4205_v15 }
 0x272   :  { %v5523_v61 = vpop.eup %5522  ;;  %v7664_v9 = vadd.f32 %v5519_v54, %v4212_v31  ;;  %v4211_v22 = vmul.f32 %v5521_v55, %v7564_v12  ;;  %v4227_v10 = vmul.f32 %v5521_v55, %v7566_v28  ;;  %5540 = vpow2.f32 %v4784_v34 }
 0x273   :  { %v5525_v39 = vpop.eup %5524  ;;  %v7668_v27 = vadd.f32 %v4236_v7, %v4228_v0  ;;  %v4235_v56 = vmul.f32 2.0, %v5523_v61  ;;  %v4808_v53 = vmul.f32 1.442695, %v4799_v3  ;;  %v4766_v38 = vmax.f32 %v7556_v19, %v7605_v17 }
 0x274   :  { %v5527_v2 = vpop.eup %5526  ;;  %v7670_v63 = vadd.f32 %v5523_v61, %v4211_v22  ;;  %v4214_v4 = vmul.f32 %v5525_v39, %v7576_v33  ;;  %v4230_v46 = vmul.f32 %v5525_v39, %v7578_v36  ;;  %v4769_v51 = vmax.f32 %v7559_v24, %v7617_v57 }
 0x275   :  { %v5529_v12 = vpop.eup %5528  ;;  %v7676_v23 = vadd.f32 %v4235_v56, %v4227_v10  ;;  %v4238_v28 = vmul.f32 2.0, %v5527_v2  ;;  %5542 = vpow2.f32 %v4808_v53  ;;  %v4774_v36 = vsub.f32 %v7556_v19, %v4766_v38 }
 0x276   :  { %v5531_v14 = vpop.eup %5530  ;;  %v7680_v60 = vadd.f32 %v5527_v2, %v4214_v4  ;;  %v4213_v18 = vmul.f32 %v5529_v12, %v7582_v47  ;;  %v4229_v33 = vmul.f32 %v5529_v12, %v7584_v30  ;;  %v4798_v41 = vsub.f32 %v7605_v17, %v4766_v38 }
 0x277   :  { %v5533_v26 = vpop.eup %5532  ;;  %v7685_v48 = vadd.f32 %v4238_v28, %v4230_v46  ;;  %v4237_v59 = vmul.f32 2.0, %v5531_v14  ;;  %v4777_v20 = vsub.f32 %v7559_v24, %v4769_v51  ;;  %v4782_v47 = vmul.f32 1.442695, %v4774_v36 }
 0x278   :  { %v5535_v40 = vpop.eup %5534  ;;  %v7689_v43 = vadd.f32 %v5531_v14, %v4213_v18  ;;  %v4216_v6 = vmul.f32 %v5533_v26, %v7613_v25  ;;  %v4232_v5 = vmul.f32 %v5533_v26, %v7615_v21  ;;  %v4806_v19 = vmul.f32 1.442695, %v4798_v41 }
 0x279   :  { %v7693_v49 = vadd.f32 %v4237_v59, %v4229_v33  ;;  %v4240_v30 = vmul.f32 2.0, %v5535_v40  ;;  %v4788_v15 = vmul.f32 1.442695, %v4777_v20  ;;  %5544 = vpow2.f32 %v4782_v47 }
 0x27a   :  { %v7695_v54 = vadd.f32 %v5535_v40, %v4216_v6  ;;  %v4801_v17 = vsub.f32 %v7617_v57, %v4769_v51  ;;  %v4768_v24 = vmax.f32 %v7562_v29, %v7621_v58  ;;  %v5537_v31 = vpop.eup %5536  ;;  %5546 = vpow2.f32 %v4806_v19 }
 0x27b   :  { %v7700_v0 = vadd.f32 %v4240_v30, %v4232_v5  ;;  %v4771_v25 = vmax.f32 %v7593_v11, %v7636_v42  ;;  %v4770_v21 = vmax.f32 %v7596_v1, %v7642_v52  ;;  %v5539_v34 = vpop.eup %5538  ;;  %v4215_v55 = vmul.f32 %v5537_v31, %v7632_v8 }
 0x27c   :  { %v4231_v7 = vmul.f32 %v5537_v31, %v7634_v45  ;;  %5548 = vpow2.f32 %v4788_v15  ;;  %v4812_v57 = vmul.f32 1.442695, %v4801_v17  ;;  %v5541_v3 = vpop.eup %5540  ;;  %v4239_v61 = vmul.f32 2.0, %v5539_v34 }
 0x27d   :  { %v4776_v22 = vsub.f32 %v7562_v29, %v4768_v24  ;;  %v4800_v10 = vsub.f32 %v7621_v58, %v4768_v24  ;;  %v4779_v39 = vsub.f32 %v7593_v11, %v4771_v25  ;;  %v7711_v56 = vadd.f32 %v5539_v34, %v4215_v55 }
 0x27e   :  { %v4823_v53 = vmul.f32 %v5541_v3, %v7647_v35  ;;  %v4839_v2 = vmul.f32 %v5541_v3, %v7651_v50  ;;  %5550 = vpow2.f32 %v4812_v57  ;;  %v7715_v4 = vadd.f32 %v4239_v61, %v4231_v7 }
 0x27f   :  { %v5543_v8 = vpop.eup %5542  ;;  %v4786_v45 = vmul.f32 1.442695, %v4776_v22  ;;  %v4810_v46 = vmul.f32 1.442695, %v4800_v10  ;;  %v4792_v38 = vmul.f32 1.442695, %v4779_v39  ;;  %v4803_v29 = vsub.f32 %v7636_v42, %v4771_v25 }
 0x280   :  { %v4831_v12 = vadd.f32 %v5543_v8, %v4823_v53  ;;  %v4847_v28 = vmul.f32 3.0, %v5543_v8  ;;  %v4778_v58 = vsub.f32 %v7596_v1, %v4770_v21  ;;  %v4802_v11 = vsub.f32 %v7642_v52, %v4770_v21 }
 0x281   :  { %5552 = vpow2.f32 %v4786_v45  ;;  %v4773_v35 = vmax.f32 %v7599_v37, %v7653_v32  ;;  %v4772_v50 = vmax.f32 %v7628_v62, %v7659_v16  ;;  %v4816_v14 = vmul.f32 1.442695, %v4803_v29 }
 0x282   :  { %v4855_v51 = vadd.f32 %v4847_v28, %v4839_v2  ;;  %5554 = vrcp.f32 %v4831_v12  ;;  %v4790_v18 = vmul.f32 1.442695, %v4778_v58  ;;  %v4814_v33 = vmul.f32 1.442695, %v4802_v11 }
 0x283   :  { %5556 = vpow2.f32 %v4810_v46  ;;  %v4781_v36 = vsub.f32 %v7599_v37, %v4773_v35  ;;  %v4805_v42 = vsub.f32 %v7653_v32, %v4773_v35  ;;  %v5545_v1 = vpop.eup %5544  ;;  %v4780_v52 = vsub.f32 %v7628_v62, %v4772_v50 }
 0x284   :  { %5558 = vpow2.f32 %v4792_v38  ;;  %v4804_v26 = vsub.f32 %v7659_v16, %v4772_v50  ;;  %v5547_v59 = vpop.eup %5546  ;;  %v4822_v41 = vmul.f32 %v5545_v1, %v7655_v44  ;;  %v4838_v20 = vmul.f32 %v5545_v1, %v7661_v13 }
 0x285   :  { %5560 = vpow2.f32 %v4816_v14  ;;  %v4796_v40 = vmul.f32 1.442695, %v4781_v36  ;;  %v4846_v5 = vmul.f32 3.0, %v5547_v59  ;;  %v4820_v47 = vmul.f32 1.442695, %v4805_v42 }
 0x286   :  { %v5549_v6 = vpop.eup %5548  ;;  %5562 = vpow2.f32 %v4790_v18  ;;  %v4830_v37 = vadd.f32 %v5547_v59, %v4822_v41  ;;  %v4794_v16 = vmul.f32 1.442695, %v4780_v52  ;;  %v4818_v13 = vmul.f32 1.442695, %v4804_v26 }
 0x287   :  { %v4825_v32 = vmul.f32 %v5549_v6, %v7664_v9  ;;  %v4841_v30 = vmul.f32 %v5549_v6, %v7668_v27  ;;  %5564 = vpow2.f32 %v4814_v33  ;;  %v4854_v19 = vadd.f32 %v4846_v5, %v4838_v20 }
 0x288   :  { %v5551_v62 = vpop.eup %5550  ;;  %5566 = vpow2.f32 %v4796_v40 }
 0x289   :  { %5568 = vrcp.f32 %v4830_v37  ;;  %v4833_v44 = vadd.f32 %v5551_v62, %v4825_v32  ;;  %v4849_v15 = vmul.f32 3.0, %v5551_v62 }
 0x28a   :  { %5570 = vpow2.f32 %v4820_v47 }
 0x28b   :  { %v5553_v17 = vpop.eup %5552  ;;  %v4857_v24 = vadd.f32 %v4849_v15, %v4841_v30  ;;  %5572 = vrcp.f32 %v4833_v44 }
 0x28c   :  { %v5555_v31 = vpop.eup %5554  ;;  %v4824_v25 = vmul.f32 %v5553_v17, %v7670_v63  ;;  %v4840_v9 = vmul.f32 %v5553_v17, %v7676_v23  ;;  %5574 = vpow2.f32 %v4794_v16 }
 0x28d   :  { %v5557_v27 = vpop.eup %5556  ;;  %v4865_v21 = vmul.f32 %v5555_v31, %v4855_v51  ;;  %5576 = vpow2.f32 %v4818_v13 }
 0x28e   :  { %v5559_v34 = vpop.eup %5558  ;;  %v4832_v55 = vadd.f32 %v5557_v27, %v4824_v25  ;;  %v4848_v7 = vmul.f32 3.0, %v5557_v27 }
 0x28f   :  { %v5561_v57 = vpop.eup %5560  ;;  %4880 = vst.msk [vmem:[%s7783_s9 + $0x8] sm:$0xff] %vm4878_vm10, %v4865_v21  ;;  %v4827_v3 = vmul.f32 %v5559_v34, %v7680_v60  ;;  %v4843_v61 = vmul.f32 %v5559_v34, %v7685_v48 }
 0x290   :  { %v5563_v63 = vpop.eup %5562  ;;  %v4856_v22 = vadd.f32 %v4848_v7, %v4840_v9  ;;  %5578 = vrcp.f32 %v4832_v55  ;;  %v4851_v23 = vmul.f32 3.0, %v5561_v57 }
 0x291   :  { %v5565_v10 = vpop.eup %5564  ;;  %v4835_v39 = vadd.f32 %v5561_v57, %v4827_v3  ;;  %v4826_v53 = vmul.f32 %v5563_v63, %v7689_v43  ;;  %v4842_v2 = vmul.f32 %v5563_v63, %v7693_v49 }
 0x292   :  { %v5567_v8 = vpop.eup %5566  ;;  %v4859_v45 = vadd.f32 %v4851_v23, %v4843_v61  ;;  %v4850_v46 = vmul.f32 3.0, %v5565_v10 }
 0x293   :  { %v5569_v38 = vpop.eup %5568  ;;  %5580 = vrcp.f32 %v4835_v39  ;;  %v4834_v12 = vadd.f32 %v5565_v10, %v4826_v53  ;;  %v4829_v60 = vmul.f32 %v5567_v8, %v7695_v54  ;;  %v4845_v48 = vmul.f32 %v5567_v8, %v7700_v0 }
 0x294   :  { %v5571_v28 = vpop.eup %5570  ;;  %v4863_v29 = vmul.f32 %v5569_v38, %v4854_v19  ;;  %v4858_v58 = vadd.f32 %v4850_v46, %v4842_v2 }
 0x295   :  { %v5573_v11 = vpop.eup %5572  ;;  %5582 = vrcp.f32 %v4834_v12  ;;  %v4837_v35 = vadd.f32 %v5571_v28, %v4829_v60  ;;  %v4853_v50 = vmul.f32 3.0, %v5571_v28 }
 0x296   :  { %v5575_v43 = vpop.eup %5574  ;;  %4879 = vst.msk [vmem:[%s7783_s9] sm:$0xff] %vm4878_vm10, %v4863_v29  ;;  %v4869_v49 = vmul.f32 %v5573_v11, %v4857_v24 }
 0x297   :  { %v5577_v51 = vpop.eup %5576  ;;  %v4861_v14 = vadd.f32 %v4853_v50, %v4845_v48  ;;  %5584 = vrcp.f32 %v4837_v35  ;;  %v4828_v54 = vmul.f32 %v5575_v43, %v7711_v56  ;;  %v4844_v0 = vmul.f32 %v5575_v43, %v7715_v4 }
 0x298   :  { %4882 = vst.msk [vmem:[%s7783_s9 + $0x18] sm:$0xff] %vm4878_vm10, %v4869_v49  ;;  %v4852_v18 = vmul.f32 3.0, %v5577_v51 }
 0x299   :  { %v4836_v33 = vadd.f32 %v5577_v51, %v4828_v54 }
 0x29a   :  { %v5579_v36 = vpop.eup %5578  ;;  %v4860_v42 = vadd.f32 %v4852_v18, %v4844_v0 }
 0x29b   :  { %v4867_v1 = vmul.f32 %v5579_v36, %v4856_v22  ;;  %5586 = vrcp.f32 %v4836_v33 }
 0x29d   :  { %v5581_v52 = vpop.eup %5580  ;;  %4881 = vst.msk [vmem:[%s7783_s9 + $0x10] sm:$0xff] %vm4878_vm10, %v4867_v1 }
 0x29e   :  { %v4873_v56 = vmul.f32 %v5581_v52, %v4859_v45 }
 0x29f   :  { %v5583_v26 = vpop.eup %5582 }
 0x2a0   :  { %4884 = vst.msk [vmem:[%s7783_s9 + $0x28] sm:$0xff] %vm4878_vm10, %v4873_v56  ;;  %v4871_v4 = vmul.f32 %v5583_v26, %v4858_v58 }
 0x2a1   :  { %v5585_v59 = vpop.eup %5584 }
 0x2a2   :  { %4883 = vst.msk [vmem:[%s7783_s9 + $0x20] sm:$0xff] %vm4878_vm10, %v4871_v4  ;;  %v4877_v41 = vmul.f32 %v5585_v59, %v4861_v14 }
 0x2a4   :  { %4886 = vst.msk [vmem:[%s7783_s9 + $0x38] sm:$0xff] %vm4878_vm10, %v4877_v41 }
 0x2a5   :  { %v5587_v20 = vpop.eup %5586 }
 0x2a6   :  { %v4875_v40 = vmul.f32 %v5587_v20, %v4860_v42 }
 0x2a8   :  { %4885 = vst.msk [vmem:[%s7783_s9 + $0x30] sm:$0xff] %vm4878_vm10, %v4875_v40 }

</bundles_post_ra>
